<compile_context>
chip_gen: v7x
topology: tpu7x:2x2x1
jax: 0.10.0
libtpu: 0.0.40
codegen_flags: <defaults>
</compile_context>

<pallas_src>
import functools

import numpy as np
import jax
import jax.numpy as jnp
from jax.experimental import pallas as pl
from jax.experimental.pallas import tpu as pltpu


def _round_up(x, m):
    return (x + m - 1) // m * m


# ----------------------------- Pallas kernels -----------------------------

def _matmul_fused_kernel(*refs, relu, has_side):
    """acc = x @ w (bf16 in, f32 acc); epilogue: *scale + bias (+ side) (+ ReLU)."""
    if has_side:
        x_ref, w_ref, s_ref, b_ref, side_ref, o_ref, acc_ref = refs
    else:
        x_ref, w_ref, s_ref, b_ref, o_ref, acc_ref = refs
        side_ref = None

    k = pl.program_id(2)

    @pl.when(k == 0)
    def _():
        acc_ref[...] = jnp.zeros_like(acc_ref)

    acc_ref[...] += jnp.dot(x_ref[...], w_ref[...],
                            preferred_element_type=jnp.float32)

    @pl.when(k == pl.num_programs(2) - 1)
    def _():
        out = acc_ref[...] * s_ref[...] + b_ref[...]
        if has_side:
            out = out + side_ref[...]
        if relu:
            out = jnp.maximum(out, 0.0)
        o_ref[...] = out.astype(o_ref.dtype)


def matmul_fused(x, w, scale, bias, *, relu=False, side=None):
    """out = relu?((x @ w) * scale + bias [+ side]); scale/bias per output column.

    x, w are cast to bf16 for the MXU; accumulation and epilogue are f32.
    """
    M, K = x.shape
    K2, N = w.shape
    assert K == K2

    x = x.astype(jnp.bfloat16)
    w = w.astype(jnp.bfloat16)

    Np = _round_up(N, 128)
    Kp = _round_up(K, 128)

    # Tile selection: 256-wide N / up-to-512 K tiles when divisible, else 128.
    tn = 256 if Np % 256 == 0 else 128
    if Kp % 512 == 0:
        tk = 512
    elif Kp % 256 == 0:
        tk = 256
    else:
        tk = 128
    if M > 256:
        tm = 256
        Mp = _round_up(M, 256)
    else:
        Mp = _round_up(M, 8)
        tm = Mp

    # Single pad op for the activation (constant-folded for weights under jit).
    xp = jnp.pad(x, ((0, Mp - M), (0, Kp - K)))
    wp = jnp.pad(w, ((0, Kp - K), (0, Np - N)))
    sp = jnp.pad(scale.astype(jnp.float32).reshape(1, N), ((0, 0), (0, Np - N)))
    bp = jnp.pad(bias.astype(jnp.float32).reshape(1, N), ((0, 0), (0, Np - N)))

    operands = [xp, wp, sp, bp]
    # TODO(synk): pl.Buffered(3) on the weight operand not used (pipeline_mode
    # availability varies across jax versions); default double-buffering is used.
    in_specs = [
        pl.BlockSpec((tm, tk), lambda i, j, k: (i, k)),
        pl.BlockSpec((tk, tn), lambda i, j, k: (k, j)),
        pl.BlockSpec((1, tn), lambda i, j, k: (0, j)),
        pl.BlockSpec((1, tn), lambda i, j, k: (0, j)),
    ]

    has_side = side is not None
    if has_side:
        sidep = jnp.pad(side.astype(jnp.float32), ((0, Mp - M), (0, Np - N)))
        operands.append(sidep)
        in_specs.append(pl.BlockSpec((tm, tn), lambda i, j, k: (i, j)))

    grid = (Mp // tm, Np // tn, Kp // tk)

    out = pl.pallas_call(
        functools.partial(_matmul_fused_kernel, relu=relu, has_side=has_side),
        out_shape=jax.ShapeDtypeStruct((Mp, Np), jnp.float32),
        grid_spec=pltpu.PrefetchScalarGridSpec(
            num_scalar_prefetch=0,
            grid=grid,
            in_specs=in_specs,
            out_specs=pl.BlockSpec((tm, tn), lambda i, j, k: (i, j)),
            scratch_shapes=[pltpu.VMEM((tm, tn), jnp.float32)],
        ),
        compiler_params=pltpu.CompilerParams(
            dimension_semantics=("parallel", "parallel", "arbitrary"),
            vmem_limit_bytes=32 * 1024 * 1024),
    )(*operands)
    return out[:M, :N]


def _attnpool_kernel(q_ref, k_ref, v_ref, o_ref, *, scale, valid_len):
    # q: (B, 1, hdp)   k, v: (B, Lp, hdp)   (B = batch * num_heads, 1 query token)
    q = q_ref[...] * scale
    k = k_ref[...]
    v = v_ref[...]
    s = jnp.einsum('bqd,bkd->bqk', q, k,
                   preferred_element_type=jnp.float32)        # (B, 1, Lp)
    col = jax.lax.broadcasted_iota(jnp.int32, s.shape, dimension=2)
    s = jnp.where(col < valid_len, s, -jnp.inf)
    m = jnp.max(s, axis=-1, keepdims=True)
    p = jnp.exp(s - m)
    denom = jnp.sum(p, axis=-1, keepdims=True)
    p = p * pl.reciprocal(denom, approx=True)
    o = jnp.einsum('bqk,bkd->bqd', p, v,
                   preferred_element_type=jnp.float32)        # (B, 1, hdp)
    o_ref[...] = o.astype(o_ref.dtype)


def attention_pool_core(qh, kh, vh, scale):
    # qh: (B, 1, hd)   kh, vh: (B, L, hd)
    B, L, hd = kh.shape
    Lp = _round_up(L, 128)
    hdp = _round_up(hd, 128)
    qp = jnp.pad(qh.astype(jnp.float32), ((0, 0), (0, 0), (0, hdp - hd)))
    kp = jnp.pad(kh.astype(jnp.float32), ((0, 0), (0, Lp - L), (0, hdp - hd)))
    vp = jnp.pad(vh.astype(jnp.float32), ((0, 0), (0, Lp - L), (0, hdp - hd)))
    out = pl.pallas_call(
        functools.partial(_attnpool_kernel, scale=scale, valid_len=L),
        out_shape=jax.ShapeDtypeStruct((B, 1, hdp), jnp.float32),
    )(qp, kp, vp)
    return out[:, 0, :hd]


# ------------------------------ JAX glue ------------------------------

def im2col(x, kh, kw, stride, padding):
    # TODO(synk): patch gather is still materialized in JAX (emitted in bf16);
    # full fusion of the (ki,kj,Cin) gather into the matmul K grid not implemented.
    N, H, W, C = x.shape
    xp = jnp.pad(x, ((0, 0), (padding, padding), (padding, padding), (0, 0)))
    Ho = (H + 2 * padding - kh) // stride + 1
    Wo = (W + 2 * padding - kw) // stride + 1
    cols = []
    for i in range(kh):
        for j in range(kw):
            cols.append(xp[:, i:i + stride * Ho:stride, j:j + stride * Wo:stride, :])
    patches = jnp.concatenate(cols, axis=-1)          # (N, Ho, Wo, kh*kw*C)
    return patches.reshape(N * Ho * Wo, kh * kw * C), (N, Ho, Wo)


def conv_bn(x, w, bn_scale, bn_bias, *, stride, padding, relu, side=None):
    # w in PyTorch layout (Cout, Cin, kh, kw)
    Cout, Cin, kh, kw = w.shape
    patches, (N, Ho, Wo) = im2col(x.astype(jnp.bfloat16), kh, kw, stride, padding)
    wm = jnp.transpose(w, (2, 3, 1, 0)).reshape(kh * kw * Cin, Cout)
    side2 = None if side is None else side.reshape(N * Ho * Wo, Cout)
    out = matmul_fused(patches, wm, bn_scale, bn_bias, relu=relu, side=side2)
    return out.reshape(N, Ho, Wo, Cout)


def avgpool2d(x, k):
    if k == 1:
        return x
    N, H, W, C = x.shape
    return x.reshape(N, H // k, k, W // k, k, C).mean(axis=(2, 4))


def bottleneck_forward(p, x):
    stride = p['stride']
    out = conv_bn(x, p['c1_w'], *p['bn1'], stride=1, padding=0, relu=True)
    out = conv_bn(out, p['c2_w'], *p['bn2'], stride=1, padding=1, relu=True)
    out = avgpool2d(out, stride)
    if 'down_w' in p:
        identity = avgpool2d(x, stride)
        identity = conv_bn(identity, p['down_w'], *p['dbn'],
                           stride=1, padding=0, relu=False)
    else:
        identity = x
    # bn3(conv3(out)) + identity, then ReLU -- fused into the matmul epilogue.
    return conv_bn(out, p['c3_w'], *p['bn3'], stride=1, padding=0,
                   relu=True, side=identity)


def attnpool_forward(p, x, num_heads):
    N, H, W, C = x.shape
    xs = x.reshape(N, H * W, C).transpose(1, 0, 2)                       # (HW, N, C)
    xs = jnp.concatenate([xs.mean(axis=0, keepdims=True), xs], axis=0)   # (L, N, C)
    xs = xs + p['pos'][:, None, :]
    L = xs.shape[0]
    ones_c = jnp.ones((C,), jnp.float32)
    xq = xs[0]                                                           # (N, C) query
    xf = xs.reshape(L * N, C)
    q = matmul_fused(xq, p['q_w'].T, ones_c, p['q_b'])
    k = matmul_fused(xf, p['k_w'].T, ones_c, p['k_b'])
    v = matmul_fused(xf, p['v_w'].T, ones_c, p['v_b'])
    hd = C // num_heads
    qh = q.reshape(N * num_heads, 1, hd)
    kh = k.reshape(L, N, num_heads, hd).transpose(1, 2, 0, 3).reshape(N * num_heads, L, hd)
    vh = v.reshape(L, N, num_heads, hd).transpose(1, 2, 0, 3).reshape(N * num_heads, L, hd)
    o = attention_pool_core(qh, kh, vh, float(hd) ** -0.5)               # (N*h, hd)
    o = o.reshape(N, C)
    out_dim = p['c_w'].shape[0]
    return matmul_fused(o, p['c_w'].T, jnp.ones((out_dim,), jnp.float32), p['c_b'])


def model_forward(params, x_nchw):
    x = jnp.transpose(x_nchw.astype(jnp.float32), (0, 2, 3, 1))          # NCHW -> NHWC
    # stem
    x = conv_bn(x, params['conv1'], *params['bn1'], stride=2, padding=1, relu=True)
    x = conv_bn(x, params['conv2'], *params['bn2'], stride=1, padding=1, relu=True)
    x = conv_bn(x, params['conv3'], *params['bn3'], stride=1, padding=1, relu=True)
    x = avgpool2d(x, 2)
    for name in ('layer1', 'layer2', 'layer3', 'layer4'):
        for blk in params[name]:
            x = bottleneck_forward(blk, x)
    feature = attnpool_forward(params['attnpool'], x, params['heads'])
    cw, cb = params['classifier']
    classes = matmul_fused(feature, cw.T, jnp.ones((cw.shape[0],), jnp.float32), cb)
    if 'classifier2' in params:
        cw2, cb2 = params['classifier2']
        classes2 = matmul_fused(feature, cw2.T,
                                jnp.ones((cw2.shape[0],), jnp.float32), cb2)
        return feature, classes, classes2
    return feature, classes


# --------------------------- Parameter init ---------------------------

def init_params(seed, layers, output_dim, heads, input_resolution, width,
                num_classes, num_classes2=0):
    key = jax.random.PRNGKey(seed)
    counter = [0]

    def nk():
        counter[0] += 1
        return jax.random.fold_in(key, counter[0])

    def conv_w(cout, cin, kh, kw):
        fan_in = cin * kh * kw
        return jax.random.normal(nk(), (cout, cin, kh, kw), jnp.float32) / np.sqrt(fan_in)

    def bn(c):
        gamma = jax.random.uniform(nk(), (c,), jnp.float32, 0.5, 1.5)
        beta = jax.random.normal(nk(), (c,), jnp.float32) * 0.1
        mean = jax.random.normal(nk(), (c,), jnp.float32) * 0.1
        var = jax.random.uniform(nk(), (c,), jnp.float32, 0.5, 1.5)
        scale = gamma / jnp.sqrt(var + 1e-5)        # fold BN (inference mode)
        bias = beta - mean * scale
        return (scale, bias)

    def linear(out_f, in_f):
        w = jax.random.normal(nk(), (out_f, in_f), jnp.float32) * 0.02
        b = jax.random.normal(nk(), (out_f,), jnp.float32) * 0.01
        return (w, b)

    p = {'heads': heads}
    p['conv1'] = conv_w(width // 2, 3, 3, 3); p['bn1'] = bn(width // 2)
    p['conv2'] = conv_w(width // 2, width // 2, 3, 3); p['bn2'] = bn(width // 2)
    p['conv3'] = conv_w(width, width // 2, 3, 3); p['bn3'] = bn(width)

    inplanes = [width]

    def make_layer(planes, blocks, stride):
        blks = []
        strides = [stride] + [1] * (blocks - 1)
        for s in strides:
            b = {'stride': s}
            b['c1_w'] = conv_w(planes, inplanes[0], 1, 1); b['bn1'] = bn(planes)
            b['c2_w'] = conv_w(planes, planes, 3, 3); b['bn2'] = bn(planes)
            b['c3_w'] = conv_w(planes * 4, planes, 1, 1); b['bn3'] = bn(planes * 4)
            if s > 1 or inplanes[0] != planes * 4:
                b['down_w'] = conv_w(planes * 4, inplanes[0], 1, 1)
                b['dbn'] = bn(planes * 4)
            blks.append(b)
            inplanes[0] = planes * 4
        return blks

    p['layer1'] = make_layer(width, layers[0], 1)
    p['layer2'] = make_layer(width * 2, layers[1], 2)
    p['layer3'] = make_layer(width * 4, layers[2], 2)
    p['layer4'] = make_layer(width * 8, layers[3], 2)

    embed_dim = width * 32
    spacial = input_resolution // 32
    ap = {}
    ap['pos'] = jax.random.normal(nk(), (spacial * spacial + 1, embed_dim),
                                  jnp.float32) / np.sqrt(embed_dim)
    ap['q_w'], ap['q_b'] = linear(embed_dim, embed_dim)
    ap['k_w'], ap['k_b'] = linear(embed_dim, embed_dim)
    ap['v_w'], ap['v_b'] = linear(embed_dim, embed_dim)
    ap['c_w'], ap['c_b'] = linear(output_dim, embed_dim)
    p['attnpool'] = ap

    p['classifier'] = linear(num_classes, output_dim)
    if num_classes2 > 0:
        p['classifier2'] = linear(num_classes2, output_dim)
    return p


# ------------------------------- main -------------------------------

if __name__ == "__main__":
    layers = (1, 1, 1, 1)
    output_dim = 32
    heads = 4
    input_resolution = 32     # must be a multiple of 32 (total stride of the net)
    width = 8                 # embed_dim = width * 32 = 256
    num_classes = 10

    params = init_params(0, layers, output_dim, heads, input_resolution,
                         width, num_classes, num_classes2=0)

    x = jax.random.normal(jax.random.PRNGKey(0),
                          (2, 3, input_resolution, input_resolution),
                          jnp.float32)            # NCHW, like PyTorch

    fwd = jax.jit(lambda inp: model_forward(params, inp))
    feature, classes = fwd(x)
    jax.block_until_ready((feature, classes))
    assert feature.shape == (2, output_dim)
    assert classes.shape == (2, num_classes)
    assert bool(jnp.all(jnp.isfinite(feature))) and bool(jnp.all(jnp.isfinite(classes)))
    print("KERNEL_OK")
</pallas_src>

<mosaic_0001>
module attributes {stable_mosaic.version = 11 : i64} {
  func.func @_matmul_fused_kernel(%arg0: i32, %arg1: i32, %arg2: i32, %arg3: memref<256x128xbf16, #tpu.memory_space<vmem>>, %arg4: memref<128x128xbf16, #tpu.memory_space<vmem>>, %arg5: memref<1x128xf32, #tpu.memory_space<vmem>>, %arg6: memref<1x128xf32, #tpu.memory_space<vmem>>, %arg7: memref<256x128xf32, #tpu.memory_space<vmem>>, %arg8: memref<256x128xf32, #tpu.memory_space<vmem>>) attributes {dimension_semantics = [#tpu.dimension_semantics<parallel>, #tpu.dimension_semantics<parallel>, #tpu.dimension_semantics<arbitrary>], iteration_bounds = array<i64: 2, 1, 1>, scalar_prefetch = 0 : i64, scratch_operands = 1 : i64, tpu.core_type = #tpu.core_type<tc>, window_params = [{transform_indices = @transform_0, window_bounds = array<i64: 256, 128>}, {transform_indices = @transform_1, window_bounds = array<i64: 128, 128>}, {transform_indices = @transform_2, window_bounds = array<i64: 1, 128>}, {transform_indices = @transform_3, window_bounds = array<i64: 1, 128>}, {transform_indices = @transform_4, window_bounds = array<i64: 256, 128>}]} {
    %c0_i32 = arith.constant 0 : i32
    %0 = arith.cmpi eq, %arg2, %c0_i32 : i32
    %1 = arith.extui %0 : i1 to i32
    %c0_i32_0 = arith.constant 0 : i32
    %2 = arith.cmpi ne, %1, %c0_i32_0 : i32
    scf.if %2 {
      %cst_10 = arith.constant 0.000000e+00 : f32
      %12 = vector.broadcast %cst_10 : f32 to vector<256x128xf32>
      %c0_11 = arith.constant 0 : index
      %c0_12 = arith.constant 0 : index
      %13 = vector.load %arg8[%c0_11, %c0_12] : memref<256x128xf32, #tpu.memory_space<vmem>>, vector<256x128xf32>
      tpu.vector_store %arg8[%c0_11, %c0_12], %12 {strides = array<i32>} : memref<256x128xf32, #tpu.memory_space<vmem>>, vector<256x128xf32>,
    } else {
    }
    %c0 = arith.constant 0 : index
    %c0_1 = arith.constant 0 : index
    %3 = vector.load %arg8[%c0, %c0_1] : memref<256x128xf32, #tpu.memory_space<vmem>>, vector<256x128xf32>
    %c0_2 = arith.constant 0 : index
    %c0_3 = arith.constant 0 : index
    %4 = vector.load %arg3[%c0_2, %c0_3] : memref<256x128xbf16, #tpu.memory_space<vmem>>, vector<256x128xbf16>
    %c0_4 = arith.constant 0 : index
    %c0_5 = arith.constant 0 : index
    %5 = vector.load %arg4[%c0_4, %c0_5] : memref<128x128xbf16, #tpu.memory_space<vmem>>, vector<128x128xbf16>
    %cst = arith.constant dense<0.000000e+00> : vector<256x128xf32>
    %6 = tpu.matmul %4, %5, %cst {dimension_numbers = #tpu.dot_dimension_numbers<[1], [0], [0], [1], [0, 0, 1, 1], [], []>} : vector<256x128xbf16>, vector<128x128xbf16>, vector<256x128xf32> -> vector<256x128xf32>
    %7 = arith.addf %3, %6 : vector<256x128xf32>
    %c0_6 = arith.constant 0 : index
    %c0_7 = arith.constant 0 : index
    %8 = vector.load %arg8[%c0_6, %c0_7] : memref<256x128xf32, #tpu.memory_space<vmem>>, vector<256x128xf32>
    tpu.vector_store %arg8[%c0_6, %c0_7], %7 {strides = array<i32>} : memref<256x128xf32, #tpu.memory_space<vmem>>, vector<256x128xf32>,
    %c0_i32_8 = arith.constant 0 : i32
    %9 = arith.cmpi eq, %arg2, %c0_i32_8 : i32
    %10 = arith.extui %9 : i1 to i32
    %c0_i32_9 = arith.constant 0 : i32
    %11 = arith.cmpi ne, %10, %c0_i32_9 : i32
    scf.if %11 {
      %c0_10 = arith.constant 0 : index
      %c0_11 = arith.constant 0 : index
      %12 = vector.load %arg8[%c0_10, %c0_11] : memref<256x128xf32, #tpu.memory_space<vmem>>, vector<256x128xf32>
      %c0_12 = arith.constant 0 : index
      %c0_13 = arith.constant 0 : index
      %13 = vector.load %arg5[%c0_12, %c0_13] : memref<1x128xf32, #tpu.memory_space<vmem>>, vector<1x128xf32>
      %14 = vector.broadcast %13 : vector<1x128xf32> to vector<256x128xf32>
      %15 = arith.mulf %12, %14 : vector<256x128xf32>
      %c0_14 = arith.constant 0 : index
      %c0_15 = arith.constant 0 : index
      %16 = vector.load %arg6[%c0_14, %c0_15] : memref<1x128xf32, #tpu.memory_space<vmem>>, vector<1x128xf32>
      %17 = vector.broadcast %16 : vector<1x128xf32> to vector<256x128xf32>
      %18 = arith.addf %15, %17 : vector<256x128xf32>
      %cst_16 = arith.constant 0.000000e+00 : f32
      %19 = vector.broadcast %cst_16 : f32 to vector<256x128xf32>
      %20 = arith.maximumf %18, %19 : vector<256x128xf32>
      %c0_17 = arith.constant 0 : index
      %c0_18 = arith.constant 0 : index
      %21 = vector.load %arg7[%c0_17, %c0_18] : memref<256x128xf32, #tpu.memory_space<vmem>>, vector<256x128xf32>
      tpu.vector_store %arg7[%c0_17, %c0_18], %20 {strides = array<i32>} : memref<256x128xf32, #tpu.memory_space<vmem>>, vector<256x128xf32>,
    } else {
    }
    return
  }
  func.func @transform_0(%arg0: i32, %arg1: i32, %arg2: i32) -> (i32, i32) {
    %c0_i32 = arith.constant 0 : i32
    return %arg0, %arg2 : i32, i32
  }
  func.func @transform_1(%arg0: i32, %arg1: i32, %arg2: i32) -> (i32, i32) {
    %c0_i32 = arith.constant 0 : i32
    return %arg2, %arg1 : i32, i32
  }
  func.func @transform_2(%arg0: i32, %arg1: i32, %arg2: i32) -> (i32, i32) {
    %c0_i32 = arith.constant 0 : i32
    %c0_i32_0 = arith.constant 0 : i32
    return %c0_i32, %arg1 : i32, i32
  }
  func.func @transform_3(%arg0: i32, %arg1: i32, %arg2: i32) -> (i32, i32) {
    %c0_i32 = arith.constant 0 : i32
    %c0_i32_0 = arith.constant 0 : i32
    return %c0_i32, %arg1 : i32, i32
  }
  func.func @transform_4(%arg0: i32, %arg1: i32, %arg2: i32) -> (i32, i32) {
    %c0_i32 = arith.constant 0 : i32
    return %arg0, %arg1 : i32, i32
  }
}

module attributes {stable_mosaic.version = 11 : i64} {
  func.func @_matmul_fused_kernel(%arg0: i32, %arg1: i32, %arg2: i32, %arg3: memref<128x128xbf16, #tpu.memory_space<vmem>>, %arg4: memref<128x128xbf16, #tpu.memory_space<vmem>>, %arg5: memref<1x128xf32, #tpu.memory_space<vmem>>, %arg6: memref<1x128xf32, #tpu.memory_space<vmem>>, %arg7: memref<128x128xf32, #tpu.memory_space<vmem>>, %arg8: memref<128x128xf32, #tpu.memory_space<vmem>>) attributes {dimension_semantics = [#tpu.dimension_semantics<parallel>, #tpu.dimension_semantics<parallel>, #tpu.dimension_semantics<arbitrary>], iteration_bounds = array<i64: 1, 1, 1>, scalar_prefetch = 0 : i64, scratch_operands = 1 : i64, tpu.core_type = #tpu.core_type<tc>, window_params = [{transform_indices = @transform_0, window_bounds = array<i64: 128, 128>}, {transform_indices = @transform_1, window_bounds = array<i64: 128, 128>}, {transform_indices = @transform_2, window_bounds = array<i64: 1, 128>}, {transform_indices = @transform_3, window_bounds = array<i64: 1, 128>}, {transform_indices = @transform_4, window_bounds = array<i64: 128, 128>}]} {
    %c0_i32 = arith.constant 0 : i32
    %0 = arith.cmpi eq, %arg2, %c0_i32 : i32
    %1 = arith.extui %0 : i1 to i32
    %c0_i32_0 = arith.constant 0 : i32
    %2 = arith.cmpi ne, %1, %c0_i32_0 : i32
    scf.if %2 {
      %cst_10 = arith.constant 0.000000e+00 : f32
      %12 = vector.broadcast %cst_10 : f32 to vector<128x128xf32>
      %c0_11 = arith.constant 0 : index
      %c0_12 = arith.constant 0 : index
      %13 = vector.load %arg8[%c0_11, %c0_12] : memref<128x128xf32, #tpu.memory_space<vmem>>, vector<128x128xf32>
      tpu.vector_store %arg8[%c0_11, %c0_12], %12 {strides = array<i32>} : memref<128x128xf32, #tpu.memory_space<vmem>>, vector<128x128xf32>,
    } else {
    }
    %c0 = arith.constant 0 : index
    %c0_1 = arith.constant 0 : index
    %3 = vector.load %arg8[%c0, %c0_1] : memref<128x128xf32, #tpu.memory_space<vmem>>, vector<128x128xf32>
    %c0_2 = arith.constant 0 : index
    %c0_3 = arith.constant 0 : index
    %4 = vector.load %arg3[%c0_2, %c0_3] : memref<128x128xbf16, #tpu.memory_space<vmem>>, vector<128x128xbf16>
    %c0_4 = arith.constant 0 : index
    %c0_5 = arith.constant 0 : index
    %5 = vector.load %arg4[%c0_4, %c0_5] : memref<128x128xbf16, #tpu.memory_space<vmem>>, vector<128x128xbf16>
    %cst = arith.constant dense<0.000000e+00> : vector<128x128xf32>
    %6 = tpu.matmul %4, %5, %cst {dimension_numbers = #tpu.dot_dimension_numbers<[1], [0], [0], [1], [0, 0, 1, 1], [], []>} : vector<128x128xbf16>, vector<128x128xbf16>, vector<128x128xf32> -> vector<128x128xf32>
    %7 = arith.addf %3, %6 : vector<128x128xf32>
    %c0_6 = arith.constant 0 : index
    %c0_7 = arith.constant 0 : index
    %8 = vector.load %arg8[%c0_6, %c0_7] : memref<128x128xf32, #tpu.memory_space<vmem>>, vector<128x128xf32>
    tpu.vector_store %arg8[%c0_6, %c0_7], %7 {strides = array<i32>} : memref<128x128xf32, #tpu.memory_space<vmem>>, vector<128x128xf32>,
    %c0_i32_8 = arith.constant 0 : i32
    %9 = arith.cmpi eq, %arg2, %c0_i32_8 : i32
    %10 = arith.extui %9 : i1 to i32
    %c0_i32_9 = arith.constant 0 : i32
    %11 = arith.cmpi ne, %10, %c0_i32_9 : i32
    scf.if %11 {
      %c0_10 = arith.constant 0 : index
      %c0_11 = arith.constant 0 : index
      %12 = vector.load %arg8[%c0_10, %c0_11] : memref<128x128xf32, #tpu.memory_space<vmem>>, vector<128x128xf32>
      %c0_12 = arith.constant 0 : index
      %c0_13 = arith.constant 0 : index
      %13 = vector.load %arg5[%c0_12, %c0_13] : memref<1x128xf32, #tpu.memory_space<vmem>>, vector<1x128xf32>
      %14 = vector.broadcast %13 : vector<1x128xf32> to vector<128x128xf32>
      %15 = arith.mulf %12, %14 : vector<128x128xf32>
      %c0_14 = arith.constant 0 : index
      %c0_15 = arith.constant 0 : index
      %16 = vector.load %arg6[%c0_14, %c0_15] : memref<1x128xf32, #tpu.memory_space<vmem>>, vector<1x128xf32>
      %17 = vector.broadcast %16 : vector<1x128xf32> to vector<128x128xf32>
      %18 = arith.addf %15, %17 : vector<128x128xf32>
      %cst_16 = arith.constant 0.000000e+00 : f32
      %19 = vector.broadcast %cst_16 : f32 to vector<128x128xf32>
      %20 = arith.maximumf %18, %19 : vector<128x128xf32>
      %c0_17 = arith.constant 0 : index
      %c0_18 = arith.constant 0 : index
      %21 = vector.load %arg7[%c0_17, %c0_18] : memref<128x128xf32, #tpu.memory_space<vmem>>, vector<128x128xf32>
      tpu.vector_store %arg7[%c0_17, %c0_18], %20 {strides = array<i32>} : memref<128x128xf32, #tpu.memory_space<vmem>>, vector<128x128xf32>,
    } else {
    }
    return
  }
  func.func @transform_0(%arg0: i32, %arg1: i32, %arg2: i32) -> (i32, i32) {
    %c0_i32 = arith.constant 0 : i32
    return %arg0, %arg2 : i32, i32
  }
  func.func @transform_1(%arg0: i32, %arg1: i32, %arg2: i32) -> (i32, i32) {
    %c0_i32 = arith.constant 0 : i32
    return %arg2, %arg1 : i32, i32
  }
  func.func @transform_2(%arg0: i32, %arg1: i32, %arg2: i32) -> (i32, i32) {
    %c0_i32 = arith.constant 0 : i32
    %c0_i32_0 = arith.constant 0 : i32
    return %c0_i32, %arg1 : i32, i32
  }
  func.func @transform_3(%arg0: i32, %arg1: i32, %arg2: i32) -> (i32, i32) {
    %c0_i32 = arith.constant 0 : i32
    %c0_i32_0 = arith.constant 0 : i32
    return %c0_i32, %arg1 : i32, i32
  }
  func.func @transform_4(%arg0: i32, %arg1: i32, %arg2: i32) -> (i32, i32) {
    %c0_i32 = arith.constant 0 : i32
    return %arg0, %arg1 : i32, i32
  }
}

module attributes {stable_mosaic.version = 11 : i64} {
  func.func @_matmul_fused_kernel(%arg0: i32, %arg1: i32, %arg2: i32, %arg3: memref<128x128xbf16, #tpu.memory_space<vmem>>, %arg4: memref<128x128xbf16, #tpu.memory_space<vmem>>, %arg5: memref<1x128xf32, #tpu.memory_space<vmem>>, %arg6: memref<1x128xf32, #tpu.memory_space<vmem>>, %arg7: memref<128x128xf32, #tpu.memory_space<vmem>>, %arg8: memref<128x128xf32, #tpu.memory_space<vmem>>) attributes {dimension_semantics = [#tpu.dimension_semantics<parallel>, #tpu.dimension_semantics<parallel>, #tpu.dimension_semantics<arbitrary>], iteration_bounds = array<i64: 1, 1, 1>, scalar_prefetch = 0 : i64, scratch_operands = 1 : i64, tpu.core_type = #tpu.core_type<tc>, window_params = [{transform_indices = @transform_0, window_bounds = array<i64: 128, 128>}, {transform_indices = @transform_1, window_bounds = array<i64: 128, 128>}, {transform_indices = @transform_2, window_bounds = array<i64: 1, 128>}, {transform_indices = @transform_3, window_bounds = array<i64: 1, 128>}, {transform_indices = @transform_4, window_bounds = array<i64: 128, 128>}]} {
    %c0_i32 = arith.constant 0 : i32
    %0 = arith.cmpi eq, %arg2, %c0_i32 : i32
    %1 = arith.extui %0 : i1 to i32
    %c0_i32_0 = arith.constant 0 : i32
    %2 = arith.cmpi ne, %1, %c0_i32_0 : i32
    scf.if %2 {
      %cst_10 = arith.constant 0.000000e+00 : f32
      %12 = vector.broadcast %cst_10 : f32 to vector<128x128xf32>
      %c0_11 = arith.constant 0 : index
      %c0_12 = arith.constant 0 : index
      %13 = vector.load %arg8[%c0_11, %c0_12] : memref<128x128xf32, #tpu.memory_space<vmem>>, vector<128x128xf32>
      tpu.vector_store %arg8[%c0_11, %c0_12], %12 {strides = array<i32>} : memref<128x128xf32, #tpu.memory_space<vmem>>, vector<128x128xf32>,
    } else {
    }
    %c0 = arith.constant 0 : index
    %c0_1 = arith.constant 0 : index
    %3 = vector.load %arg8[%c0, %c0_1] : memref<128x128xf32, #tpu.memory_space<vmem>>, vector<128x128xf32>
    %c0_2 = arith.constant 0 : index
    %c0_3 = arith.constant 0 : index
    %4 = vector.load %arg3[%c0_2, %c0_3] : memref<128x128xbf16, #tpu.memory_space<vmem>>, vector<128x128xbf16>
    %c0_4 = arith.constant 0 : index
    %c0_5 = arith.constant 0 : index
    %5 = vector.load %arg4[%c0_4, %c0_5] : memref<128x128xbf16, #tpu.memory_space<vmem>>, vector<128x128xbf16>
    %cst = arith.constant dense<0.000000e+00> : vector<128x128xf32>
    %6 = tpu.matmul %4, %5, %cst {dimension_numbers = #tpu.dot_dimension_numbers<[1], [0], [0], [1], [0, 0, 1, 1], [], []>} : vector<128x128xbf16>, vector<128x128xbf16>, vector<128x128xf32> -> vector<128x128xf32>
    %7 = arith.addf %3, %6 : vector<128x128xf32>
    %c0_6 = arith.constant 0 : index
    %c0_7 = arith.constant 0 : index
    %8 = vector.load %arg8[%c0_6, %c0_7] : memref<128x128xf32, #tpu.memory_space<vmem>>, vector<128x128xf32>
    tpu.vector_store %arg8[%c0_6, %c0_7], %7 {strides = array<i32>} : memref<128x128xf32, #tpu.memory_space<vmem>>, vector<128x128xf32>,
    %c0_i32_8 = arith.constant 0 : i32
    %9 = arith.cmpi eq, %arg2, %c0_i32_8 : i32
    %10 = arith.extui %9 : i1 to i32
    %c0_i32_9 = arith.constant 0 : i32
    %11 = arith.cmpi ne, %10, %c0_i32_9 : i32
    scf.if %11 {
      %c0_10 = arith.constant 0 : index
      %c0_11 = arith.constant 0 : index
      %12 = vector.load %arg8[%c0_10, %c0_11] : memref<128x128xf32, #tpu.memory_space<vmem>>, vector<128x128xf32>
      %c0_12 = arith.constant 0 : index
      %c0_13 = arith.constant 0 : index
      %13 = vector.load %arg5[%c0_12, %c0_13] : memref<1x128xf32, #tpu.memory_space<vmem>>, vector<1x128xf32>
      %14 = vector.broadcast %13 : vector<1x128xf32> to vector<128x128xf32>
      %15 = arith.mulf %12, %14 : vector<128x128xf32>
      %c0_14 = arith.constant 0 : index
      %c0_15 = arith.constant 0 : index
      %16 = vector.load %arg6[%c0_14, %c0_15] : memref<1x128xf32, #tpu.memory_space<vmem>>, vector<1x128xf32>
      %17 = vector.broadcast %16 : vector<1x128xf32> to vector<128x128xf32>
      %18 = arith.addf %15, %17 : vector<128x128xf32>
      %c0_16 = arith.constant 0 : index
      %c0_17 = arith.constant 0 : index
      %19 = vector.load %arg7[%c0_16, %c0_17] : memref<128x128xf32, #tpu.memory_space<vmem>>, vector<128x128xf32>
      tpu.vector_store %arg7[%c0_16, %c0_17], %18 {strides = array<i32>} : memref<128x128xf32, #tpu.memory_space<vmem>>, vector<128x128xf32>,
    } else {
    }
    return
  }
  func.func @transform_0(%arg0: i32, %arg1: i32, %arg2: i32) -> (i32, i32) {
    %c0_i32 = arith.constant 0 : i32
    return %arg0, %arg2 : i32, i32
  }
  func.func @transform_1(%arg0: i32, %arg1: i32, %arg2: i32) -> (i32, i32) {
    %c0_i32 = arith.constant 0 : i32
    return %arg2, %arg1 : i32, i32
  }
  func.func @transform_2(%arg0: i32, %arg1: i32, %arg2: i32) -> (i32, i32) {
    %c0_i32 = arith.constant 0 : i32
    %c0_i32_0 = arith.constant 0 : i32
    return %c0_i32, %arg1 : i32, i32
  }
  func.func @transform_3(%arg0: i32, %arg1: i32, %arg2: i32) -> (i32, i32) {
    %c0_i32 = arith.constant 0 : i32
    %c0_i32_0 = arith.constant 0 : i32
    return %c0_i32, %arg1 : i32, i32
  }
  func.func @transform_4(%arg0: i32, %arg1: i32, %arg2: i32) -> (i32, i32) {
    %c0_i32 = arith.constant 0 : i32
    return %arg0, %arg1 : i32, i32
  }
}

module attributes {stable_mosaic.version = 11 : i64} {
  func.func @_matmul_fused_kernel(%arg0: i32, %arg1: i32, %arg2: i32, %arg3: memref<128x128xbf16, #tpu.memory_space<vmem>>, %arg4: memref<128x128xbf16, #tpu.memory_space<vmem>>, %arg5: memref<1x128xf32, #tpu.memory_space<vmem>>, %arg6: memref<1x128xf32, #tpu.memory_space<vmem>>, %arg7: memref<128x128xf32, #tpu.memory_space<vmem>>, %arg8: memref<128x128xf32, #tpu.memory_space<vmem>>, %arg9: memref<128x128xf32, #tpu.memory_space<vmem>>) attributes {dimension_semantics = [#tpu.dimension_semantics<parallel>, #tpu.dimension_semantics<parallel>, #tpu.dimension_semantics<arbitrary>], iteration_bounds = array<i64: 1, 1, 1>, scalar_prefetch = 0 : i64, scratch_operands = 1 : i64, tpu.core_type = #tpu.core_type<tc>, window_params = [{transform_indices = @transform_0, window_bounds = array<i64: 128, 128>}, {transform_indices = @transform_1, window_bounds = array<i64: 128, 128>}, {transform_indices = @transform_2, window_bounds = array<i64: 1, 128>}, {transform_indices = @transform_3, window_bounds = array<i64: 1, 128>}, {transform_indices = @transform_4, window_bounds = array<i64: 128, 128>}, {transform_indices = @transform_5, window_bounds = array<i64: 128, 128>}]} {
    %c0_i32 = arith.constant 0 : i32
    %0 = arith.cmpi eq, %arg2, %c0_i32 : i32
    %1 = arith.extui %0 : i1 to i32
    %c0_i32_0 = arith.constant 0 : i32
    %2 = arith.cmpi ne, %1, %c0_i32_0 : i32
    scf.if %2 {
      %cst_10 = arith.constant 0.000000e+00 : f32
      %12 = vector.broadcast %cst_10 : f32 to vector<128x128xf32>
      %c0_11 = arith.constant 0 : index
      %c0_12 = arith.constant 0 : index
      %13 = vector.load %arg9[%c0_11, %c0_12] : memref<128x128xf32, #tpu.memory_space<vmem>>, vector<128x128xf32>
      tpu.vector_store %arg9[%c0_11, %c0_12], %12 {strides = array<i32>} : memref<128x128xf32, #tpu.memory_space<vmem>>, vector<128x128xf32>,
    } else {
    }
    %c0 = arith.constant 0 : index
    %c0_1 = arith.constant 0 : index
    %3 = vector.load %arg9[%c0, %c0_1] : memref<128x128xf32, #tpu.memory_space<vmem>>, vector<128x128xf32>
    %c0_2 = arith.constant 0 : index
    %c0_3 = arith.constant 0 : index
    %4 = vector.load %arg3[%c0_2, %c0_3] : memref<128x128xbf16, #tpu.memory_space<vmem>>, vector<128x128xbf16>
    %c0_4 = arith.constant 0 : index
    %c0_5 = arith.constant 0 : index
    %5 = vector.load %arg4[%c0_4, %c0_5] : memref<128x128xbf16, #tpu.memory_space<vmem>>, vector<128x128xbf16>
    %cst = arith.constant dense<0.000000e+00> : vector<128x128xf32>
    %6 = tpu.matmul %4, %5, %cst {dimension_numbers = #tpu.dot_dimension_numbers<[1], [0], [0], [1], [0, 0, 1, 1], [], []>} : vector<128x128xbf16>, vector<128x128xbf16>, vector<128x128xf32> -> vector<128x128xf32>
    %7 = arith.addf %3, %6 : vector<128x128xf32>
    %c0_6 = arith.constant 0 : index
    %c0_7 = arith.constant 0 : index
    %8 = vector.load %arg9[%c0_6, %c0_7] : memref<128x128xf32, #tpu.memory_space<vmem>>, vector<128x128xf32>
    tpu.vector_store %arg9[%c0_6, %c0_7], %7 {strides = array<i32>} : memref<128x128xf32, #tpu.memory_space<vmem>>, vector<128x128xf32>,
    %c0_i32_8 = arith.constant 0 : i32
    %9 = arith.cmpi eq, %arg2, %c0_i32_8 : i32
    %10 = arith.extui %9 : i1 to i32
    %c0_i32_9 = arith.constant 0 : i32
    %11 = arith.cmpi ne, %10, %c0_i32_9 : i32
    scf.if %11 {
      %c0_10 = arith.constant 0 : index
      %c0_11 = arith.constant 0 : index
      %12 = vector.load %arg9[%c0_10, %c0_11] : memref<128x128xf32, #tpu.memory_space<vmem>>, vector<128x128xf32>
      %c0_12 = arith.constant 0 : index
      %c0_13 = arith.constant 0 : index
      %13 = vector.load %arg5[%c0_12, %c0_13] : memref<1x128xf32, #tpu.memory_space<vmem>>, vector<1x128xf32>
      %14 = vector.broadcast %13 : vector<1x128xf32> to vector<128x128xf32>
      %15 = arith.mulf %12, %14 : vector<128x128xf32>
      %c0_14 = arith.constant 0 : index
      %c0_15 = arith.constant 0 : index
      %16 = vector.load %arg6[%c0_14, %c0_15] : memref<1x128xf32, #tpu.memory_space<vmem>>, vector<1x128xf32>
      %17 = vector.broadcast %16 : vector<1x128xf32> to vector<128x128xf32>
      %18 = arith.addf %15, %17 : vector<128x128xf32>
      %c0_16 = arith.constant 0 : index
      %c0_17 = arith.constant 0 : index
      %19 = vector.load %arg7[%c0_16, %c0_17] : memref<128x128xf32, #tpu.memory_space<vmem>>, vector<128x128xf32>
      %20 = arith.addf %18, %19 : vector<128x128xf32>
      %cst_18 = arith.constant 0.000000e+00 : f32
      %21 = vector.broadcast %cst_18 : f32 to vector<128x128xf32>
      %22 = arith.maximumf %20, %21 : vector<128x128xf32>
      %c0_19 = arith.constant 0 : index
      %c0_20 = arith.constant 0 : index
      %23 = vector.load %arg8[%c0_19, %c0_20] : memref<128x128xf32, #tpu.memory_space<vmem>>, vector<128x128xf32>
      tpu.vector_store %arg8[%c0_19, %c0_20], %22 {strides = array<i32>} : memref<128x128xf32, #tpu.memory_space<vmem>>, vector<128x128xf32>,
    } else {
    }
    return
  }
  func.func @transform_0(%arg0: i32, %arg1: i32, %arg2: i32) -> (i32, i32) {
    %c0_i32 = arith.constant 0 : i32
    return %arg0, %arg2 : i32, i32
  }
  func.func @transform_1(%arg0: i32, %arg1: i32, %arg2: i32) -> (i32, i32) {
    %c0_i32 = arith.constant 0 : i32
    return %arg2, %arg1 : i32, i32
  }
  func.func @transform_2(%arg0: i32, %arg1: i32, %arg2: i32) -> (i32, i32) {
    %c0_i32 = arith.constant 0 : i32
    %c0_i32_0 = arith.constant 0 : i32
    return %c0_i32, %arg1 : i32, i32
  }
  func.func @transform_3(%arg0: i32, %arg1: i32, %arg2: i32) -> (i32, i32) {
    %c0_i32 = arith.constant 0 : i32
    %c0_i32_0 = arith.constant 0 : i32
    return %c0_i32, %arg1 : i32, i32
  }
  func.func @transform_4(%arg0: i32, %arg1: i32, %arg2: i32) -> (i32, i32) {
    %c0_i32 = arith.constant 0 : i32
    return %arg0, %arg1 : i32, i32
  }
  func.func @transform_5(%arg0: i32, %arg1: i32, %arg2: i32) -> (i32, i32) {
    %c0_i32 = arith.constant 0 : i32
    return %arg0, %arg1 : i32, i32
  }
}

module attributes {stable_mosaic.version = 11 : i64} {
  func.func @_matmul_fused_kernel(%arg0: i32, %arg1: i32, %arg2: i32, %arg3: memref<128x256xbf16, #tpu.memory_space<vmem>>, %arg4: memref<256x128xbf16, #tpu.memory_space<vmem>>, %arg5: memref<1x128xf32, #tpu.memory_space<vmem>>, %arg6: memref<1x128xf32, #tpu.memory_space<vmem>>, %arg7: memref<128x128xf32, #tpu.memory_space<vmem>>, %arg8: memref<128x128xf32, #tpu.memory_space<vmem>>) attributes {dimension_semantics = [#tpu.dimension_semantics<parallel>, #tpu.dimension_semantics<parallel>, #tpu.dimension_semantics<arbitrary>], iteration_bounds = array<i64: 1, 1, 1>, scalar_prefetch = 0 : i64, scratch_operands = 1 : i64, tpu.core_type = #tpu.core_type<tc>, window_params = [{transform_indices = @transform_0, window_bounds = array<i64: 128, 256>}, {transform_indices = @transform_1, window_bounds = array<i64: 256, 128>}, {transform_indices = @transform_2, window_bounds = array<i64: 1, 128>}, {transform_indices = @transform_3, window_bounds = array<i64: 1, 128>}, {transform_indices = @transform_4, window_bounds = array<i64: 128, 128>}]} {
    %c0_i32 = arith.constant 0 : i32
    %0 = arith.cmpi eq, %arg2, %c0_i32 : i32
    %1 = arith.extui %0 : i1 to i32
    %c0_i32_0 = arith.constant 0 : i32
    %2 = arith.cmpi ne, %1, %c0_i32_0 : i32
    scf.if %2 {
      %cst_10 = arith.constant 0.000000e+00 : f32
      %12 = vector.broadcast %cst_10 : f32 to vector<128x128xf32>
      %c0_11 = arith.constant 0 : index
      %c0_12 = arith.constant 0 : index
      %13 = vector.load %arg8[%c0_11, %c0_12] : memref<128x128xf32, #tpu.memory_space<vmem>>, vector<128x128xf32>
      tpu.vector_store %arg8[%c0_11, %c0_12], %12 {strides = array<i32>} : memref<128x128xf32, #tpu.memory_space<vmem>>, vector<128x128xf32>,
    } else {
    }
    %c0 = arith.constant 0 : index
    %c0_1 = arith.constant 0 : index
    %3 = vector.load %arg8[%c0, %c0_1] : memref<128x128xf32, #tpu.memory_space<vmem>>, vector<128x128xf32>
    %c0_2 = arith.constant 0 : index
    %c0_3 = arith.constant 0 : index
    %4 = vector.load %arg3[%c0_2, %c0_3] : memref<128x256xbf16, #tpu.memory_space<vmem>>, vector<128x256xbf16>
    %c0_4 = arith.constant 0 : index
    %c0_5 = arith.constant 0 : index
    %5 = vector.load %arg4[%c0_4, %c0_5] : memref<256x128xbf16, #tpu.memory_space<vmem>>, vector<256x128xbf16>
    %cst = arith.constant dense<0.000000e+00> : vector<128x128xf32>
    %6 = tpu.matmul %4, %5, %cst {dimension_numbers = #tpu.dot_dimension_numbers<[1], [0], [0], [1], [0, 0, 1, 1], [], []>} : vector<128x256xbf16>, vector<256x128xbf16>, vector<128x128xf32> -> vector<128x128xf32>
    %7 = arith.addf %3, %6 : vector<128x128xf32>
    %c0_6 = arith.constant 0 : index
    %c0_7 = arith.constant 0 : index
    %8 = vector.load %arg8[%c0_6, %c0_7] : memref<128x128xf32, #tpu.memory_space<vmem>>, vector<128x128xf32>
    tpu.vector_store %arg8[%c0_6, %c0_7], %7 {strides = array<i32>} : memref<128x128xf32, #tpu.memory_space<vmem>>, vector<128x128xf32>,
    %c0_i32_8 = arith.constant 0 : i32
    %9 = arith.cmpi eq, %arg2, %c0_i32_8 : i32
    %10 = arith.extui %9 : i1 to i32
    %c0_i32_9 = arith.constant 0 : i32
    %11 = arith.cmpi ne, %10, %c0_i32_9 : i32
    scf.if %11 {
      %c0_10 = arith.constant 0 : index
      %c0_11 = arith.constant 0 : index
      %12 = vector.load %arg8[%c0_10, %c0_11] : memref<128x128xf32, #tpu.memory_space<vmem>>, vector<128x128xf32>
      %c0_12 = arith.constant 0 : index
      %c0_13 = arith.constant 0 : index
      %13 = vector.load %arg5[%c0_12, %c0_13] : memref<1x128xf32, #tpu.memory_space<vmem>>, vector<1x128xf32>
      %14 = vector.broadcast %13 : vector<1x128xf32> to vector<128x128xf32>
      %15 = arith.mulf %12, %14 : vector<128x128xf32>
      %c0_14 = arith.constant 0 : index
      %c0_15 = arith.constant 0 : index
      %16 = vector.load %arg6[%c0_14, %c0_15] : memref<1x128xf32, #tpu.memory_space<vmem>>, vector<1x128xf32>
      %17 = vector.broadcast %16 : vector<1x128xf32> to vector<128x128xf32>
      %18 = arith.addf %15, %17 : vector<128x128xf32>
      %cst_16 = arith.constant 0.000000e+00 : f32
      %19 = vector.broadcast %cst_16 : f32 to vector<128x128xf32>
      %20 = arith.maximumf %18, %19 : vector<128x128xf32>
      %c0_17 = arith.constant 0 : index
      %c0_18 = arith.constant 0 : index
      %21 = vector.load %arg7[%c0_17, %c0_18] : memref<128x128xf32, #tpu.memory_space<vmem>>, vector<128x128xf32>
      tpu.vector_store %arg7[%c0_17, %c0_18], %20 {strides = array<i32>} : memref<128x128xf32, #tpu.memory_space<vmem>>, vector<128x128xf32>,
    } else {
    }
    return
  }
  func.func @transform_0(%arg0: i32, %arg1: i32, %arg2: i32) -> (i32, i32) {
    %c0_i32 = arith.constant 0 : i32
    return %arg0, %arg2 : i32, i32
  }
  func.func @transform_1(%arg0: i32, %arg1: i32, %arg2: i32) -> (i32, i32) {
    %c0_i32 = arith.constant 0 : i32
    return %arg2, %arg1 : i32, i32
  }
  func.func @transform_2(%arg0: i32, %arg1: i32, %arg2: i32) -> (i32, i32) {
    %c0_i32 = arith.constant 0 : i32
    %c0_i32_0 = arith.constant 0 : i32
    return %c0_i32, %arg1 : i32, i32
  }
  func.func @transform_3(%arg0: i32, %arg1: i32, %arg2: i32) -> (i32, i32) {
    %c0_i32 = arith.constant 0 : i32
    %c0_i32_0 = arith.constant 0 : i32
    return %c0_i32, %arg1 : i32, i32
  }
  func.func @transform_4(%arg0: i32, %arg1: i32, %arg2: i32) -> (i32, i32) {
    %c0_i32 = arith.constant 0 : i32
    return %arg0, %arg1 : i32, i32
  }
}

module attributes {stable_mosaic.version = 11 : i64} {
  func.func @_matmul_fused_kernel(%arg0: i32, %arg1: i32, %arg2: i32, %arg3: memref<32x128xbf16, #tpu.memory_space<vmem>>, %arg4: memref<128x128xbf16, #tpu.memory_space<vmem>>, %arg5: memref<1x128xf32, #tpu.memory_space<vmem>>, %arg6: memref<1x128xf32, #tpu.memory_space<vmem>>, %arg7: memref<32x128xf32, #tpu.memory_space<vmem>>, %arg8: memref<32x128xf32, #tpu.memory_space<vmem>>) attributes {dimension_semantics = [#tpu.dimension_semantics<parallel>, #tpu.dimension_semantics<parallel>, #tpu.dimension_semantics<arbitrary>], iteration_bounds = array<i64: 1, 1, 1>, scalar_prefetch = 0 : i64, scratch_operands = 1 : i64, tpu.core_type = #tpu.core_type<tc>, window_params = [{transform_indices = @transform_0, window_bounds = array<i64: 32, 128>}, {transform_indices = @transform_1, window_bounds = array<i64: 128, 128>}, {transform_indices = @transform_2, window_bounds = array<i64: 1, 128>}, {transform_indices = @transform_3, window_bounds = array<i64: 1, 128>}, {transform_indices = @transform_4, window_bounds = array<i64: 32, 128>}]} {
    %c0_i32 = arith.constant 0 : i32
    %0 = arith.cmpi eq, %arg2, %c0_i32 : i32
    %1 = arith.extui %0 : i1 to i32
    %c0_i32_0 = arith.constant 0 : i32
    %2 = arith.cmpi ne, %1, %c0_i32_0 : i32
    scf.if %2 {
      %cst_10 = arith.constant 0.000000e+00 : f32
      %12 = vector.broadcast %cst_10 : f32 to vector<32x128xf32>
      %c0_11 = arith.constant 0 : index
      %c0_12 = arith.constant 0 : index
      %13 = vector.load %arg8[%c0_11, %c0_12] : memref<32x128xf32, #tpu.memory_space<vmem>>, vector<32x128xf32>
      tpu.vector_store %arg8[%c0_11, %c0_12], %12 {strides = array<i32>} : memref<32x128xf32, #tpu.memory_space<vmem>>, vector<32x128xf32>,
    } else {
    }
    %c0 = arith.constant 0 : index
    %c0_1 = arith.constant 0 : index
    %3 = vector.load %arg8[%c0, %c0_1] : memref<32x128xf32, #tpu.memory_space<vmem>>, vector<32x128xf32>
    %c0_2 = arith.constant 0 : index
    %c0_3 = arith.constant 0 : index
    %4 = vector.load %arg3[%c0_2, %c0_3] : memref<32x128xbf16, #tpu.memory_space<vmem>>, vector<32x128xbf16>
    %c0_4 = arith.constant 0 : index
    %c0_5 = arith.constant 0 : index
    %5 = vector.load %arg4[%c0_4, %c0_5] : memref<128x128xbf16, #tpu.memory_space<vmem>>, vector<128x128xbf16>
    %cst = arith.constant dense<0.000000e+00> : vector<32x128xf32>
    %6 = tpu.matmul %4, %5, %cst {dimension_numbers = #tpu.dot_dimension_numbers<[1], [0], [0], [1], [0, 0, 1, 1], [], []>} : vector<32x128xbf16>, vector<128x128xbf16>, vector<32x128xf32> -> vector<32x128xf32>
    %7 = arith.addf %3, %6 : vector<32x128xf32>
    %c0_6 = arith.constant 0 : index
    %c0_7 = arith.constant 0 : index
    %8 = vector.load %arg8[%c0_6, %c0_7] : memref<32x128xf32, #tpu.memory_space<vmem>>, vector<32x128xf32>
    tpu.vector_store %arg8[%c0_6, %c0_7], %7 {strides = array<i32>} : memref<32x128xf32, #tpu.memory_space<vmem>>, vector<32x128xf32>,
    %c0_i32_8 = arith.constant 0 : i32
    %9 = arith.cmpi eq, %arg2, %c0_i32_8 : i32
    %10 = arith.extui %9 : i1 to i32
    %c0_i32_9 = arith.constant 0 : i32
    %11 = arith.cmpi ne, %10, %c0_i32_9 : i32
    scf.if %11 {
      %c0_10 = arith.constant 0 : index
      %c0_11 = arith.constant 0 : index
      %12 = vector.load %arg8[%c0_10, %c0_11] : memref<32x128xf32, #tpu.memory_space<vmem>>, vector<32x128xf32>
      %c0_12 = arith.constant 0 : index
      %c0_13 = arith.constant 0 : index
      %13 = vector.load %arg5[%c0_12, %c0_13] : memref<1x128xf32, #tpu.memory_space<vmem>>, vector<1x128xf32>
      %14 = vector.broadcast %13 : vector<1x128xf32> to vector<32x128xf32>
      %15 = arith.mulf %12, %14 : vector<32x128xf32>
      %c0_14 = arith.constant 0 : index
      %c0_15 = arith.constant 0 : index
      %16 = vector.load %arg6[%c0_14, %c0_15] : memref<1x128xf32, #tpu.memory_space<vmem>>, vector<1x128xf32>
      %17 = vector.broadcast %16 : vector<1x128xf32> to vector<32x128xf32>
      %18 = arith.addf %15, %17 : vector<32x128xf32>
      %c0_16 = arith.constant 0 : index
      %c0_17 = arith.constant 0 : index
      %19 = vector.load %arg7[%c0_16, %c0_17] : memref<32x128xf32, #tpu.memory_space<vmem>>, vector<32x128xf32>
      tpu.vector_store %arg7[%c0_16, %c0_17], %18 {strides = array<i32>} : memref<32x128xf32, #tpu.memory_space<vmem>>, vector<32x128xf32>,
    } else {
    }
    return
  }
  func.func @transform_0(%arg0: i32, %arg1: i32, %arg2: i32) -> (i32, i32) {
    %c0_i32 = arith.constant 0 : i32
    return %arg0, %arg2 : i32, i32
  }
  func.func @transform_1(%arg0: i32, %arg1: i32, %arg2: i32) -> (i32, i32) {
    %c0_i32 = arith.constant 0 : i32
    return %arg2, %arg1 : i32, i32
  }
  func.func @transform_2(%arg0: i32, %arg1: i32, %arg2: i32) -> (i32, i32) {
    %c0_i32 = arith.constant 0 : i32
    %c0_i32_0 = arith.constant 0 : i32
    return %c0_i32, %arg1 : i32, i32
  }
  func.func @transform_3(%arg0: i32, %arg1: i32, %arg2: i32) -> (i32, i32) {
    %c0_i32 = arith.constant 0 : i32
    %c0_i32_0 = arith.constant 0 : i32
    return %c0_i32, %arg1 : i32, i32
  }
  func.func @transform_4(%arg0: i32, %arg1: i32, %arg2: i32) -> (i32, i32) {
    %c0_i32 = arith.constant 0 : i32
    return %arg0, %arg1 : i32, i32
  }
}

module attributes {stable_mosaic.version = 11 : i64} {
  func.func @_matmul_fused_kernel(%arg0: i32, %arg1: i32, %arg2: i32, %arg3: memref<32x128xbf16, #tpu.memory_space<vmem>>, %arg4: memref<128x128xbf16, #tpu.memory_space<vmem>>, %arg5: memref<1x128xf32, #tpu.memory_space<vmem>>, %arg6: memref<1x128xf32, #tpu.memory_space<vmem>>, %arg7: memref<32x128xf32, #tpu.memory_space<vmem>>, %arg8: memref<32x128xf32, #tpu.memory_space<vmem>>, %arg9: memref<32x128xf32, #tpu.memory_space<vmem>>) attributes {dimension_semantics = [#tpu.dimension_semantics<parallel>, #tpu.dimension_semantics<parallel>, #tpu.dimension_semantics<arbitrary>], iteration_bounds = array<i64: 1, 1, 1>, scalar_prefetch = 0 : i64, scratch_operands = 1 : i64, tpu.core_type = #tpu.core_type<tc>, window_params = [{transform_indices = @transform_0, window_bounds = array<i64: 32, 128>}, {transform_indices = @transform_1, window_bounds = array<i64: 128, 128>}, {transform_indices = @transform_2, window_bounds = array<i64: 1, 128>}, {transform_indices = @transform_3, window_bounds = array<i64: 1, 128>}, {transform_indices = @transform_4, window_bounds = array<i64: 32, 128>}, {transform_indices = @transform_5, window_bounds = array<i64: 32, 128>}]} {
    %c0_i32 = arith.constant 0 : i32
    %0 = arith.cmpi eq, %arg2, %c0_i32 : i32
    %1 = arith.extui %0 : i1 to i32
    %c0_i32_0 = arith.constant 0 : i32
    %2 = arith.cmpi ne, %1, %c0_i32_0 : i32
    scf.if %2 {
      %cst_10 = arith.constant 0.000000e+00 : f32
      %12 = vector.broadcast %cst_10 : f32 to vector<32x128xf32>
      %c0_11 = arith.constant 0 : index
      %c0_12 = arith.constant 0 : index
      %13 = vector.load %arg9[%c0_11, %c0_12] : memref<32x128xf32, #tpu.memory_space<vmem>>, vector<32x128xf32>
      tpu.vector_store %arg9[%c0_11, %c0_12], %12 {strides = array<i32>} : memref<32x128xf32, #tpu.memory_space<vmem>>, vector<32x128xf32>,
    } else {
    }
    %c0 = arith.constant 0 : index
    %c0_1 = arith.constant 0 : index
    %3 = vector.load %arg9[%c0, %c0_1] : memref<32x128xf32, #tpu.memory_space<vmem>>, vector<32x128xf32>
    %c0_2 = arith.constant 0 : index
    %c0_3 = arith.constant 0 : index
    %4 = vector.load %arg3[%c0_2, %c0_3] : memref<32x128xbf16, #tpu.memory_space<vmem>>, vector<32x128xbf16>
    %c0_4 = arith.constant 0 : index
    %c0_5 = arith.constant 0 : index
    %5 = vector.load %arg4[%c0_4, %c0_5] : memref<128x128xbf16, #tpu.memory_space<vmem>>, vector<128x128xbf16>
    %cst = arith.constant dense<0.000000e+00> : vector<32x128xf32>
    %6 = tpu.matmul %4, %5, %cst {dimension_numbers = #tpu.dot_dimension_numbers<[1], [0], [0], [1], [0, 0, 1, 1], [], []>} : vector<32x128xbf16>, vector<128x128xbf16>, vector<32x128xf32> -> vector<32x128xf32>
    %7 = arith.addf %3, %6 : vector<32x128xf32>
    %c0_6 = arith.constant 0 : index
    %c0_7 = arith.constant 0 : index
    %8 = vector.load %arg9[%c0_6, %c0_7] : memref<32x128xf32, #tpu.memory_space<vmem>>, vector<32x128xf32>
    tpu.vector_store %arg9[%c0_6, %c0_7], %7 {strides = array<i32>} : memref<32x128xf32, #tpu.memory_space<vmem>>, vector<32x128xf32>,
    %c0_i32_8 = arith.constant 0 : i32
    %9 = arith.cmpi eq, %arg2, %c0_i32_8 : i32
    %10 = arith.extui %9 : i1 to i32
    %c0_i32_9 = arith.constant 0 : i32
    %11 = arith.cmpi ne, %10, %c0_i32_9 : i32
    scf.if %11 {
      %c0_10 = arith.constant 0 : index
      %c0_11 = arith.constant 0 : index
      %12 = vector.load %arg9[%c0_10, %c0_11] : memref<32x128xf32, #tpu.memory_space<vmem>>, vector<32x128xf32>
      %c0_12 = arith.constant 0 : index
      %c0_13 = arith.constant 0 : index
      %13 = vector.load %arg5[%c0_12, %c0_13] : memref<1x128xf32, #tpu.memory_space<vmem>>, vector<1x128xf32>
      %14 = vector.broadcast %13 : vector<1x128xf32> to vector<32x128xf32>
      %15 = arith.mulf %12, %14 : vector<32x128xf32>
      %c0_14 = arith.constant 0 : index
      %c0_15 = arith.constant 0 : index
      %16 = vector.load %arg6[%c0_14, %c0_15] : memref<1x128xf32, #tpu.memory_space<vmem>>, vector<1x128xf32>
      %17 = vector.broadcast %16 : vector<1x128xf32> to vector<32x128xf32>
      %18 = arith.addf %15, %17 : vector<32x128xf32>
      %c0_16 = arith.constant 0 : index
      %c0_17 = arith.constant 0 : index
      %19 = vector.load %arg7[%c0_16, %c0_17] : memref<32x128xf32, #tpu.memory_space<vmem>>, vector<32x128xf32>
      %20 = arith.addf %18, %19 : vector<32x128xf32>
      %cst_18 = arith.constant 0.000000e+00 : f32
      %21 = vector.broadcast %cst_18 : f32 to vector<32x128xf32>
      %22 = arith.maximumf %20, %21 : vector<32x128xf32>
      %c0_19 = arith.constant 0 : index
      %c0_20 = arith.constant 0 : index
      %23 = vector.load %arg8[%c0_19, %c0_20] : memref<32x128xf32, #tpu.memory_space<vmem>>, vector<32x128xf32>
      tpu.vector_store %arg8[%c0_19, %c0_20], %22 {strides = array<i32>} : memref<32x128xf32, #tpu.memory_space<vmem>>, vector<32x128xf32>,
    } else {
    }
    return
  }
  func.func @transform_0(%arg0: i32, %arg1: i32, %arg2: i32) -> (i32, i32) {
    %c0_i32 = arith.constant 0 : i32
    return %arg0, %arg2 : i32, i32
  }
  func.func @transform_1(%arg0: i32, %arg1: i32, %arg2: i32) -> (i32, i32) {
    %c0_i32 = arith.constant 0 : i32
    return %arg2, %arg1 : i32, i32
  }
  func.func @transform_2(%arg0: i32, %arg1: i32, %arg2: i32) -> (i32, i32) {
    %c0_i32 = arith.constant 0 : i32
    %c0_i32_0 = arith.constant 0 : i32
    return %c0_i32, %arg1 : i32, i32
  }
  func.func @transform_3(%arg0: i32, %arg1: i32, %arg2: i32) -> (i32, i32) {
    %c0_i32 = arith.constant 0 : i32
    %c0_i32_0 = arith.constant 0 : i32
    return %c0_i32, %arg1 : i32, i32
  }
  func.func @transform_4(%arg0: i32, %arg1: i32, %arg2: i32) -> (i32, i32) {
    %c0_i32 = arith.constant 0 : i32
    return %arg0, %arg1 : i32, i32
  }
  func.func @transform_5(%arg0: i32, %arg1: i32, %arg2: i32) -> (i32, i32) {
    %c0_i32 = arith.constant 0 : i32
    return %arg0, %arg1 : i32, i32
  }
}

module attributes {stable_mosaic.version = 11 : i64} {
  func.func @_matmul_fused_kernel(%arg0: i32, %arg1: i32, %arg2: i32, %arg3: memref<32x128xbf16, #tpu.memory_space<vmem>>, %arg4: memref<128x128xbf16, #tpu.memory_space<vmem>>, %arg5: memref<1x128xf32, #tpu.memory_space<vmem>>, %arg6: memref<1x128xf32, #tpu.memory_space<vmem>>, %arg7: memref<32x128xf32, #tpu.memory_space<vmem>>, %arg8: memref<32x128xf32, #tpu.memory_space<vmem>>) attributes {dimension_semantics = [#tpu.dimension_semantics<parallel>, #tpu.dimension_semantics<parallel>, #tpu.dimension_semantics<arbitrary>], iteration_bounds = array<i64: 1, 1, 1>, scalar_prefetch = 0 : i64, scratch_operands = 1 : i64, tpu.core_type = #tpu.core_type<tc>, window_params = [{transform_indices = @transform_0, window_bounds = array<i64: 32, 128>}, {transform_indices = @transform_1, window_bounds = array<i64: 128, 128>}, {transform_indices = @transform_2, window_bounds = array<i64: 1, 128>}, {transform_indices = @transform_3, window_bounds = array<i64: 1, 128>}, {transform_indices = @transform_4, window_bounds = array<i64: 32, 128>}]} {
    %c0_i32 = arith.constant 0 : i32
    %0 = arith.cmpi eq, %arg2, %c0_i32 : i32
    %1 = arith.extui %0 : i1 to i32
    %c0_i32_0 = arith.constant 0 : i32
    %2 = arith.cmpi ne, %1, %c0_i32_0 : i32
    scf.if %2 {
      %cst_10 = arith.constant 0.000000e+00 : f32
      %12 = vector.broadcast %cst_10 : f32 to vector<32x128xf32>
      %c0_11 = arith.constant 0 : index
      %c0_12 = arith.constant 0 : index
      %13 = vector.load %arg8[%c0_11, %c0_12] : memref<32x128xf32, #tpu.memory_space<vmem>>, vector<32x128xf32>
      tpu.vector_store %arg8[%c0_11, %c0_12], %12 {strides = array<i32>} : memref<32x128xf32, #tpu.memory_space<vmem>>, vector<32x128xf32>,
    } else {
    }
    %c0 = arith.constant 0 : index
    %c0_1 = arith.constant 0 : index
    %3 = vector.load %arg8[%c0, %c0_1] : memref<32x128xf32, #tpu.memory_space<vmem>>, vector<32x128xf32>
    %c0_2 = arith.constant 0 : index
    %c0_3 = arith.constant 0 : index
    %4 = vector.load %arg3[%c0_2, %c0_3] : memref<32x128xbf16, #tpu.memory_space<vmem>>, vector<32x128xbf16>
    %c0_4 = arith.constant 0 : index
    %c0_5 = arith.constant 0 : index
    %5 = vector.load %arg4[%c0_4, %c0_5] : memref<128x128xbf16, #tpu.memory_space<vmem>>, vector<128x128xbf16>
    %cst = arith.constant dense<0.000000e+00> : vector<32x128xf32>
    %6 = tpu.matmul %4, %5, %cst {dimension_numbers = #tpu.dot_dimension_numbers<[1], [0], [0], [1], [0, 0, 1, 1], [], []>} : vector<32x128xbf16>, vector<128x128xbf16>, vector<32x128xf32> -> vector<32x128xf32>
    %7 = arith.addf %3, %6 : vector<32x128xf32>
    %c0_6 = arith.constant 0 : index
    %c0_7 = arith.constant 0 : index
    %8 = vector.load %arg8[%c0_6, %c0_7] : memref<32x128xf32, #tpu.memory_space<vmem>>, vector<32x128xf32>
    tpu.vector_store %arg8[%c0_6, %c0_7], %7 {strides = array<i32>} : memref<32x128xf32, #tpu.memory_space<vmem>>, vector<32x128xf32>,
    %c0_i32_8 = arith.constant 0 : i32
    %9 = arith.cmpi eq, %arg2, %c0_i32_8 : i32
    %10 = arith.extui %9 : i1 to i32
    %c0_i32_9 = arith.constant 0 : i32
    %11 = arith.cmpi ne, %10, %c0_i32_9 : i32
    scf.if %11 {
      %c0_10 = arith.constant 0 : index
      %c0_11 = arith.constant 0 : index
      %12 = vector.load %arg8[%c0_10, %c0_11] : memref<32x128xf32, #tpu.memory_space<vmem>>, vector<32x128xf32>
      %c0_12 = arith.constant 0 : index
      %c0_13 = arith.constant 0 : index
      %13 = vector.load %arg5[%c0_12, %c0_13] : memref<1x128xf32, #tpu.memory_space<vmem>>, vector<1x128xf32>
      %14 = vector.broadcast %13 : vector<1x128xf32> to vector<32x128xf32>
      %15 = arith.mulf %12, %14 : vector<32x128xf32>
      %c0_14 = arith.constant 0 : index
      %c0_15 = arith.constant 0 : index
      %16 = vector.load %arg6[%c0_14, %c0_15] : memref<1x128xf32, #tpu.memory_space<vmem>>, vector<1x128xf32>
      %17 = vector.broadcast %16 : vector<1x128xf32> to vector<32x128xf32>
      %18 = arith.addf %15, %17 : vector<32x128xf32>
      %cst_16 = arith.constant 0.000000e+00 : f32
      %19 = vector.broadcast %cst_16 : f32 to vector<32x128xf32>
      %20 = arith.maximumf %18, %19 : vector<32x128xf32>
      %c0_17 = arith.constant 0 : index
      %c0_18 = arith.constant 0 : index
      %21 = vector.load %arg7[%c0_17, %c0_18] : memref<32x128xf32, #tpu.memory_space<vmem>>, vector<32x128xf32>
      tpu.vector_store %arg7[%c0_17, %c0_18], %20 {strides = array<i32>} : memref<32x128xf32, #tpu.memory_space<vmem>>, vector<32x128xf32>,
    } else {
    }
    return
  }
  func.func @transform_0(%arg0: i32, %arg1: i32, %arg2: i32) -> (i32, i32) {
    %c0_i32 = arith.constant 0 : i32
    return %arg0, %arg2 : i32, i32
  }
  func.func @transform_1(%arg0: i32, %arg1: i32, %arg2: i32) -> (i32, i32) {
    %c0_i32 = arith.constant 0 : i32
    return %arg2, %arg1 : i32, i32
  }
  func.func @transform_2(%arg0: i32, %arg1: i32, %arg2: i32) -> (i32, i32) {
    %c0_i32 = arith.constant 0 : i32
    %c0_i32_0 = arith.constant 0 : i32
    return %c0_i32, %arg1 : i32, i32
  }
  func.func @transform_3(%arg0: i32, %arg1: i32, %arg2: i32) -> (i32, i32) {
    %c0_i32 = arith.constant 0 : i32
    %c0_i32_0 = arith.constant 0 : i32
    return %c0_i32, %arg1 : i32, i32
  }
  func.func @transform_4(%arg0: i32, %arg1: i32, %arg2: i32) -> (i32, i32) {
    %c0_i32 = arith.constant 0 : i32
    return %arg0, %arg1 : i32, i32
  }
}

module attributes {stable_mosaic.version = 11 : i64} {
  func.func @_matmul_fused_kernel(%arg0: i32, %arg1: i32, %arg2: i32, %arg3: memref<32x128xbf16, #tpu.memory_space<vmem>>, %arg4: memref<128x128xbf16, #tpu.memory_space<vmem>>, %arg5: memref<1x128xf32, #tpu.memory_space<vmem>>, %arg6: memref<1x128xf32, #tpu.memory_space<vmem>>, %arg7: memref<32x128xf32, #tpu.memory_space<vmem>>, %arg8: memref<32x128xf32, #tpu.memory_space<vmem>>) attributes {dimension_semantics = [#tpu.dimension_semantics<parallel>, #tpu.dimension_semantics<parallel>, #tpu.dimension_semantics<arbitrary>], iteration_bounds = array<i64: 1, 1, 3>, scalar_prefetch = 0 : i64, scratch_operands = 1 : i64, tpu.core_type = #tpu.core_type<tc>, window_params = [{transform_indices = @transform_0, window_bounds = array<i64: 32, 128>}, {transform_indices = @transform_1, window_bounds = array<i64: 128, 128>}, {transform_indices = @transform_2, window_bounds = array<i64: 1, 128>}, {transform_indices = @transform_3, window_bounds = array<i64: 1, 128>}, {transform_indices = @transform_4, window_bounds = array<i64: 32, 128>}]} {
    %c0_i32 = arith.constant 0 : i32
    %0 = arith.cmpi eq, %arg2, %c0_i32 : i32
    %1 = arith.extui %0 : i1 to i32
    %c0_i32_0 = arith.constant 0 : i32
    %2 = arith.cmpi ne, %1, %c0_i32_0 : i32
    scf.if %2 {
      %cst_9 = arith.constant 0.000000e+00 : f32
      %12 = vector.broadcast %cst_9 : f32 to vector<32x128xf32>
      %c0_10 = arith.constant 0 : index
      %c0_11 = arith.constant 0 : index
      %13 = vector.load %arg8[%c0_10, %c0_11] : memref<32x128xf32, #tpu.memory_space<vmem>>, vector<32x128xf32>
      tpu.vector_store %arg8[%c0_10, %c0_11], %12 {strides = array<i32>} : memref<32x128xf32, #tpu.memory_space<vmem>>, vector<32x128xf32>,
    } else {
    }
    %c0 = arith.constant 0 : index
    %c0_1 = arith.constant 0 : index
    %3 = vector.load %arg8[%c0, %c0_1] : memref<32x128xf32, #tpu.memory_space<vmem>>, vector<32x128xf32>
    %c0_2 = arith.constant 0 : index
    %c0_3 = arith.constant 0 : index
    %4 = vector.load %arg3[%c0_2, %c0_3] : memref<32x128xbf16, #tpu.memory_space<vmem>>, vector<32x128xbf16>
    %c0_4 = arith.constant 0 : index
    %c0_5 = arith.constant 0 : index
    %5 = vector.load %arg4[%c0_4, %c0_5] : memref<128x128xbf16, #tpu.memory_space<vmem>>, vector<128x128xbf16>
    %cst = arith.constant dense<0.000000e+00> : vector<32x128xf32>
    %6 = tpu.matmul %4, %5, %cst {dimension_numbers = #tpu.dot_dimension_numbers<[1], [0], [0], [1], [0, 0, 1, 1], [], []>} : vector<32x128xbf16>, vector<128x128xbf16>, vector<32x128xf32> -> vector<32x128xf32>
    %7 = arith.addf %3, %6 : vector<32x128xf32>
    %c0_6 = arith.constant 0 : index
    %c0_7 = arith.constant 0 : index
    %8 = vector.load %arg8[%c0_6, %c0_7] : memref<32x128xf32, #tpu.memory_space<vmem>>, vector<32x128xf32>
    tpu.vector_store %arg8[%c0_6, %c0_7], %7 {strides = array<i32>} : memref<32x128xf32, #tpu.memory_space<vmem>>, vector<32x128xf32>,
    %c2_i32 = arith.constant 2 : i32
    %9 = arith.cmpi eq, %arg2, %c2_i32 : i32
    %10 = arith.extui %9 : i1 to i32
    %c0_i32_8 = arith.constant 0 : i32
    %11 = arith.cmpi ne, %10, %c0_i32_8 : i32
    scf.if %11 {
      %c0_9 = arith.constant 0 : index
      %c0_10 = arith.constant 0 : index
      %12 = vector.load %arg8[%c0_9, %c0_10] : memref<32x128xf32, #tpu.memory_space<vmem>>, vector<32x128xf32>
      %c0_11 = arith.constant 0 : index
      %c0_12 = arith.constant 0 : index
      %13 = vector.load %arg5[%c0_11, %c0_12] : memref<1x128xf32, #tpu.memory_space<vmem>>, vector<1x128xf32>
      %14 = vector.broadcast %13 : vector<1x128xf32> to vector<32x128xf32>
      %15 = arith.mulf %12, %14 : vector<32x128xf32>
      %c0_13 = arith.constant 0 : index
      %c0_14 = arith.constant 0 : index
      %16 = vector.load %arg6[%c0_13, %c0_14] : memref<1x128xf32, #tpu.memory_space<vmem>>, vector<1x128xf32>
      %17 = vector.broadcast %16 : vector<1x128xf32> to vector<32x128xf32>
      %18 = arith.addf %15, %17 : vector<32x128xf32>
      %cst_15 = arith.constant 0.000000e+00 : f32
      %19 = vector.broadcast %cst_15 : f32 to vector<32x128xf32>
      %20 = arith.maximumf %18, %19 : vector<32x128xf32>
      %c0_16 = arith.constant 0 : index
      %c0_17 = arith.constant 0 : index
      %21 = vector.load %arg7[%c0_16, %c0_17] : memref<32x128xf32, #tpu.memory_space<vmem>>, vector<32x128xf32>
      tpu.vector_store %arg7[%c0_16, %c0_17], %20 {strides = array<i32>} : memref<32x128xf32, #tpu.memory_space<vmem>>, vector<32x128xf32>,
    } else {
    }
    return
  }
  func.func @transform_0(%arg0: i32, %arg1: i32, %arg2: i32) -> (i32, i32) {
    %c0_i32 = arith.constant 0 : i32
    return %arg0, %arg2 : i32, i32
  }
  func.func @transform_1(%arg0: i32, %arg1: i32, %arg2: i32) -> (i32, i32) {
    %c0_i32 = arith.constant 0 : i32
    return %arg2, %arg1 : i32, i32
  }
  func.func @transform_2(%arg0: i32, %arg1: i32, %arg2: i32) -> (i32, i32) {
    %c0_i32 = arith.constant 0 : i32
    %c0_i32_0 = arith.constant 0 : i32
    return %c0_i32, %arg1 : i32, i32
  }
  func.func @transform_3(%arg0: i32, %arg1: i32, %arg2: i32) -> (i32, i32) {
    %c0_i32 = arith.constant 0 : i32
    %c0_i32_0 = arith.constant 0 : i32
    return %c0_i32, %arg1 : i32, i32
  }
  func.func @transform_4(%arg0: i32, %arg1: i32, %arg2: i32) -> (i32, i32) {
    %c0_i32 = arith.constant 0 : i32
    return %arg0, %arg1 : i32, i32
  }
}

module attributes {stable_mosaic.version = 11 : i64} {
  func.func @_matmul_fused_kernel(%arg0: i32, %arg1: i32, %arg2: i32, %arg3: memref<8x128xbf16, #tpu.memory_space<vmem>>, %arg4: memref<128x128xbf16, #tpu.memory_space<vmem>>, %arg5: memref<1x128xf32, #tpu.memory_space<vmem>>, %arg6: memref<1x128xf32, #tpu.memory_space<vmem>>, %arg7: memref<8x128xf32, #tpu.memory_space<vmem>>, %arg8: memref<8x128xf32, #tpu.memory_space<vmem>>) attributes {dimension_semantics = [#tpu.dimension_semantics<parallel>, #tpu.dimension_semantics<parallel>, #tpu.dimension_semantics<arbitrary>], iteration_bounds = array<i64: 1, 1, 1>, scalar_prefetch = 0 : i64, scratch_operands = 1 : i64, tpu.core_type = #tpu.core_type<tc>, window_params = [{transform_indices = @transform_0, window_bounds = array<i64: 8, 128>}, {transform_indices = @transform_1, window_bounds = array<i64: 128, 128>}, {transform_indices = @transform_2, window_bounds = array<i64: 1, 128>}, {transform_indices = @transform_3, window_bounds = array<i64: 1, 128>}, {transform_indices = @transform_4, window_bounds = array<i64: 8, 128>}]} {
    %c0_i32 = arith.constant 0 : i32
    %0 = arith.cmpi eq, %arg2, %c0_i32 : i32
    %1 = arith.extui %0 : i1 to i32
    %c0_i32_0 = arith.constant 0 : i32
    %2 = arith.cmpi ne, %1, %c0_i32_0 : i32
    scf.if %2 {
      %cst_10 = arith.constant 0.000000e+00 : f32
      %12 = vector.broadcast %cst_10 : f32 to vector<8x128xf32>
      %c0_11 = arith.constant 0 : index
      %c0_12 = arith.constant 0 : index
      %13 = vector.load %arg8[%c0_11, %c0_12] : memref<8x128xf32, #tpu.memory_space<vmem>>, vector<8x128xf32>
      tpu.vector_store %arg8[%c0_11, %c0_12], %12 {strides = array<i32>} : memref<8x128xf32, #tpu.memory_space<vmem>>, vector<8x128xf32>,
    } else {
    }
    %c0 = arith.constant 0 : index
    %c0_1 = arith.constant 0 : index
    %3 = vector.load %arg8[%c0, %c0_1] : memref<8x128xf32, #tpu.memory_space<vmem>>, vector<8x128xf32>
    %c0_2 = arith.constant 0 : index
    %c0_3 = arith.constant 0 : index
    %4 = vector.load %arg3[%c0_2, %c0_3] : memref<8x128xbf16, #tpu.memory_space<vmem>>, vector<8x128xbf16>
    %c0_4 = arith.constant 0 : index
    %c0_5 = arith.constant 0 : index
    %5 = vector.load %arg4[%c0_4, %c0_5] : memref<128x128xbf16, #tpu.memory_space<vmem>>, vector<128x128xbf16>
    %cst = arith.constant dense<0.000000e+00> : vector<8x128xf32>
    %6 = tpu.matmul %4, %5, %cst {dimension_numbers = #tpu.dot_dimension_numbers<[1], [0], [0], [1], [0, 0, 1, 1], [], []>} : vector<8x128xbf16>, vector<128x128xbf16>, vector<8x128xf32> -> vector<8x128xf32>
    %7 = arith.addf %3, %6 : vector<8x128xf32>
    %c0_6 = arith.constant 0 : index
    %c0_7 = arith.constant 0 : index
    %8 = vector.load %arg8[%c0_6, %c0_7] : memref<8x128xf32, #tpu.memory_space<vmem>>, vector<8x128xf32>
    tpu.vector_store %arg8[%c0_6, %c0_7], %7 {strides = array<i32>} : memref<8x128xf32, #tpu.memory_space<vmem>>, vector<8x128xf32>,
    %c0_i32_8 = arith.constant 0 : i32
    %9 = arith.cmpi eq, %arg2, %c0_i32_8 : i32
    %10 = arith.extui %9 : i1 to i32
    %c0_i32_9 = arith.constant 0 : i32
    %11 = arith.cmpi ne, %10, %c0_i32_9 : i32
    scf.if %11 {
      %c0_10 = arith.constant 0 : index
      %c0_11 = arith.constant 0 : index
      %12 = vector.load %arg8[%c0_10, %c0_11] : memref<8x128xf32, #tpu.memory_space<vmem>>, vector<8x128xf32>
      %c0_12 = arith.constant 0 : index
      %c0_13 = arith.constant 0 : index
      %13 = vector.load %arg5[%c0_12, %c0_13] : memref<1x128xf32, #tpu.memory_space<vmem>>, vector<1x128xf32>
      %14 = vector.broadcast %13 : vector<1x128xf32> to vector<8x128xf32>
      %15 = arith.mulf %12, %14 : vector<8x128xf32>
      %c0_14 = arith.constant 0 : index
      %c0_15 = arith.constant 0 : index
      %16 = vector.load %arg6[%c0_14, %c0_15] : memref<1x128xf32, #tpu.memory_space<vmem>>, vector<1x128xf32>
      %17 = vector.broadcast %16 : vector<1x128xf32> to vector<8x128xf32>
      %18 = arith.addf %15, %17 : vector<8x128xf32>
      %c0_16 = arith.constant 0 : index
      %c0_17 = arith.constant 0 : index
      %19 = vector.load %arg7[%c0_16, %c0_17] : memref<8x128xf32, #tpu.memory_space<vmem>>, vector<8x128xf32>
      tpu.vector_store %arg7[%c0_16, %c0_17], %18 {strides = array<i32>} : memref<8x128xf32, #tpu.memory_space<vmem>>, vector<8x128xf32>,
    } else {
    }
    return
  }
  func.func @transform_0(%arg0: i32, %arg1: i32, %arg2: i32) -> (i32, i32) {
    %c0_i32 = arith.constant 0 : i32
    return %arg0, %arg2 : i32, i32
  }
  func.func @transform_1(%arg0: i32, %arg1: i32, %arg2: i32) -> (i32, i32) {
    %c0_i32 = arith.constant 0 : i32
    return %arg2, %arg1 : i32, i32
  }
  func.func @transform_2(%arg0: i32, %arg1: i32, %arg2: i32) -> (i32, i32) {
    %c0_i32 = arith.constant 0 : i32
    %c0_i32_0 = arith.constant 0 : i32
    return %c0_i32, %arg1 : i32, i32
  }
  func.func @transform_3(%arg0: i32, %arg1: i32, %arg2: i32) -> (i32, i32) {
    %c0_i32 = arith.constant 0 : i32
    %c0_i32_0 = arith.constant 0 : i32
    return %c0_i32, %arg1 : i32, i32
  }
  func.func @transform_4(%arg0: i32, %arg1: i32, %arg2: i32) -> (i32, i32) {
    %c0_i32 = arith.constant 0 : i32
    return %arg0, %arg1 : i32, i32
  }
}

module attributes {stable_mosaic.version = 11 : i64} {
  func.func @_matmul_fused_kernel(%arg0: i32, %arg1: i32, %arg2: i32, %arg3: memref<8x128xbf16, #tpu.memory_space<vmem>>, %arg4: memref<128x128xbf16, #tpu.memory_space<vmem>>, %arg5: memref<1x128xf32, #tpu.memory_space<vmem>>, %arg6: memref<1x128xf32, #tpu.memory_space<vmem>>, %arg7: memref<8x128xf32, #tpu.memory_space<vmem>>, %arg8: memref<8x128xf32, #tpu.memory_space<vmem>>, %arg9: memref<8x128xf32, #tpu.memory_space<vmem>>) attributes {dimension_semantics = [#tpu.dimension_semantics<parallel>, #tpu.dimension_semantics<parallel>, #tpu.dimension_semantics<arbitrary>], iteration_bounds = array<i64: 1, 1, 1>, scalar_prefetch = 0 : i64, scratch_operands = 1 : i64, tpu.core_type = #tpu.core_type<tc>, window_params = [{transform_indices = @transform_0, window_bounds = array<i64: 8, 128>}, {transform_indices = @transform_1, window_bounds = array<i64: 128, 128>}, {transform_indices = @transform_2, window_bounds = array<i64: 1, 128>}, {transform_indices = @transform_3, window_bounds = array<i64: 1, 128>}, {transform_indices = @transform_4, window_bounds = array<i64: 8, 128>}, {transform_indices = @transform_5, window_bounds = array<i64: 8, 128>}]} {
    %c0_i32 = arith.constant 0 : i32
    %0 = arith.cmpi eq, %arg2, %c0_i32 : i32
    %1 = arith.extui %0 : i1 to i32
    %c0_i32_0 = arith.constant 0 : i32
    %2 = arith.cmpi ne, %1, %c0_i32_0 : i32
    scf.if %2 {
      %cst_10 = arith.constant 0.000000e+00 : f32
      %12 = vector.broadcast %cst_10 : f32 to vector<8x128xf32>
      %c0_11 = arith.constant 0 : index
      %c0_12 = arith.constant 0 : index
      %13 = vector.load %arg9[%c0_11, %c0_12] : memref<8x128xf32, #tpu.memory_space<vmem>>, vector<8x128xf32>
      tpu.vector_store %arg9[%c0_11, %c0_12], %12 {strides = array<i32>} : memref<8x128xf32, #tpu.memory_space<vmem>>, vector<8x128xf32>,
    } else {
    }
    %c0 = arith.constant 0 : index
    %c0_1 = arith.constant 0 : index
    %3 = vector.load %arg9[%c0, %c0_1] : memref<8x128xf32, #tpu.memory_space<vmem>>, vector<8x128xf32>
    %c0_2 = arith.constant 0 : index
    %c0_3 = arith.constant 0 : index
    %4 = vector.load %arg3[%c0_2, %c0_3] : memref<8x128xbf16, #tpu.memory_space<vmem>>, vector<8x128xbf16>
    %c0_4 = arith.constant 0 : index
    %c0_5 = arith.constant 0 : index
    %5 = vector.load %arg4[%c0_4, %c0_5] : memref<128x128xbf16, #tpu.memory_space<vmem>>, vector<128x128xbf16>
    %cst = arith.constant dense<0.000000e+00> : vector<8x128xf32>
    %6 = tpu.matmul %4, %5, %cst {dimension_numbers = #tpu.dot_dimension_numbers<[1], [0], [0], [1], [0, 0, 1, 1], [], []>} : vector<8x128xbf16>, vector<128x128xbf16>, vector<8x128xf32> -> vector<8x128xf32>
    %7 = arith.addf %3, %6 : vector<8x128xf32>
    %c0_6 = arith.constant 0 : index
    %c0_7 = arith.constant 0 : index
    %8 = vector.load %arg9[%c0_6, %c0_7] : memref<8x128xf32, #tpu.memory_space<vmem>>, vector<8x128xf32>
    tpu.vector_store %arg9[%c0_6, %c0_7], %7 {strides = array<i32>} : memref<8x128xf32, #tpu.memory_space<vmem>>, vector<8x128xf32>,
    %c0_i32_8 = arith.constant 0 : i32
    %9 = arith.cmpi eq, %arg2, %c0_i32_8 : i32
    %10 = arith.extui %9 : i1 to i32
    %c0_i32_9 = arith.constant 0 : i32
    %11 = arith.cmpi ne, %10, %c0_i32_9 : i32
    scf.if %11 {
      %c0_10 = arith.constant 0 : index
      %c0_11 = arith.constant 0 : index
      %12 = vector.load %arg9[%c0_10, %c0_11] : memref<8x128xf32, #tpu.memory_space<vmem>>, vector<8x128xf32>
      %c0_12 = arith.constant 0 : index
      %c0_13 = arith.constant 0 : index
      %13 = vector.load %arg5[%c0_12, %c0_13] : memref<1x128xf32, #tpu.memory_space<vmem>>, vector<1x128xf32>
      %14 = vector.broadcast %13 : vector<1x128xf32> to vector<8x128xf32>
      %15 = arith.mulf %12, %14 : vector<8x128xf32>
      %c0_14 = arith.constant 0 : index
      %c0_15 = arith.constant 0 : index
      %16 = vector.load %arg6[%c0_14, %c0_15] : memref<1x128xf32, #tpu.memory_space<vmem>>, vector<1x128xf32>
      %17 = vector.broadcast %16 : vector<1x128xf32> to vector<8x128xf32>
      %18 = arith.addf %15, %17 : vector<8x128xf32>
      %c0_16 = arith.constant 0 : index
      %c0_17 = arith.constant 0 : index
      %19 = vector.load %arg7[%c0_16, %c0_17] : memref<8x128xf32, #tpu.memory_space<vmem>>, vector<8x128xf32>
      %20 = arith.addf %18, %19 : vector<8x128xf32>
      %cst_18 = arith.constant 0.000000e+00 : f32
      %21 = vector.broadcast %cst_18 : f32 to vector<8x128xf32>
      %22 = arith.maximumf %20, %21 : vector<8x128xf32>
      %c0_19 = arith.constant 0 : index
      %c0_20 = arith.constant 0 : index
      %23 = vector.load %arg8[%c0_19, %c0_20] : memref<8x128xf32, #tpu.memory_space<vmem>>, vector<8x128xf32>
      tpu.vector_store %arg8[%c0_19, %c0_20], %22 {strides = array<i32>} : memref<8x128xf32, #tpu.memory_space<vmem>>, vector<8x128xf32>,
    } else {
    }
    return
  }
  func.func @transform_0(%arg0: i32, %arg1: i32, %arg2: i32) -> (i32, i32) {
    %c0_i32 = arith.constant 0 : i32
    return %arg0, %arg2 : i32, i32
  }
  func.func @transform_1(%arg0: i32, %arg1: i32, %arg2: i32) -> (i32, i32) {
    %c0_i32 = arith.constant 0 : i32
    return %arg2, %arg1 : i32, i32
  }
  func.func @transform_2(%arg0: i32, %arg1: i32, %arg2: i32) -> (i32, i32) {
    %c0_i32 = arith.constant 0 : i32
    %c0_i32_0 = arith.constant 0 : i32
    return %c0_i32, %arg1 : i32, i32
  }
  func.func @transform_3(%arg0: i32, %arg1: i32, %arg2: i32) -> (i32, i32) {
    %c0_i32 = arith.constant 0 : i32
    %c0_i32_0 = arith.constant 0 : i32
    return %c0_i32, %arg1 : i32, i32
  }
  func.func @transform_4(%arg0: i32, %arg1: i32, %arg2: i32) -> (i32, i32) {
    %c0_i32 = arith.constant 0 : i32
    return %arg0, %arg1 : i32, i32
  }
  func.func @transform_5(%arg0: i32, %arg1: i32, %arg2: i32) -> (i32, i32) {
    %c0_i32 = arith.constant 0 : i32
    return %arg0, %arg1 : i32, i32
  }
}

module attributes {stable_mosaic.version = 11 : i64} {
  func.func @_matmul_fused_kernel(%arg0: i32, %arg1: i32, %arg2: i32, %arg3: memref<8x128xbf16, #tpu.memory_space<vmem>>, %arg4: memref<128x256xbf16, #tpu.memory_space<vmem>>, %arg5: memref<1x256xf32, #tpu.memory_space<vmem>>, %arg6: memref<1x256xf32, #tpu.memory_space<vmem>>, %arg7: memref<8x256xf32, #tpu.memory_space<vmem>>, %arg8: memref<8x256xf32, #tpu.memory_space<vmem>>) attributes {dimension_semantics = [#tpu.dimension_semantics<parallel>, #tpu.dimension_semantics<parallel>, #tpu.dimension_semantics<arbitrary>], iteration_bounds = array<i64: 1, 1, 1>, scalar_prefetch = 0 : i64, scratch_operands = 1 : i64, tpu.core_type = #tpu.core_type<tc>, window_params = [{transform_indices = @transform_0, window_bounds = array<i64: 8, 128>}, {transform_indices = @transform_1, window_bounds = array<i64: 128, 256>}, {transform_indices = @transform_2, window_bounds = array<i64: 1, 256>}, {transform_indices = @transform_3, window_bounds = array<i64: 1, 256>}, {transform_indices = @transform_4, window_bounds = array<i64: 8, 256>}]} {
    %c0_i32 = arith.constant 0 : i32
    %0 = arith.cmpi eq, %arg2, %c0_i32 : i32
    %1 = arith.extui %0 : i1 to i32
    %c0_i32_0 = arith.constant 0 : i32
    %2 = arith.cmpi ne, %1, %c0_i32_0 : i32
    scf.if %2 {
      %cst_10 = arith.constant 0.000000e+00 : f32
      %12 = vector.broadcast %cst_10 : f32 to vector<8x256xf32>
      %c0_11 = arith.constant 0 : index
      %c0_12 = arith.constant 0 : index
      %13 = vector.load %arg8[%c0_11, %c0_12] : memref<8x256xf32, #tpu.memory_space<vmem>>, vector<8x256xf32>
      tpu.vector_store %arg8[%c0_11, %c0_12], %12 {strides = array<i32>} : memref<8x256xf32, #tpu.memory_space<vmem>>, vector<8x256xf32>,
    } else {
    }
    %c0 = arith.constant 0 : index
    %c0_1 = arith.constant 0 : index
    %3 = vector.load %arg8[%c0, %c0_1] : memref<8x256xf32, #tpu.memory_space<vmem>>, vector<8x256xf32>
    %c0_2 = arith.constant 0 : index
    %c0_3 = arith.constant 0 : index
    %4 = vector.load %arg3[%c0_2, %c0_3] : memref<8x128xbf16, #tpu.memory_space<vmem>>, vector<8x128xbf16>
    %c0_4 = arith.constant 0 : index
    %c0_5 = arith.constant 0 : index
    %5 = vector.load %arg4[%c0_4, %c0_5] : memref<128x256xbf16, #tpu.memory_space<vmem>>, vector<128x256xbf16>
    %cst = arith.constant dense<0.000000e+00> : vector<8x256xf32>
    %6 = tpu.matmul %4, %5, %cst {dimension_numbers = #tpu.dot_dimension_numbers<[1], [0], [0], [1], [0, 0, 1, 1], [], []>} : vector<8x128xbf16>, vector<128x256xbf16>, vector<8x256xf32> -> vector<8x256xf32>
    %7 = arith.addf %3, %6 : vector<8x256xf32>
    %c0_6 = arith.constant 0 : index
    %c0_7 = arith.constant 0 : index
    %8 = vector.load %arg8[%c0_6, %c0_7] : memref<8x256xf32, #tpu.memory_space<vmem>>, vector<8x256xf32>
    tpu.vector_store %arg8[%c0_6, %c0_7], %7 {strides = array<i32>} : memref<8x256xf32, #tpu.memory_space<vmem>>, vector<8x256xf32>,
    %c0_i32_8 = arith.constant 0 : i32
    %9 = arith.cmpi eq, %arg2, %c0_i32_8 : i32
    %10 = arith.extui %9 : i1 to i32
    %c0_i32_9 = arith.constant 0 : i32
    %11 = arith.cmpi ne, %10, %c0_i32_9 : i32
    scf.if %11 {
      %c0_10 = arith.constant 0 : index
      %c0_11 = arith.constant 0 : index
      %12 = vector.load %arg8[%c0_10, %c0_11] : memref<8x256xf32, #tpu.memory_space<vmem>>, vector<8x256xf32>
      %c0_12 = arith.constant 0 : index
      %c0_13 = arith.constant 0 : index
      %13 = vector.load %arg5[%c0_12, %c0_13] : memref<1x256xf32, #tpu.memory_space<vmem>>, vector<1x256xf32>
      %14 = vector.broadcast %13 : vector<1x256xf32> to vector<8x256xf32>
      %15 = arith.mulf %12, %14 : vector<8x256xf32>
      %c0_14 = arith.constant 0 : index
      %c0_15 = arith.constant 0 : index
      %16 = vector.load %arg6[%c0_14, %c0_15] : memref<1x256xf32, #tpu.memory_space<vmem>>, vector<1x256xf32>
      %17 = vector.broadcast %16 : vector<1x256xf32> to vector<8x256xf32>
      %18 = arith.addf %15, %17 : vector<8x256xf32>
      %c0_16 = arith.constant 0 : index
      %c0_17 = arith.constant 0 : index
      %19 = vector.load %arg7[%c0_16, %c0_17] : memref<8x256xf32, #tpu.memory_space<vmem>>, vector<8x256xf32>
      tpu.vector_store %arg7[%c0_16, %c0_17], %18 {strides = array<i32>} : memref<8x256xf32, #tpu.memory_space<vmem>>, vector<8x256xf32>,
    } else {
    }
    return
  }
  func.func @transform_0(%arg0: i32, %arg1: i32, %arg2: i32) -> (i32, i32) {
    %c0_i32 = arith.constant 0 : i32
    return %arg0, %arg2 : i32, i32
  }
  func.func @transform_1(%arg0: i32, %arg1: i32, %arg2: i32) -> (i32, i32) {
    %c0_i32 = arith.constant 0 : i32
    return %arg2, %arg1 : i32, i32
  }
  func.func @transform_2(%arg0: i32, %arg1: i32, %arg2: i32) -> (i32, i32) {
    %c0_i32 = arith.constant 0 : i32
    %c0_i32_0 = arith.constant 0 : i32
    return %c0_i32, %arg1 : i32, i32
  }
  func.func @transform_3(%arg0: i32, %arg1: i32, %arg2: i32) -> (i32, i32) {
    %c0_i32 = arith.constant 0 : i32
    %c0_i32_0 = arith.constant 0 : i32
    return %c0_i32, %arg1 : i32, i32
  }
  func.func @transform_4(%arg0: i32, %arg1: i32, %arg2: i32) -> (i32, i32) {
    %c0_i32 = arith.constant 0 : i32
    return %arg0, %arg1 : i32, i32
  }
}

module attributes {stable_mosaic.version = 11 : i64} {
  func.func @_matmul_fused_kernel(%arg0: i32, %arg1: i32, %arg2: i32, %arg3: memref<8x128xbf16, #tpu.memory_space<vmem>>, %arg4: memref<128x128xbf16, #tpu.memory_space<vmem>>, %arg5: memref<1x128xf32, #tpu.memory_space<vmem>>, %arg6: memref<1x128xf32, #tpu.memory_space<vmem>>, %arg7: memref<8x128xf32, #tpu.memory_space<vmem>>, %arg8: memref<8x128xf32, #tpu.memory_space<vmem>>) attributes {dimension_semantics = [#tpu.dimension_semantics<parallel>, #tpu.dimension_semantics<parallel>, #tpu.dimension_semantics<arbitrary>], iteration_bounds = array<i64: 1, 1, 1>, scalar_prefetch = 0 : i64, scratch_operands = 1 : i64, tpu.core_type = #tpu.core_type<tc>, window_params = [{transform_indices = @transform_0, window_bounds = array<i64: 8, 128>}, {transform_indices = @transform_1, window_bounds = array<i64: 128, 128>}, {transform_indices = @transform_2, window_bounds = array<i64: 1, 128>}, {transform_indices = @transform_3, window_bounds = array<i64: 1, 128>}, {transform_indices = @transform_4, window_bounds = array<i64: 8, 128>}]} {
    %c0_i32 = arith.constant 0 : i32
    %0 = arith.cmpi eq, %arg2, %c0_i32 : i32
    %1 = arith.extui %0 : i1 to i32
    %c0_i32_0 = arith.constant 0 : i32
    %2 = arith.cmpi ne, %1, %c0_i32_0 : i32
    scf.if %2 {
      %cst_10 = arith.constant 0.000000e+00 : f32
      %12 = vector.broadcast %cst_10 : f32 to vector<8x128xf32>
      %c0_11 = arith.constant 0 : index
      %c0_12 = arith.constant 0 : index
      %13 = vector.load %arg8[%c0_11, %c0_12] : memref<8x128xf32, #tpu.memory_space<vmem>>, vector<8x128xf32>
      tpu.vector_store %arg8[%c0_11, %c0_12], %12 {strides = array<i32>} : memref<8x128xf32, #tpu.memory_space<vmem>>, vector<8x128xf32>,
    } else {
    }
    %c0 = arith.constant 0 : index
    %c0_1 = arith.constant 0 : index
    %3 = vector.load %arg8[%c0, %c0_1] : memref<8x128xf32, #tpu.memory_space<vmem>>, vector<8x128xf32>
    %c0_2 = arith.constant 0 : index
    %c0_3 = arith.constant 0 : index
    %4 = vector.load %arg3[%c0_2, %c0_3] : memref<8x128xbf16, #tpu.memory_space<vmem>>, vector<8x128xbf16>
    %c0_4 = arith.constant 0 : index
    %c0_5 = arith.constant 0 : index
    %5 = vector.load %arg4[%c0_4, %c0_5] : memref<128x128xbf16, #tpu.memory_space<vmem>>, vector<128x128xbf16>
    %cst = arith.constant dense<0.000000e+00> : vector<8x128xf32>
    %6 = tpu.matmul %4, %5, %cst {dimension_numbers = #tpu.dot_dimension_numbers<[1], [0], [0], [1], [0, 0, 1, 1], [], []>} : vector<8x128xbf16>, vector<128x128xbf16>, vector<8x128xf32> -> vector<8x128xf32>
    %7 = arith.addf %3, %6 : vector<8x128xf32>
    %c0_6 = arith.constant 0 : index
    %c0_7 = arith.constant 0 : index
    %8 = vector.load %arg8[%c0_6, %c0_7] : memref<8x128xf32, #tpu.memory_space<vmem>>, vector<8x128xf32>
    tpu.vector_store %arg8[%c0_6, %c0_7], %7 {strides = array<i32>} : memref<8x128xf32, #tpu.memory_space<vmem>>, vector<8x128xf32>,
    %c0_i32_8 = arith.constant 0 : i32
    %9 = arith.cmpi eq, %arg2, %c0_i32_8 : i32
    %10 = arith.extui %9 : i1 to i32
    %c0_i32_9 = arith.constant 0 : i32
    %11 = arith.cmpi ne, %10, %c0_i32_9 : i32
    scf.if %11 {
      %c0_10 = arith.constant 0 : index
      %c0_11 = arith.constant 0 : index
      %12 = vector.load %arg8[%c0_10, %c0_11] : memref<8x128xf32, #tpu.memory_space<vmem>>, vector<8x128xf32>
      %c0_12 = arith.constant 0 : index
      %c0_13 = arith.constant 0 : index
      %13 = vector.load %arg5[%c0_12, %c0_13] : memref<1x128xf32, #tpu.memory_space<vmem>>, vector<1x128xf32>
      %14 = vector.broadcast %13 : vector<1x128xf32> to vector<8x128xf32>
      %15 = arith.mulf %12, %14 : vector<8x128xf32>
      %c0_14 = arith.constant 0 : index
      %c0_15 = arith.constant 0 : index
      %16 = vector.load %arg6[%c0_14, %c0_15] : memref<1x128xf32, #tpu.memory_space<vmem>>, vector<1x128xf32>
      %17 = vector.broadcast %16 : vector<1x128xf32> to vector<8x128xf32>
      %18 = arith.addf %15, %17 : vector<8x128xf32>
      %cst_16 = arith.constant 0.000000e+00 : f32
      %19 = vector.broadcast %cst_16 : f32 to vector<8x128xf32>
      %20 = arith.maximumf %18, %19 : vector<8x128xf32>
      %c0_17 = arith.constant 0 : index
      %c0_18 = arith.constant 0 : index
      %21 = vector.load %arg7[%c0_17, %c0_18] : memref<8x128xf32, #tpu.memory_space<vmem>>, vector<8x128xf32>
      tpu.vector_store %arg7[%c0_17, %c0_18], %20 {strides = array<i32>} : memref<8x128xf32, #tpu.memory_space<vmem>>, vector<8x128xf32>,
    } else {
    }
    return
  }
  func.func @transform_0(%arg0: i32, %arg1: i32, %arg2: i32) -> (i32, i32) {
    %c0_i32 = arith.constant 0 : i32
    return %arg0, %arg2 : i32, i32
  }
  func.func @transform_1(%arg0: i32, %arg1: i32, %arg2: i32) -> (i32, i32) {
    %c0_i32 = arith.constant 0 : i32
    return %arg2, %arg1 : i32, i32
  }
  func.func @transform_2(%arg0: i32, %arg1: i32, %arg2: i32) -> (i32, i32) {
    %c0_i32 = arith.constant 0 : i32
    %c0_i32_0 = arith.constant 0 : i32
    return %c0_i32, %arg1 : i32, i32
  }
  func.func @transform_3(%arg0: i32, %arg1: i32, %arg2: i32) -> (i32, i32) {
    %c0_i32 = arith.constant 0 : i32
    %c0_i32_0 = arith.constant 0 : i32
    return %c0_i32, %arg1 : i32, i32
  }
  func.func @transform_4(%arg0: i32, %arg1: i32, %arg2: i32) -> (i32, i32) {
    %c0_i32 = arith.constant 0 : i32
    return %arg0, %arg1 : i32, i32
  }
}

module attributes {stable_mosaic.version = 11 : i64} {
  func.func @_matmul_fused_kernel(%arg0: i32, %arg1: i32, %arg2: i32, %arg3: memref<8x128xbf16, #tpu.memory_space<vmem>>, %arg4: memref<128x256xbf16, #tpu.memory_space<vmem>>, %arg5: memref<1x256xf32, #tpu.memory_space<vmem>>, %arg6: memref<1x256xf32, #tpu.memory_space<vmem>>, %arg7: memref<8x256xf32, #tpu.memory_space<vmem>>, %arg8: memref<8x256xf32, #tpu.memory_space<vmem>>, %arg9: memref<8x256xf32, #tpu.memory_space<vmem>>) attributes {dimension_semantics = [#tpu.dimension_semantics<parallel>, #tpu.dimension_semantics<parallel>, #tpu.dimension_semantics<arbitrary>], iteration_bounds = array<i64: 1, 1, 1>, scalar_prefetch = 0 : i64, scratch_operands = 1 : i64, tpu.core_type = #tpu.core_type<tc>, window_params = [{transform_indices = @transform_0, window_bounds = array<i64: 8, 128>}, {transform_indices = @transform_1, window_bounds = array<i64: 128, 256>}, {transform_indices = @transform_2, window_bounds = array<i64: 1, 256>}, {transform_indices = @transform_3, window_bounds = array<i64: 1, 256>}, {transform_indices = @transform_4, window_bounds = array<i64: 8, 256>}, {transform_indices = @transform_5, window_bounds = array<i64: 8, 256>}]} {
    %c0_i32 = arith.constant 0 : i32
    %0 = arith.cmpi eq, %arg2, %c0_i32 : i32
    %1 = arith.extui %0 : i1 to i32
    %c0_i32_0 = arith.constant 0 : i32
    %2 = arith.cmpi ne, %1, %c0_i32_0 : i32
    scf.if %2 {
      %cst_10 = arith.constant 0.000000e+00 : f32
      %12 = vector.broadcast %cst_10 : f32 to vector<8x256xf32>
      %c0_11 = arith.constant 0 : index
      %c0_12 = arith.constant 0 : index
      %13 = vector.load %arg9[%c0_11, %c0_12] : memref<8x256xf32, #tpu.memory_space<vmem>>, vector<8x256xf32>
      tpu.vector_store %arg9[%c0_11, %c0_12], %12 {strides = array<i32>} : memref<8x256xf32, #tpu.memory_space<vmem>>, vector<8x256xf32>,
    } else {
    }
    %c0 = arith.constant 0 : index
    %c0_1 = arith.constant 0 : index
    %3 = vector.load %arg9[%c0, %c0_1] : memref<8x256xf32, #tpu.memory_space<vmem>>, vector<8x256xf32>
    %c0_2 = arith.constant 0 : index
    %c0_3 = arith.constant 0 : index
    %4 = vector.load %arg3[%c0_2, %c0_3] : memref<8x128xbf16, #tpu.memory_space<vmem>>, vector<8x128xbf16>
    %c0_4 = arith.constant 0 : index
    %c0_5 = arith.constant 0 : index
    %5 = vector.load %arg4[%c0_4, %c0_5] : memref<128x256xbf16, #tpu.memory_space<vmem>>, vector<128x256xbf16>
    %cst = arith.constant dense<0.000000e+00> : vector<8x256xf32>
    %6 = tpu.matmul %4, %5, %cst {dimension_numbers = #tpu.dot_dimension_numbers<[1], [0], [0], [1], [0, 0, 1, 1], [], []>} : vector<8x128xbf16>, vector<128x256xbf16>, vector<8x256xf32> -> vector<8x256xf32>
    %7 = arith.addf %3, %6 : vector<8x256xf32>
    %c0_6 = arith.constant 0 : index
    %c0_7 = arith.constant 0 : index
    %8 = vector.load %arg9[%c0_6, %c0_7] : memref<8x256xf32, #tpu.memory_space<vmem>>, vector<8x256xf32>
    tpu.vector_store %arg9[%c0_6, %c0_7], %7 {strides = array<i32>} : memref<8x256xf32, #tpu.memory_space<vmem>>, vector<8x256xf32>,
    %c0_i32_8 = arith.constant 0 : i32
    %9 = arith.cmpi eq, %arg2, %c0_i32_8 : i32
    %10 = arith.extui %9 : i1 to i32
    %c0_i32_9 = arith.constant 0 : i32
    %11 = arith.cmpi ne, %10, %c0_i32_9 : i32
    scf.if %11 {
      %c0_10 = arith.constant 0 : index
      %c0_11 = arith.constant 0 : index
      %12 = vector.load %arg9[%c0_10, %c0_11] : memref<8x256xf32, #tpu.memory_space<vmem>>, vector<8x256xf32>
      %c0_12 = arith.constant 0 : index
      %c0_13 = arith.constant 0 : index
      %13 = vector.load %arg5[%c0_12, %c0_13] : memref<1x256xf32, #tpu.memory_space<vmem>>, vector<1x256xf32>
      %14 = vector.broadcast %13 : vector<1x256xf32> to vector<8x256xf32>
      %15 = arith.mulf %12, %14 : vector<8x256xf32>
      %c0_14 = arith.constant 0 : index
      %c0_15 = arith.constant 0 : index
      %16 = vector.load %arg6[%c0_14, %c0_15] : memref<1x256xf32, #tpu.memory_space<vmem>>, vector<1x256xf32>
      %17 = vector.broadcast %16 : vector<1x256xf32> to vector<8x256xf32>
      %18 = arith.addf %15, %17 : vector<8x256xf32>
      %c0_16 = arith.constant 0 : index
      %c0_17 = arith.constant 0 : index
      %19 = vector.load %arg7[%c0_16, %c0_17] : memref<8x256xf32, #tpu.memory_space<vmem>>, vector<8x256xf32>
      %20 = arith.addf %18, %19 : vector<8x256xf32>
      %cst_18 = arith.constant 0.000000e+00 : f32
      %21 = vector.broadcast %cst_18 : f32 to vector<8x256xf32>
      %22 = arith.maximumf %20, %21 : vector<8x256xf32>
      %c0_19 = arith.constant 0 : index
      %c0_20 = arith.constant 0 : index
      %23 = vector.load %arg8[%c0_19, %c0_20] : memref<8x256xf32, #tpu.memory_space<vmem>>, vector<8x256xf32>
      tpu.vector_store %arg8[%c0_19, %c0_20], %22 {strides = array<i32>} : memref<8x256xf32, #tpu.memory_space<vmem>>, vector<8x256xf32>,
    } else {
    }
    return
  }
  func.func @transform_0(%arg0: i32, %arg1: i32, %arg2: i32) -> (i32, i32) {
    %c0_i32 = arith.constant 0 : i32
    return %arg0, %arg2 : i32, i32
  }
  func.func @transform_1(%arg0: i32, %arg1: i32, %arg2: i32) -> (i32, i32) {
    %c0_i32 = arith.constant 0 : i32
    return %arg2, %arg1 : i32, i32
  }
  func.func @transform_2(%arg0: i32, %arg1: i32, %arg2: i32) -> (i32, i32) {
    %c0_i32 = arith.constant 0 : i32
    %c0_i32_0 = arith.constant 0 : i32
    return %c0_i32, %arg1 : i32, i32
  }
  func.func @transform_3(%arg0: i32, %arg1: i32, %arg2: i32) -> (i32, i32) {
    %c0_i32 = arith.constant 0 : i32
    %c0_i32_0 = arith.constant 0 : i32
    return %c0_i32, %arg1 : i32, i32
  }
  func.func @transform_4(%arg0: i32, %arg1: i32, %arg2: i32) -> (i32, i32) {
    %c0_i32 = arith.constant 0 : i32
    return %arg0, %arg1 : i32, i32
  }
  func.func @transform_5(%arg0: i32, %arg1: i32, %arg2: i32) -> (i32, i32) {
    %c0_i32 = arith.constant 0 : i32
    return %arg0, %arg1 : i32, i32
  }
}

module attributes {stable_mosaic.version = 11 : i64} {
  func.func @_matmul_fused_kernel(%arg0: i32, %arg1: i32, %arg2: i32, %arg3: memref<8x128xbf16, #tpu.memory_space<vmem>>, %arg4: memref<128x128xbf16, #tpu.memory_space<vmem>>, %arg5: memref<1x128xf32, #tpu.memory_space<vmem>>, %arg6: memref<1x128xf32, #tpu.memory_space<vmem>>, %arg7: memref<8x128xf32, #tpu.memory_space<vmem>>, %arg8: memref<8x128xf32, #tpu.memory_space<vmem>>) attributes {dimension_semantics = [#tpu.dimension_semantics<parallel>, #tpu.dimension_semantics<parallel>, #tpu.dimension_semantics<arbitrary>], iteration_bounds = array<i64: 1, 1, 5>, scalar_prefetch = 0 : i64, scratch_operands = 1 : i64, tpu.core_type = #tpu.core_type<tc>, window_params = [{transform_indices = @transform_0, window_bounds = array<i64: 8, 128>}, {transform_indices = @transform_1, window_bounds = array<i64: 128, 128>}, {transform_indices = @transform_2, window_bounds = array<i64: 1, 128>}, {transform_indices = @transform_3, window_bounds = array<i64: 1, 128>}, {transform_indices = @transform_4, window_bounds = array<i64: 8, 128>}]} {
    %c0_i32 = arith.constant 0 : i32
    %0 = arith.cmpi eq, %arg2, %c0_i32 : i32
    %1 = arith.extui %0 : i1 to i32
    %c0_i32_0 = arith.constant 0 : i32
    %2 = arith.cmpi ne, %1, %c0_i32_0 : i32
    scf.if %2 {
      %cst_9 = arith.constant 0.000000e+00 : f32
      %12 = vector.broadcast %cst_9 : f32 to vector<8x128xf32>
      %c0_10 = arith.constant 0 : index
      %c0_11 = arith.constant 0 : index
      %13 = vector.load %arg8[%c0_10, %c0_11] : memref<8x128xf32, #tpu.memory_space<vmem>>, vector<8x128xf32>
      tpu.vector_store %arg8[%c0_10, %c0_11], %12 {strides = array<i32>} : memref<8x128xf32, #tpu.memory_space<vmem>>, vector<8x128xf32>,
    } else {
    }
    %c0 = arith.constant 0 : index
    %c0_1 = arith.constant 0 : index
    %3 = vector.load %arg8[%c0, %c0_1] : memref<8x128xf32, #tpu.memory_space<vmem>>, vector<8x128xf32>
    %c0_2 = arith.constant 0 : index
    %c0_3 = arith.constant 0 : index
    %4 = vector.load %arg3[%c0_2, %c0_3] : memref<8x128xbf16, #tpu.memory_space<vmem>>, vector<8x128xbf16>
    %c0_4 = arith.constant 0 : index
    %c0_5 = arith.constant 0 : index
    %5 = vector.load %arg4[%c0_4, %c0_5] : memref<128x128xbf16, #tpu.memory_space<vmem>>, vector<128x128xbf16>
    %cst = arith.constant dense<0.000000e+00> : vector<8x128xf32>
    %6 = tpu.matmul %4, %5, %cst {dimension_numbers = #tpu.dot_dimension_numbers<[1], [0], [0], [1], [0, 0, 1, 1], [], []>} : vector<8x128xbf16>, vector<128x128xbf16>, vector<8x128xf32> -> vector<8x128xf32>
    %7 = arith.addf %3, %6 : vector<8x128xf32>
    %c0_6 = arith.constant 0 : index
    %c0_7 = arith.constant 0 : index
    %8 = vector.load %arg8[%c0_6, %c0_7] : memref<8x128xf32, #tpu.memory_space<vmem>>, vector<8x128xf32>
    tpu.vector_store %arg8[%c0_6, %c0_7], %7 {strides = array<i32>} : memref<8x128xf32, #tpu.memory_space<vmem>>, vector<8x128xf32>,
    %c4_i32 = arith.constant 4 : i32
    %9 = arith.cmpi eq, %arg2, %c4_i32 : i32
    %10 = arith.extui %9 : i1 to i32
    %c0_i32_8 = arith.constant 0 : i32
    %11 = arith.cmpi ne, %10, %c0_i32_8 : i32
    scf.if %11 {
      %c0_9 = arith.constant 0 : index
      %c0_10 = arith.constant 0 : index
      %12 = vector.load %arg8[%c0_9, %c0_10] : memref<8x128xf32, #tpu.memory_space<vmem>>, vector<8x128xf32>
      %c0_11 = arith.constant 0 : index
      %c0_12 = arith.constant 0 : index
      %13 = vector.load %arg5[%c0_11, %c0_12] : memref<1x128xf32, #tpu.memory_space<vmem>>, vector<1x128xf32>
      %14 = vector.broadcast %13 : vector<1x128xf32> to vector<8x128xf32>
      %15 = arith.mulf %12, %14 : vector<8x128xf32>
      %c0_13 = arith.constant 0 : index
      %c0_14 = arith.constant 0 : index
      %16 = vector.load %arg6[%c0_13, %c0_14] : memref<1x128xf32, #tpu.memory_space<vmem>>, vector<1x128xf32>
      %17 = vector.broadcast %16 : vector<1x128xf32> to vector<8x128xf32>
      %18 = arith.addf %15, %17 : vector<8x128xf32>
      %cst_15 = arith.constant 0.000000e+00 : f32
      %19 = vector.broadcast %cst_15 : f32 to vector<8x128xf32>
      %20 = arith.maximumf %18, %19 : vector<8x128xf32>
      %c0_16 = arith.constant 0 : index
      %c0_17 = arith.constant 0 : index
      %21 = vector.load %arg7[%c0_16, %c0_17] : memref<8x128xf32, #tpu.memory_space<vmem>>, vector<8x128xf32>
      tpu.vector_store %arg7[%c0_16, %c0_17], %20 {strides = array<i32>} : memref<8x128xf32, #tpu.memory_space<vmem>>, vector<8x128xf32>,
    } else {
    }
    return
  }
  func.func @transform_0(%arg0: i32, %arg1: i32, %arg2: i32) -> (i32, i32) {
    %c0_i32 = arith.constant 0 : i32
    return %arg0, %arg2 : i32, i32
  }
  func.func @transform_1(%arg0: i32, %arg1: i32, %arg2: i32) -> (i32, i32) {
    %c0_i32 = arith.constant 0 : i32
    return %arg2, %arg1 : i32, i32
  }
  func.func @transform_2(%arg0: i32, %arg1: i32, %arg2: i32) -> (i32, i32) {
    %c0_i32 = arith.constant 0 : i32
    %c0_i32_0 = arith.constant 0 : i32
    return %c0_i32, %arg1 : i32, i32
  }
  func.func @transform_3(%arg0: i32, %arg1: i32, %arg2: i32) -> (i32, i32) {
    %c0_i32 = arith.constant 0 : i32
    %c0_i32_0 = arith.constant 0 : i32
    return %c0_i32, %arg1 : i32, i32
  }
  func.func @transform_4(%arg0: i32, %arg1: i32, %arg2: i32) -> (i32, i32) {
    %c0_i32 = arith.constant 0 : i32
    return %arg0, %arg1 : i32, i32
  }
}

module attributes {stable_mosaic.version = 11 : i64} {
  func.func @_matmul_fused_kernel(%arg0: i32, %arg1: i32, %arg2: i32, %arg3: memref<8x256xbf16, #tpu.memory_space<vmem>>, %arg4: memref<256x256xbf16, #tpu.memory_space<vmem>>, %arg5: memref<1x256xf32, #tpu.memory_space<vmem>>, %arg6: memref<1x256xf32, #tpu.memory_space<vmem>>, %arg7: memref<8x256xf32, #tpu.memory_space<vmem>>, %arg8: memref<8x256xf32, #tpu.memory_space<vmem>>) attributes {dimension_semantics = [#tpu.dimension_semantics<parallel>, #tpu.dimension_semantics<parallel>, #tpu.dimension_semantics<arbitrary>], iteration_bounds = array<i64: 1, 1, 1>, scalar_prefetch = 0 : i64, scratch_operands = 1 : i64, tpu.core_type = #tpu.core_type<tc>, window_params = [{transform_indices = @transform_0, window_bounds = array<i64: 8, 256>}, {transform_indices = @transform_1, window_bounds = array<i64: 256, 256>}, {transform_indices = @transform_2, window_bounds = array<i64: 1, 256>}, {transform_indices = @transform_3, window_bounds = array<i64: 1, 256>}, {transform_indices = @transform_4, window_bounds = array<i64: 8, 256>}]} {
    %c0_i32 = arith.constant 0 : i32
    %0 = arith.cmpi eq, %arg2, %c0_i32 : i32
    %1 = arith.extui %0 : i1 to i32
    %c0_i32_0 = arith.constant 0 : i32
    %2 = arith.cmpi ne, %1, %c0_i32_0 : i32
    scf.if %2 {
      %cst_10 = arith.constant 0.000000e+00 : f32
      %12 = vector.broadcast %cst_10 : f32 to vector<8x256xf32>
      %c0_11 = arith.constant 0 : index
      %c0_12 = arith.constant 0 : index
      %13 = vector.load %arg8[%c0_11, %c0_12] : memref<8x256xf32, #tpu.memory_space<vmem>>, vector<8x256xf32>
      tpu.vector_store %arg8[%c0_11, %c0_12], %12 {strides = array<i32>} : memref<8x256xf32, #tpu.memory_space<vmem>>, vector<8x256xf32>,
    } else {
    }
    %c0 = arith.constant 0 : index
    %c0_1 = arith.constant 0 : index
    %3 = vector.load %arg8[%c0, %c0_1] : memref<8x256xf32, #tpu.memory_space<vmem>>, vector<8x256xf32>
    %c0_2 = arith.constant 0 : index
    %c0_3 = arith.constant 0 : index
    %4 = vector.load %arg3[%c0_2, %c0_3] : memref<8x256xbf16, #tpu.memory_space<vmem>>, vector<8x256xbf16>
    %c0_4 = arith.constant 0 : index
    %c0_5 = arith.constant 0 : index
    %5 = vector.load %arg4[%c0_4, %c0_5] : memref<256x256xbf16, #tpu.memory_space<vmem>>, vector<256x256xbf16>
    %cst = arith.constant dense<0.000000e+00> : vector<8x256xf32>
    %6 = tpu.matmul %4, %5, %cst {dimension_numbers = #tpu.dot_dimension_numbers<[1], [0], [0], [1], [0, 0, 1, 1], [], []>} : vector<8x256xbf16>, vector<256x256xbf16>, vector<8x256xf32> -> vector<8x256xf32>
    %7 = arith.addf %3, %6 : vector<8x256xf32>
    %c0_6 = arith.constant 0 : index
    %c0_7 = arith.constant 0 : index
    %8 = vector.load %arg8[%c0_6, %c0_7] : memref<8x256xf32, #tpu.memory_space<vmem>>, vector<8x256xf32>
    tpu.vector_store %arg8[%c0_6, %c0_7], %7 {strides = array<i32>} : memref<8x256xf32, #tpu.memory_space<vmem>>, vector<8x256xf32>,
    %c0_i32_8 = arith.constant 0 : i32
    %9 = arith.cmpi eq, %arg2, %c0_i32_8 : i32
    %10 = arith.extui %9 : i1 to i32
    %c0_i32_9 = arith.constant 0 : i32
    %11 = arith.cmpi ne, %10, %c0_i32_9 : i32
    scf.if %11 {
      %c0_10 = arith.constant 0 : index
      %c0_11 = arith.constant 0 : index
      %12 = vector.load %arg8[%c0_10, %c0_11] : memref<8x256xf32, #tpu.memory_space<vmem>>, vector<8x256xf32>
      %c0_12 = arith.constant 0 : index
      %c0_13 = arith.constant 0 : index
      %13 = vector.load %arg5[%c0_12, %c0_13] : memref<1x256xf32, #tpu.memory_space<vmem>>, vector<1x256xf32>
      %14 = vector.broadcast %13 : vector<1x256xf32> to vector<8x256xf32>
      %15 = arith.mulf %12, %14 : vector<8x256xf32>
      %c0_14 = arith.constant 0 : index
      %c0_15 = arith.constant 0 : index
      %16 = vector.load %arg6[%c0_14, %c0_15] : memref<1x256xf32, #tpu.memory_space<vmem>>, vector<1x256xf32>
      %17 = vector.broadcast %16 : vector<1x256xf32> to vector<8x256xf32>
      %18 = arith.addf %15, %17 : vector<8x256xf32>
      %c0_16 = arith.constant 0 : index
      %c0_17 = arith.constant 0 : index
      %19 = vector.load %arg7[%c0_16, %c0_17] : memref<8x256xf32, #tpu.memory_space<vmem>>, vector<8x256xf32>
      tpu.vector_store %arg7[%c0_16, %c0_17], %18 {strides = array<i32>} : memref<8x256xf32, #tpu.memory_space<vmem>>, vector<8x256xf32>,
    } else {
    }
    return
  }
  func.func @transform_0(%arg0: i32, %arg1: i32, %arg2: i32) -> (i32, i32) {
    %c0_i32 = arith.constant 0 : i32
    return %arg0, %arg2 : i32, i32
  }
  func.func @transform_1(%arg0: i32, %arg1: i32, %arg2: i32) -> (i32, i32) {
    %c0_i32 = arith.constant 0 : i32
    return %arg2, %arg1 : i32, i32
  }
  func.func @transform_2(%arg0: i32, %arg1: i32, %arg2: i32) -> (i32, i32) {
    %c0_i32 = arith.constant 0 : i32
    %c0_i32_0 = arith.constant 0 : i32
    return %c0_i32, %arg1 : i32, i32
  }
  func.func @transform_3(%arg0: i32, %arg1: i32, %arg2: i32) -> (i32, i32) {
    %c0_i32 = arith.constant 0 : i32
    %c0_i32_0 = arith.constant 0 : i32
    return %c0_i32, %arg1 : i32, i32
  }
  func.func @transform_4(%arg0: i32, %arg1: i32, %arg2: i32) -> (i32, i32) {
    %c0_i32 = arith.constant 0 : i32
    return %arg0, %arg1 : i32, i32
  }
}

module attributes {stable_mosaic.version = 11 : i64} {
  func.func @_attnpool_kernel(%arg0: memref<8x1x128xf32, #tpu.memory_space<vmem>>, %arg1: memref<8x128x128xf32, #tpu.memory_space<vmem>>, %arg2: memref<8x128x128xf32, #tpu.memory_space<vmem>>, %arg3: memref<8x1x128xf32, #tpu.memory_space<vmem>>) attributes {dimension_semantics = [], scalar_prefetch = 0 : i64, scratch_operands = 0 : i64, tpu.core_type = #tpu.core_type<tc>} {
    %c0 = arith.constant 0 : index
    %c0_0 = arith.constant 0 : index
    %c0_1 = arith.constant 0 : index
    %0 = vector.load %arg0[%c0, %c0_0, %c0_1] : memref<8x1x128xf32, #tpu.memory_space<vmem>>, vector<8x1x128xf32>
    %cst = arith.constant 1.250000e-01 : f32
    %1 = vector.broadcast %cst : f32 to vector<8x1x128xf32>
    %2 = arith.mulf %0, %1 : vector<8x1x128xf32>
    %c0_2 = arith.constant 0 : index
    %c0_3 = arith.constant 0 : index
    %c0_4 = arith.constant 0 : index
    %3 = vector.load %arg1[%c0_2, %c0_3, %c0_4] : memref<8x128x128xf32, #tpu.memory_space<vmem>>, vector<8x128x128xf32>
    %c0_5 = arith.constant 0 : index
    %c0_6 = arith.constant 0 : index
    %c0_7 = arith.constant 0 : index
    %4 = vector.load %arg2[%c0_5, %c0_6, %c0_7] : memref<8x128x128xf32, #tpu.memory_space<vmem>>, vector<8x128x128xf32>
    "tpu.trace_start"() <{level = 10 : i32, message = "bqd,bkd->bqk"}> : () -> ()
    %cst_8 = arith.constant dense<0.000000e+00> : vector<8x1x128xf32>
    %5 = tpu.matmul %2, %3, %cst_8 {dimension_numbers = #tpu.dot_dimension_numbers<[2], [2], [1], [1], [0, 0, 0, 1, 1, 1], [0], [0]>} : vector<8x1x128xf32>, vector<8x128x128xf32>, vector<8x1x128xf32> -> vector<8x1x128xf32>
    "tpu.trace_stop"() : () -> ()
    %6 = tpu.iota {dimensions = array<i32: 2>} : vector<8x1x128xi32>
    %c2_i32 = arith.constant 2 : i32
    %7 = vector.broadcast %c2_i32 : i32 to vector<8x1x128xi32>
    %8 = arith.cmpi slt, %6, %7 : vector<8x1x128xi32>
    %cst_9 = arith.constant 0xFF800000 : f32
    %9 = vector.broadcast %cst_9 : f32 to vector<8x1x128xf32>
    %10 = arith.select %8, %5, %9 : vector<8x1x128xi1>, vector<8x1x128xf32>
    %cst_10 = arith.constant dense<0xFF800000> : vector<8x1xf32>
    %11 = vector.multi_reduction <maximumf>, %10, %cst_10 [2] : vector<8x1x128xf32> to vector<8x1xf32>
    %12 = vector.shape_cast %11 : vector<8x1xf32> to vector<8x1x1xf32>
    %13 = vector.broadcast %12 : vector<8x1x1xf32> to vector<8x1x128xf32>
    %14 = arith.subf %10, %13 : vector<8x1x128xf32>
    %15 = math.exp %14 : vector<8x1x128xf32>
    %cst_11 = arith.constant dense<0.000000e+00> : vector<8x1xf32>
    %16 = vector.multi_reduction <add>, %15, %cst_11 [2] : vector<8x1x128xf32> to vector<8x1xf32>
    %17 = vector.shape_cast %16 : vector<8x1xf32> to vector<8x1x1xf32>
    %18 = tpu.reciprocal %17 {approx = true} : vector<8x1x1xf32> -> vector<8x1x1xf32>
    %19 = vector.broadcast %18 : vector<8x1x1xf32> to vector<8x1x128xf32>
    %20 = arith.mulf %15, %19 : vector<8x1x128xf32>
    "tpu.trace_start"() <{level = 10 : i32, message = "bqk,bkd->bqd"}> : () -> ()
    %cst_12 = arith.constant dense<0.000000e+00> : vector<8x1x128xf32>
    %21 = tpu.matmul %20, %4, %cst_12 {dimension_numbers = #tpu.dot_dimension_numbers<[2], [1], [1], [2], [0, 0, 0, 1, 1, 2], [0], [0]>} : vector<8x1x128xf32>, vector<8x128x128xf32>, vector<8x1x128xf32> -> vector<8x1x128xf32>
    "tpu.trace_stop"() : () -> ()
    %c0_13 = arith.constant 0 : index
    %c0_14 = arith.constant 0 : index
    %c0_15 = arith.constant 0 : index
    %22 = vector.load %arg3[%c0_13, %c0_14, %c0_15] : memref<8x1x128xf32, #tpu.memory_space<vmem>>, vector<8x1x128xf32>
    tpu.vector_store %arg3[%c0_13, %c0_14, %c0_15], %21 {strides = array<i32>} : memref<8x1x128xf32, #tpu.memory_space<vmem>>, vector<8x1x128xf32>,
    return
  }
}

module attributes {stable_mosaic.version = 11 : i64} {
  func.func @_matmul_fused_kernel(%arg0: i32, %arg1: i32, %arg2: i32, %arg3: memref<8x256xbf16, #tpu.memory_space<vmem>>, %arg4: memref<256x128xbf16, #tpu.memory_space<vmem>>, %arg5: memref<1x128xf32, #tpu.memory_space<vmem>>, %arg6: memref<1x128xf32, #tpu.memory_space<vmem>>, %arg7: memref<8x128xf32, #tpu.memory_space<vmem>>, %arg8: memref<8x128xf32, #tpu.memory_space<vmem>>) attributes {dimension_semantics = [#tpu.dimension_semantics<parallel>, #tpu.dimension_semantics<parallel>, #tpu.dimension_semantics<arbitrary>], iteration_bounds = array<i64: 1, 1, 1>, scalar_prefetch = 0 : i64, scratch_operands = 1 : i64, tpu.core_type = #tpu.core_type<tc>, window_params = [{transform_indices = @transform_0, window_bounds = array<i64: 8, 256>}, {transform_indices = @transform_1, window_bounds = array<i64: 256, 128>}, {transform_indices = @transform_2, window_bounds = array<i64: 1, 128>}, {transform_indices = @transform_3, window_bounds = array<i64: 1, 128>}, {transform_indices = @transform_4, window_bounds = array<i64: 8, 128>}]} {
    %c0_i32 = arith.constant 0 : i32
    %0 = arith.cmpi eq, %arg2, %c0_i32 : i32
    %1 = arith.extui %0 : i1 to i32
    %c0_i32_0 = arith.constant 0 : i32
    %2 = arith.cmpi ne, %1, %c0_i32_0 : i32
    scf.if %2 {
      %cst_10 = arith.constant 0.000000e+00 : f32
      %12 = vector.broadcast %cst_10 : f32 to vector<8x128xf32>
      %c0_11 = arith.constant 0 : index
      %c0_12 = arith.constant 0 : index
      %13 = vector.load %arg8[%c0_11, %c0_12] : memref<8x128xf32, #tpu.memory_space<vmem>>, vector<8x128xf32>
      tpu.vector_store %arg8[%c0_11, %c0_12], %12 {strides = array<i32>} : memref<8x128xf32, #tpu.memory_space<vmem>>, vector<8x128xf32>,
    } else {
    }
    %c0 = arith.constant 0 : index
    %c0_1 = arith.constant 0 : index
    %3 = vector.load %arg8[%c0, %c0_1] : memref<8x128xf32, #tpu.memory_space<vmem>>, vector<8x128xf32>
    %c0_2 = arith.constant 0 : index
    %c0_3 = arith.constant 0 : index
    %4 = vector.load %arg3[%c0_2, %c0_3] : memref<8x256xbf16, #tpu.memory_space<vmem>>, vector<8x256xbf16>
    %c0_4 = arith.constant 0 : index
    %c0_5 = arith.constant 0 : index
    %5 = vector.load %arg4[%c0_4, %c0_5] : memref<256x128xbf16, #tpu.memory_space<vmem>>, vector<256x128xbf16>
    %cst = arith.constant dense<0.000000e+00> : vector<8x128xf32>
    %6 = tpu.matmul %4, %5, %cst {dimension_numbers = #tpu.dot_dimension_numbers<[1], [0], [0], [1], [0, 0, 1, 1], [], []>} : vector<8x256xbf16>, vector<256x128xbf16>, vector<8x128xf32> -> vector<8x128xf32>
    %7 = arith.addf %3, %6 : vector<8x128xf32>
    %c0_6 = arith.constant 0 : index
    %c0_7 = arith.constant 0 : index
    %8 = vector.load %arg8[%c0_6, %c0_7] : memref<8x128xf32, #tpu.memory_space<vmem>>, vector<8x128xf32>
    tpu.vector_store %arg8[%c0_6, %c0_7], %7 {strides = array<i32>} : memref<8x128xf32, #tpu.memory_space<vmem>>, vector<8x128xf32>,
    %c0_i32_8 = arith.constant 0 : i32
    %9 = arith.cmpi eq, %arg2, %c0_i32_8 : i32
    %10 = arith.extui %9 : i1 to i32
    %c0_i32_9 = arith.constant 0 : i32
    %11 = arith.cmpi ne, %10, %c0_i32_9 : i32
    scf.if %11 {
      %c0_10 = arith.constant 0 : index
      %c0_11 = arith.constant 0 : index
      %12 = vector.load %arg8[%c0_10, %c0_11] : memref<8x128xf32, #tpu.memory_space<vmem>>, vector<8x128xf32>
      %c0_12 = arith.constant 0 : index
      %c0_13 = arith.constant 0 : index
      %13 = vector.load %arg5[%c0_12, %c0_13] : memref<1x128xf32, #tpu.memory_space<vmem>>, vector<1x128xf32>
      %14 = vector.broadcast %13 : vector<1x128xf32> to vector<8x128xf32>
      %15 = arith.mulf %12, %14 : vector<8x128xf32>
      %c0_14 = arith.constant 0 : index
      %c0_15 = arith.constant 0 : index
      %16 = vector.load %arg6[%c0_14, %c0_15] : memref<1x128xf32, #tpu.memory_space<vmem>>, vector<1x128xf32>
      %17 = vector.broadcast %16 : vector<1x128xf32> to vector<8x128xf32>
      %18 = arith.addf %15, %17 : vector<8x128xf32>
      %c0_16 = arith.constant 0 : index
      %c0_17 = arith.constant 0 : index
      %19 = vector.load %arg7[%c0_16, %c0_17] : memref<8x128xf32, #tpu.memory_space<vmem>>, vector<8x128xf32>
      tpu.vector_store %arg7[%c0_16, %c0_17], %18 {strides = array<i32>} : memref<8x128xf32, #tpu.memory_space<vmem>>, vector<8x128xf32>,
    } else {
    }
    return
  }
  func.func @transform_0(%arg0: i32, %arg1: i32, %arg2: i32) -> (i32, i32) {
    %c0_i32 = arith.constant 0 : i32
    return %arg0, %arg2 : i32, i32
  }
  func.func @transform_1(%arg0: i32, %arg1: i32, %arg2: i32) -> (i32, i32) {
    %c0_i32 = arith.constant 0 : i32
    return %arg2, %arg1 : i32, i32
  }
  func.func @transform_2(%arg0: i32, %arg1: i32, %arg2: i32) -> (i32, i32) {
    %c0_i32 = arith.constant 0 : i32
    %c0_i32_0 = arith.constant 0 : i32
    return %c0_i32, %arg1 : i32, i32
  }
  func.func @transform_3(%arg0: i32, %arg1: i32, %arg2: i32) -> (i32, i32) {
    %c0_i32 = arith.constant 0 : i32
    %c0_i32_0 = arith.constant 0 : i32
    return %c0_i32, %arg1 : i32, i32
  }
  func.func @transform_4(%arg0: i32, %arg1: i32, %arg2: i32) -> (i32, i32) {
    %c0_i32 = arith.constant 0 : i32
    return %arg0, %arg1 : i32, i32
  }
}

</mosaic_0001>

<bundles_post_ra>
// kernel: _lambda_.25
= control target key start
LH: loop header
LB: loop body
LE: loop exit
PB: predicated region body
PF: predicated region fallthrough
CT: control target
= control target key end

     0   :  { %s1311_s15 = smov 0   ;;  %s1313_s16 = smov 0   ;;  %s1498_s0 = inlined_call_operand.vmem [shape: bf16[512,128], index: 0, kind: input, shape index: {}]   ;;  %s1499_s1 = inlined_call_operand.vmem [shape: bf16[128,128], index: 1, kind: input, shape index: {}]   ;;  %s1500_s2 = inlined_call_operand.vmem [shape: f32[1,128], index: 2, kind: input, shape index: {}]   ;;  %s1501_s3 = inlined_call_operand.vmem [shape: f32[1,128], index: 3, kind: input, shape index: {}]   ;;  %s1502_s4 = inlined_call_operand.vmem [shape: f32[512,128], index: 4, kind: output, shape index: {}]  }
   0x1   :  { %s1315_s17 = smov 0  }
   0x2 LB: > { %s33_s18 = sadd.s32 1, %s1280_s16  ;;  %p1093_p0 = scmp.ge.s32.totalorder %s1284_s17, 1  ;;  %s1284_s17 = sphi %s1315_s17, %s14_s17   ;;  %s1280_s16 = sphi %s1313_s16, %s1504_s16   ;;  %s1276_s15 = sphi %s1311_s15, %s1503_s15  }
   0x3   : > { %p35_p1 = scmp.ge.s32.totalorder %s33_s18, 2  ;;  %p221_p2 = scmp.lt.s32.totalorder %s1284_s17, 3 }
   0x5   : > { %s1506_s18 = smov (%p35_p1, %s33_s18), 0  ;;  %p222_p3 = pnand %p1093_p0, %p221_p2 }
   0x6   : > { %v1238_v0 = vld [vmem:[%s1499_s1] sm:$0xff] (!%p222_p3)   ;;  %s1094_s21 = sshll.u32 (!%p222_p3), %s1276_s15, 5  ;;  %v1239_v1 = vld [vmem:[%s1499_s1 + $0x8] sm:$0xff] (!%p222_p3)   ;;  %v1240_v2 = vld [vmem:[%s1499_s1 + $0x10] sm:$0xff] (!%p222_p3)  }
   0x7   : > { %225 = sbr.rel (%p222_p3) target bundleno = 285 (0x11d), region = 36  ;;  %p268_p4 = scmp.lt.s32.totalorder (!%p222_p3), %s1094_s21, 63  ;;  %1150 = vmatprep.subr.bf16.mxu0 (!%p222_p3), %v1238_v0  ;;  %1198 = vmatprep.subr.bf16.mxu1 (!%p222_p3), %v1238_v0  ;;  %v1241_v3 = vld [vmem:[%s1499_s1 + $0x18] sm:$0xff] (!%p222_p3)   ;;  %v1242_v6 = vld [vmem:[%s1499_s1 + $0x20] sm:$0xff] (!%p222_p3)   ;;  %v1243_v7 = vld [vmem:[%s1499_s1 + $0x28] sm:$0xff] (!%p222_p3)  }
   0x8   : > { %1151 = vmatpush3.bf16.msra.mxu0 (!%p222_p3), %v1238_v0  ;;  %1206 = vmatpush3.bf16.msra.mxu1 (!%p222_p3), %v1238_v0  ;;  %v1244_v8 = vld [vmem:[%s1499_s1 + $0x30] sm:$0xff] (!%p222_p3)   ;;  %v1245_v9 = vld [vmem:[%s1499_s1 + $0x38] sm:$0xff] (!%p222_p3)   ;;  %v1380_v24 = vld [vmem:[%s1500_s2] ss:$0 sm:$0xff] (!%p222_p3) }
   0x9   : > { %1152 = vmatprep.subr.bf16.mxu0 (!%p222_p3), %v1239_v1  ;;  %1199 = vmatprep.subr.bf16.mxu1 (!%p222_p3), %v1239_v1  ;;  %v1385_v26 = vld [vmem:[%s1501_s3] ss:$0 sm:$0xff] (!%p222_p3) }
   0xc   : > { %1153 = vmatpush3.bf16.msra.mxu0 (!%p222_p3), %v1239_v1  ;;  %1207 = vmatpush3.bf16.msra.mxu1 (!%p222_p3), %v1239_v1 }
   0xd   : > { %1154 = vmatprep.subr.bf16.mxu0 (!%p222_p3), %v1240_v2  ;;  %1200 = vmatprep.subr.bf16.mxu1 (!%p222_p3), %v1240_v2 }
   0xe   : > { %s1508_s21 = smov (!%p268_p4, %s1094_s21), 63 }
   0xf   : > { %s1095_s26 = sshll.u32 %s1508_s21, 2  ;;  %s1097_s22 = sshll.u32 %s1508_s21, 3 }
  0x10   : > { %s1344_s29 = scalar_lea.vmem %s1498_s0, %s1095_s26  ;;  %1155 = vmatpush3.bf16.msra.mxu0 %v1240_v2  ;;  %1208 = vmatpush3.bf16.msra.mxu1 %v1240_v2  ;;  %s1399_s24 = scalar_lea.vmem %s1502_s4, %s1097_s22 }
  0x11   : > { %v1246_v4 = vld [vmem:[%s1344_s29] sm:$0xff]   ;;  %1156 = vmatprep.subr.bf16.mxu0 %v1241_v3  ;;  %1201 = vmatprep.subr.bf16.mxu1 %v1241_v3  ;;  %v1248_v10 = vld [vmem:[%s1344_s29 + $0x8] sm:$0xff]   ;;  %v1250_v12 = vld [vmem:[%s1344_s29 + $0x10] sm:$0xff]  }
  0x12   : > { %v1247_v5 = vld [vmem:[%s1344_s29 + $0x40] sm:$0xff]   ;;  %1166 = vmatprep.mubr.bf16.mxu0 %v1246_v4  ;;  %v1249_v11 = vld [vmem:[%s1344_s29 + $0x48] sm:$0xff]   ;;  %v1251_v13 = vld [vmem:[%s1344_s29 + $0x50] sm:$0xff]  }
  0x13   : > { %1182 = vmatprep.mubr.bf16.mxu1 %v1247_v5  ;;  %v1252_v14 = vld [vmem:[%s1344_s29 + $0x18] sm:$0xff]   ;;  %v1254_v16 = vld [vmem:[%s1344_s29 + $0x20] sm:$0xff]   ;;  %v1256_v18 = vld [vmem:[%s1344_s29 + $0x28] sm:$0xff]  }
  0x14   : > { %1157 = vmatpush3.bf16.msra.mxu0 %v1241_v3  ;;  %1209 = vmatpush3.bf16.msra.mxu1 %v1241_v3  ;;  %v1253_v15 = vld [vmem:[%s1344_s29 + $0x58] sm:$0xff]   ;;  %v1255_v17 = vld [vmem:[%s1344_s29 + $0x60] sm:$0xff]   ;;  %v1257_v19 = vld [vmem:[%s1344_s29 + $0x68] sm:$0xff]  }
  0x15   : > { %1158 = vmatprep.subr.bf16.mxu0 %v1242_v6  ;;  %1202 = vmatprep.subr.bf16.mxu1 %v1242_v6  ;;  %v1258_v20 = vld [vmem:[%s1344_s29 + $0x30] sm:$0xff]   ;;  %v1260_v22 = vld [vmem:[%s1344_s29 + $0x38] sm:$0xff]  }
  0x16   : > { %v1259_v21 = vld [vmem:[%s1344_s29 + $0x70] sm:$0xff]   ;;  %v1261_v23 = vld [vmem:[%s1344_s29 + $0x78] sm:$0xff]  }
  0x18   : > { %1159 = vmatpush3.bf16.msra.mxu0 %v1242_v6  ;;  %1210 = vmatpush3.bf16.msra.mxu1 %v1242_v6 }
  0x19   : > { %1160 = vmatprep.subr.bf16.mxu0 %v1243_v7  ;;  %1203 = vmatprep.subr.bf16.mxu1 %v1243_v7 }
  0x1c   : > { %1161 = vmatpush3.bf16.msra.mxu0 %v1243_v7  ;;  %1211 = vmatpush3.bf16.msra.mxu1 %v1243_v7 }
  0x1d   : > { %1162 = vmatprep.subr.bf16.mxu0 %v1244_v8  ;;  %1204 = vmatprep.subr.bf16.mxu1 %v1244_v8 }
  0x20   : > { %1163 = vmatpush3.bf16.msra.mxu0 %v1244_v8  ;;  %1212 = vmatpush3.bf16.msra.mxu1 %v1244_v8 }
  0x21   : > { %1164 = vmatprep.subr.bf16.mxu0 %v1245_v9  ;;  %1205 = vmatprep.subr.bf16.mxu1 %v1245_v9 }
  0x24   : > { %1165 = vmatpush3.bf16.msra.mxu0 %v1245_v9  ;;  %1213 = vmatpush3.bf16.msra.mxu1 %v1245_v9 }
  0x27   : > { %1167 = vmatmul.mubr.bf16.vlgmr.msra.gmra.mrb[0].mxu0 %v1248_v10  ;;  %1183 = vmatmul.mubr.bf16.vlgmr.msra.gmra.mrb[0].mxu1 %v1249_v11 }
  0x28   : > { %1170 = vmatprep.mubr.bf16.mxu0 %v1250_v12  ;;  %1186 = vmatprep.mubr.bf16.mxu1 %v1251_v13 }
  0x2f   : > { %1171 = vmatmul.mubr.bf16.gmra.mrb[4].mxu0 %v1252_v14  ;;  %1187 = vmatmul.mubr.bf16.gmra.mrb[4].mxu1 %v1253_v15 }
  0x30   : > { %1174 = vmatprep.mubr.bf16.mxu0 %v1254_v16  ;;  %1190 = vmatprep.mubr.bf16.mxu1 %v1255_v17 }
  0x37   : > { %1175 = vmatmul.mubr.bf16.gmra.mrb[8].mxu0 %v1256_v18  ;;  %1191 = vmatmul.mubr.bf16.gmra.mrb[8].mxu1 %v1257_v19 }
  0x38   : > { %1178 = vmatprep.mubr.bf16.mxu0 %v1258_v20  ;;  %1194 = vmatprep.mubr.bf16.mxu1 %v1259_v21 }
  0x3f   : > { %1179 = vmatmul.mubr.bf16.gmra.mrb[12].mxu0 %v1260_v22  ;;  %1195 = vmatmul.mubr.bf16.gmra.mrb[12].mxu1 %v1261_v23 }
  0xfa   : > { %v1168_v25 = vpop.f32.mrb[0].mxu0  ;;  %v1184_v27 = vpop.f32.mrb[0].mxu1 }
  0xfb   : > { %v830_v28 = vmul.f32 %v1168_v25, %v1380_v24  ;;  %v846_v29 = vmul.f32 %v1184_v27, %v1380_v24  ;;  %v595_v30 = vpop.f32.mrb[1].mxu0  ;;  %v659_v31 = vpop.f32.mrb[1].mxu1 }
  0xfc   : > { %v828_v32 = vmul.f32 %v1380_v24, %v595_v30  ;;  %v844_v33 = vmul.f32 %v1380_v24, %v659_v31  ;;  %v1169_v34 = vpop.f32.mrb[2].mxu0  ;;  %v1185_v35 = vpop.f32.mrb[2].mxu1 }
  0xfd   : > { %v869_v36 = vadd.f32 %v1385_v26, %v830_v28  ;;  %v885_v37 = vadd.f32 %v1385_v26, %v846_v29  ;;  %v831_v38 = vmul.f32 %v1169_v34, %v1380_v24  ;;  %v847_v39 = vmul.f32 %v1185_v35, %v1380_v24  ;;  %v598_v40 = vpop.f32.mrb[3].mxu0  ;;  %v662_v41 = vpop.f32.mrb[3].mxu1 }
  0xfe   : > { %v867_v42 = vadd.f32 %v1385_v26, %v828_v32  ;;  %v883_v43 = vadd.f32 %v1385_v26, %v844_v33  ;;  %v829_v44 = vmul.f32 %v1380_v24, %v598_v40  ;;  %v845_v45 = vmul.f32 %v1380_v24, %v662_v41 }
  0xff   : > { %v901_v46 = vmax.f32 %v869_v36, 0.0  ;;  %v917_v47 = vmax.f32 %v885_v37, 0.0  ;;  %v870_v48 = vadd.f32 %v1385_v26, %v831_v38  ;;  %v886_v49 = vadd.f32 %v1385_v26, %v847_v39 }
 0x100   : > { %v899_v50 = vmax.f32 %v867_v42, 0.0  ;;  %v915_v51 = vmax.f32 %v883_v43, 0.0  ;;  %v868_v52 = vadd.f32 %v1385_v26, %v829_v44  ;;  %v884_v53 = vadd.f32 %v1385_v26, %v845_v45 }
 0x101   : > { %933 = vst [vmem:[%s1399_s24 + $0x10] sm:$0xff] %v901_v46  ;;  %949 = vst [vmem:[%s1399_s24 + $0x90] sm:$0xff] %v917_v47  ;;  %v902_v54 = vmax.f32 %v870_v48, 0.0  ;;  %v918_v55 = vmax.f32 %v886_v49, 0.0 }
 0x102   : > { %931 = vst [vmem:[%s1399_s24] sm:$0xff] %v899_v50  ;;  %947 = vst [vmem:[%s1399_s24 + $0x80] sm:$0xff] %v915_v51  ;;  %v900_v56 = vmax.f32 %v868_v52, 0.0  ;;  %v916_v57 = vmax.f32 %v884_v53, 0.0  ;;  %v1172_v58 = vpop.f32.mrb[4].mxu0  ;;  %v1188_v59 = vpop.f32.mrb[4].mxu1 }
 0x103   : > { %934 = vst [vmem:[%s1399_s24 + $0x18] sm:$0xff] %v902_v54  ;;  %950 = vst [vmem:[%s1399_s24 + $0x98] sm:$0xff] %v918_v55  ;;  %v834_v60 = vmul.f32 %v1172_v58, %v1380_v24  ;;  %v850_v61 = vmul.f32 %v1188_v59, %v1380_v24  ;;  %v611_v62 = vpop.f32.mrb[5].mxu0  ;;  %v675_v63 = vpop.f32.mrb[5].mxu1 }
 0x104   : > { %932 = vst [vmem:[%s1399_s24 + $0x8] sm:$0xff] %v900_v56  ;;  %948 = vst [vmem:[%s1399_s24 + $0x88] sm:$0xff] %v916_v57  ;;  %v832_v0 = vmul.f32 %v1380_v24, %v611_v62  ;;  %v848_v1 = vmul.f32 %v1380_v24, %v675_v63  ;;  %v1173_v2 = vpop.f32.mrb[6].mxu0  ;;  %v1189_v3 = vpop.f32.mrb[6].mxu1 }
 0x105   : > { %v873_v4 = vadd.f32 %v1385_v26, %v834_v60  ;;  %v889_v5 = vadd.f32 %v1385_v26, %v850_v61  ;;  %v835_v6 = vmul.f32 %v1173_v2, %v1380_v24  ;;  %v851_v7 = vmul.f32 %v1189_v3, %v1380_v24  ;;  %v614_v8 = vpop.f32.mrb[7].mxu0  ;;  %v678_v9 = vpop.f32.mrb[7].mxu1 }
 0x106   : > { %v871_v10 = vadd.f32 %v1385_v26, %v832_v0  ;;  %v887_v11 = vadd.f32 %v1385_v26, %v848_v1  ;;  %v833_v12 = vmul.f32 %v1380_v24, %v614_v8  ;;  %v849_v13 = vmul.f32 %v1380_v24, %v678_v9 }
 0x107   : > { %v905_v14 = vmax.f32 %v873_v4, 0.0  ;;  %v921_v15 = vmax.f32 %v889_v5, 0.0  ;;  %v874_v16 = vadd.f32 %v1385_v26, %v835_v6  ;;  %v890_v17 = vadd.f32 %v1385_v26, %v851_v7 }
 0x108   : > { %v903_v18 = vmax.f32 %v871_v10, 0.0  ;;  %v919_v19 = vmax.f32 %v887_v11, 0.0  ;;  %v872_v20 = vadd.f32 %v1385_v26, %v833_v12  ;;  %v888_v21 = vadd.f32 %v1385_v26, %v849_v13 }
 0x109   : > { %937 = vst [vmem:[%s1399_s24 + $0x30] sm:$0xff] %v905_v14  ;;  %953 = vst [vmem:[%s1399_s24 + $0xb0] sm:$0xff] %v921_v15  ;;  %v906_v22 = vmax.f32 %v874_v16, 0.0  ;;  %v922_v23 = vmax.f32 %v890_v17, 0.0 }
 0x10a   : > { %935 = vst [vmem:[%s1399_s24 + $0x20] sm:$0xff] %v903_v18  ;;  %951 = vst [vmem:[%s1399_s24 + $0xa0] sm:$0xff] %v919_v19  ;;  %v904_v25 = vmax.f32 %v872_v20, 0.0  ;;  %v920_v27 = vmax.f32 %v888_v21, 0.0  ;;  %v1176_v28 = vpop.f32.mrb[8].mxu0  ;;  %v1192_v29 = vpop.f32.mrb[8].mxu1 }
 0x10b   : > { %938 = vst [vmem:[%s1399_s24 + $0x38] sm:$0xff] %v906_v22  ;;  %954 = vst [vmem:[%s1399_s24 + $0xb8] sm:$0xff] %v922_v23  ;;  %v838_v30 = vmul.f32 %v1176_v28, %v1380_v24  ;;  %v854_v31 = vmul.f32 %v1192_v29, %v1380_v24  ;;  %v627_v32 = vpop.f32.mrb[9].mxu0  ;;  %v691_v33 = vpop.f32.mrb[9].mxu1 }
 0x10c   : > { %936 = vst [vmem:[%s1399_s24 + $0x28] sm:$0xff] %v904_v25  ;;  %952 = vst [vmem:[%s1399_s24 + $0xa8] sm:$0xff] %v920_v27  ;;  %v836_v34 = vmul.f32 %v1380_v24, %v627_v32  ;;  %v852_v35 = vmul.f32 %v1380_v24, %v691_v33  ;;  %v1177_v36 = vpop.f32.mrb[10].mxu0  ;;  %v1193_v37 = vpop.f32.mrb[10].mxu1 }
 0x10d   : > { %v877_v38 = vadd.f32 %v1385_v26, %v838_v30  ;;  %v893_v39 = vadd.f32 %v1385_v26, %v854_v31  ;;  %v839_v40 = vmul.f32 %v1177_v36, %v1380_v24  ;;  %v855_v41 = vmul.f32 %v1193_v37, %v1380_v24  ;;  %v630_v42 = vpop.f32.mrb[11].mxu0  ;;  %v694_v43 = vpop.f32.mrb[11].mxu1 }
 0x10e   : > { %v875_v44 = vadd.f32 %v1385_v26, %v836_v34  ;;  %v891_v45 = vadd.f32 %v1385_v26, %v852_v35  ;;  %v837_v46 = vmul.f32 %v1380_v24, %v630_v42  ;;  %v853_v47 = vmul.f32 %v1380_v24, %v694_v43 }
 0x10f   : > { %v909_v48 = vmax.f32 %v877_v38, 0.0  ;;  %v925_v49 = vmax.f32 %v893_v39, 0.0  ;;  %v878_v50 = vadd.f32 %v1385_v26, %v839_v40  ;;  %v894_v51 = vadd.f32 %v1385_v26, %v855_v41 }
 0x110   : > { %v907_v52 = vmax.f32 %v875_v44, 0.0  ;;  %v923_v53 = vmax.f32 %v891_v45, 0.0  ;;  %v876_v54 = vadd.f32 %v1385_v26, %v837_v46  ;;  %v892_v55 = vadd.f32 %v1385_v26, %v853_v47 }
 0x111   : > { %941 = vst [vmem:[%s1399_s24 + $0x50] sm:$0xff] %v909_v48  ;;  %957 = vst [vmem:[%s1399_s24 + $0xd0] sm:$0xff] %v925_v49  ;;  %v910_v56 = vmax.f32 %v878_v50, 0.0  ;;  %v926_v57 = vmax.f32 %v894_v51, 0.0 }
 0x112   : > { %939 = vst [vmem:[%s1399_s24 + $0x40] sm:$0xff] %v907_v52  ;;  %955 = vst [vmem:[%s1399_s24 + $0xc0] sm:$0xff] %v923_v53  ;;  %v908_v58 = vmax.f32 %v876_v54, 0.0  ;;  %v924_v59 = vmax.f32 %v892_v55, 0.0  ;;  %v1180_v60 = vpop.f32.mrb[12].mxu0  ;;  %v1196_v61 = vpop.f32.mrb[12].mxu1 }
 0x113   : > { %942 = vst [vmem:[%s1399_s24 + $0x58] sm:$0xff] %v910_v56  ;;  %958 = vst [vmem:[%s1399_s24 + $0xd8] sm:$0xff] %v926_v57  ;;  %v842_v62 = vmul.f32 %v1180_v60, %v1380_v24  ;;  %v858_v63 = vmul.f32 %v1196_v61, %v1380_v24  ;;  %v643_v0 = vpop.f32.mrb[13].mxu0  ;;  %v707_v1 = vpop.f32.mrb[13].mxu1 }
 0x114   : > { %940 = vst [vmem:[%s1399_s24 + $0x48] sm:$0xff] %v908_v58  ;;  %956 = vst [vmem:[%s1399_s24 + $0xc8] sm:$0xff] %v924_v59  ;;  %v840_v2 = vmul.f32 %v1380_v24, %v643_v0  ;;  %v856_v3 = vmul.f32 %v1380_v24, %v707_v1  ;;  %v1181_v4 = vpop.f32.mrb[14].mxu0  ;;  %v1197_v5 = vpop.f32.mrb[14].mxu1 }
 0x115   : > { %v881_v6 = vadd.f32 %v1385_v26, %v842_v62  ;;  %v897_v7 = vadd.f32 %v1385_v26, %v858_v63  ;;  %v843_v8 = vmul.f32 %v1181_v4, %v1380_v24  ;;  %v859_v9 = vmul.f32 %v1197_v5, %v1380_v24  ;;  %v646_v10 = vpop.f32.mrb[15].mxu0  ;;  %v710_v11 = vpop.f32.mrb[15].mxu1 }
 0x116   : > { %v879_v12 = vadd.f32 %v1385_v26, %v840_v2  ;;  %v895_v13 = vadd.f32 %v1385_v26, %v856_v3  ;;  %v841_v14 = vmul.f32 %v1380_v24, %v646_v10  ;;  %v857_v15 = vmul.f32 %v1380_v24, %v710_v11 }
 0x117   : > { %v913_v16 = vmax.f32 %v881_v6, 0.0  ;;  %v929_v17 = vmax.f32 %v897_v7, 0.0  ;;  %v882_v18 = vadd.f32 %v1385_v26, %v843_v8  ;;  %v898_v19 = vadd.f32 %v1385_v26, %v859_v9 }
 0x118   : > { %v911_v20 = vmax.f32 %v879_v12, 0.0  ;;  %v927_v21 = vmax.f32 %v895_v13, 0.0  ;;  %v880_v22 = vadd.f32 %v1385_v26, %v841_v14  ;;  %v896_v23 = vadd.f32 %v1385_v26, %v857_v15 }
 0x119   : > { %945 = vst [vmem:[%s1399_s24 + $0x70] sm:$0xff] %v913_v16  ;;  %961 = vst [vmem:[%s1399_s24 + $0xf0] sm:$0xff] %v929_v17  ;;  %v914_v25 = vmax.f32 %v882_v18, 0.0  ;;  %v930_v24 = vmax.f32 %v898_v19, 0.0 }
 0x11a   : > { %943 = vst [vmem:[%s1399_s24 + $0x60] sm:$0xff] %v911_v20  ;;  %959 = vst [vmem:[%s1399_s24 + $0xe0] sm:$0xff] %v927_v21  ;;  %v912_v27 = vmax.f32 %v880_v22, 0.0  ;;  %v928_v28 = vmax.f32 %v896_v23, 0.0 }
 0x11b   : > { %946 = vst [vmem:[%s1399_s24 + $0x78] sm:$0xff] %v914_v25  ;;  %962 = vst [vmem:[%s1399_s24 + $0xf8] sm:$0xff] %v930_v24 }
 0x11c   : > { %944 = vst [vmem:[%s1399_s24 + $0x68] sm:$0xff] %v912_v27  ;;  %960 = vst [vmem:[%s1399_s24 + $0xe8] sm:$0xff] %v928_v28 }
 0x11d PF: > { %s14_s17 = sadd.s32 1, %s1284_s17   ;;  %s1503_s15 = smov %s1280_s16 }
 0x11e   : > { %p11_p5 = scmp.ge.s32.totalorder %s14_s17, 4   ;;  %s1504_s16 = smov %s1506_s18 }
 0x120   :  { %13 = sbr.rel (!%p11_p5) target bundleno = 2 (0x2), region = 83 }

// kernel: _lambda_.28
= control target key start
LH: loop header
LB: loop body
LE: loop exit
PB: predicated region body
PF: predicated region fallthrough
CT: control target
= control target key end

     0   :  { %s655_s1 = inlined_call_operand.vmem [shape: bf16[128,128], index: 1, kind: input, shape index: {}]   ;;  %s656_s0 = inlined_call_operand.vmem [shape: bf16[128,128], index: 0, kind: input, shape index: {}]   ;;  %s657_s2 = inlined_call_operand.vmem [shape: f32[1,128], index: 2, kind: input, shape index: {}]   ;;  %s658_s3 = inlined_call_operand.vmem [shape: f32[1,128], index: 3, kind: input, shape index: {}]   ;;  %s659_s4 = inlined_call_operand.vmem [shape: f32[128,128], index: 4, kind: output, shape index: {}]  }
   0x1   :  { %v494_v0 = vld [vmem:[%s655_s1] sm:$0xff]   ;;  %v495_v1 = vld [vmem:[%s655_s1 + $0x8] sm:$0xff]   ;;  %v496_v2 = vld [vmem:[%s655_s1 + $0x10] sm:$0xff]  }
   0x2   :  { %446 = vmatprep.subr.bf16.mxu0 %v494_v0  ;;  %478 = vmatprep.subr.bf16.mxu1 %v494_v0  ;;  %v497_v3 = vld [vmem:[%s655_s1 + $0x18] sm:$0xff]   ;;  %v502_v4 = vld [vmem:[%s656_s0] sm:$0xff]   ;;  %v499_v7 = vld [vmem:[%s655_s1 + $0x28] sm:$0xff]  }
   0x3   :  { %447 = vmatpush3.bf16.msra.mxu0 %v494_v0  ;;  %486 = vmatpush3.bf16.msra.mxu1 %v494_v0  ;;  %v503_v5 = vld [vmem:[%s656_s0 + $0x20] sm:$0xff]   ;;  %v500_v8 = vld [vmem:[%s655_s1 + $0x30] sm:$0xff]   ;;  %v501_v9 = vld [vmem:[%s655_s1 + $0x38] sm:$0xff]  }
   0x4   :  { %448 = vmatprep.subr.bf16.mxu0 %v495_v1  ;;  %479 = vmatprep.subr.bf16.mxu1 %v495_v1  ;;  %v498_v6 = vld [vmem:[%s655_s1 + $0x20] sm:$0xff]   ;;  %v504_v10 = vld [vmem:[%s656_s0 + $0x8] sm:$0xff]   ;;  %v506_v12 = vld [vmem:[%s656_s0 + $0x10] sm:$0xff]  }
   0x5   :  { %462 = vmatprep.mubr.bf16.mxu0 %v502_v4  ;;  %470 = vmatprep.mubr.bf16.mxu1 %v503_v5  ;;  %v505_v11 = vld [vmem:[%s656_s0 + $0x28] sm:$0xff]   ;;  %v507_v13 = vld [vmem:[%s656_s0 + $0x30] sm:$0xff]   ;;  %v508_v14 = vld [vmem:[%s656_s0 + $0x18] sm:$0xff]  }
   0x6   :  { %v509_v15 = vld [vmem:[%s656_s0 + $0x38] sm:$0xff]   ;;  %v428_v16 = vld [vmem:[%s657_s2] ss:$0 sm:$0xff] }
   0x7   :  { %449 = vmatpush3.bf16.msra.mxu0 %v495_v1  ;;  %487 = vmatpush3.bf16.msra.mxu1 %v495_v1  ;;  %v589_v18 = vld [vmem:[%s658_s3] ss:$0 sm:$0xff] }
   0x8   :  { %450 = vmatprep.subr.bf16.mxu0 %v496_v2  ;;  %480 = vmatprep.subr.bf16.mxu1 %v496_v2 }
   0xb   :  { %451 = vmatpush3.bf16.msra.mxu0 %v496_v2  ;;  %488 = vmatpush3.bf16.msra.mxu1 %v496_v2 }
   0xc   :  { %452 = vmatprep.subr.bf16.mxu0 %v497_v3  ;;  %481 = vmatprep.subr.bf16.mxu1 %v497_v3 }
   0xf   :  { %453 = vmatpush3.bf16.msra.mxu0 %v497_v3  ;;  %489 = vmatpush3.bf16.msra.mxu1 %v497_v3 }
  0x10   :  { %454 = vmatprep.subr.bf16.mxu0 %v498_v6  ;;  %482 = vmatprep.subr.bf16.mxu1 %v498_v6 }
  0x13   :  { %455 = vmatpush3.bf16.msra.mxu0 %v498_v6  ;;  %490 = vmatpush3.bf16.msra.mxu1 %v498_v6 }
  0x14   :  { %456 = vmatprep.subr.bf16.mxu0 %v499_v7  ;;  %483 = vmatprep.subr.bf16.mxu1 %v499_v7 }
  0x17   :  { %457 = vmatpush3.bf16.msra.mxu0 %v499_v7  ;;  %491 = vmatpush3.bf16.msra.mxu1 %v499_v7 }
  0x18   :  { %458 = vmatprep.subr.bf16.mxu0 %v500_v8  ;;  %484 = vmatprep.subr.bf16.mxu1 %v500_v8 }
  0x1b   :  { %459 = vmatpush3.bf16.msra.mxu0 %v500_v8  ;;  %492 = vmatpush3.bf16.msra.mxu1 %v500_v8 }
  0x1c   :  { %460 = vmatprep.subr.bf16.mxu0 %v501_v9  ;;  %485 = vmatprep.subr.bf16.mxu1 %v501_v9 }
  0x1f   :  { %461 = vmatpush3.bf16.msra.mxu0 %v501_v9  ;;  %493 = vmatpush3.bf16.msra.mxu1 %v501_v9 }
  0x22   :  { %463 = vmatmul.mubr.bf16.vlgmr.msra.gmra.mrb[0].mxu0 %v504_v10  ;;  %471 = vmatmul.mubr.bf16.vlgmr.msra.gmra.mrb[0].mxu1 %v505_v11 }
  0x23   :  { %466 = vmatprep.mubr.bf16.mxu0 %v506_v12  ;;  %474 = vmatprep.mubr.bf16.mxu1 %v507_v13 }
  0x2a   :  { %467 = vmatmul.mubr.bf16.gmra.mrb[4].mxu0 %v508_v14  ;;  %475 = vmatmul.mubr.bf16.gmra.mrb[4].mxu1 %v509_v15 }
  0xf5   :  { %v464_v17 = vpop.f32.mrb[0].mxu0  ;;  %v472_v19 = vpop.f32.mrb[0].mxu1 }
  0xf6   :  { %v339_v20 = vmul.f32 %v464_v17, %v428_v16  ;;  %v347_v21 = vmul.f32 %v472_v19, %v428_v16  ;;  %v216_v22 = vpop.f32.mrb[1].mxu0  ;;  %v248_v23 = vpop.f32.mrb[1].mxu1 }
  0xf7   :  { %v337_v24 = vmul.f32 %v428_v16, %v216_v22  ;;  %v345_v25 = vmul.f32 %v428_v16, %v248_v23  ;;  %v465_v26 = vpop.f32.mrb[2].mxu0  ;;  %v473_v27 = vpop.f32.mrb[2].mxu1 }
  0xf8   :  { %v362_v28 = vadd.f32 %v589_v18, %v339_v20  ;;  %v370_v29 = vadd.f32 %v589_v18, %v347_v21  ;;  %v340_v30 = vmul.f32 %v465_v26, %v428_v16  ;;  %v348_v31 = vmul.f32 %v473_v27, %v428_v16  ;;  %v219_v32 = vpop.f32.mrb[3].mxu0  ;;  %v251_v33 = vpop.f32.mrb[3].mxu1 }
  0xf9   :  { %v360_v34 = vadd.f32 %v589_v18, %v337_v24  ;;  %v368_v35 = vadd.f32 %v589_v18, %v345_v25  ;;  %v338_v36 = vmul.f32 %v428_v16, %v219_v32  ;;  %v346_v37 = vmul.f32 %v428_v16, %v251_v33 }
  0xfa   :  { %v378_v38 = vmax.f32 %v362_v28, 0.0  ;;  %v386_v39 = vmax.f32 %v370_v29, 0.0  ;;  %v363_v40 = vadd.f32 %v589_v18, %v340_v30  ;;  %v371_v41 = vadd.f32 %v589_v18, %v348_v31 }
  0xfb   :  { %v376_v42 = vmax.f32 %v360_v34, 0.0  ;;  %v384_v43 = vmax.f32 %v368_v35, 0.0  ;;  %v361_v44 = vadd.f32 %v589_v18, %v338_v36  ;;  %v369_v45 = vadd.f32 %v589_v18, %v346_v37 }
  0xfc   :  { %394 = vst [vmem:[%s659_s4 + $0x10] sm:$0xff] %v378_v38  ;;  %402 = vst [vmem:[%s659_s4 + $0x50] sm:$0xff] %v386_v39  ;;  %v379_v46 = vmax.f32 %v363_v40, 0.0  ;;  %v387_v47 = vmax.f32 %v371_v41, 0.0 }
  0xfd   :  { %392 = vst [vmem:[%s659_s4] sm:$0xff] %v376_v42  ;;  %400 = vst [vmem:[%s659_s4 + $0x40] sm:$0xff] %v384_v43  ;;  %v377_v48 = vmax.f32 %v361_v44, 0.0  ;;  %v385_v49 = vmax.f32 %v369_v45, 0.0  ;;  %v468_v50 = vpop.f32.mrb[4].mxu0  ;;  %v476_v51 = vpop.f32.mrb[4].mxu1 }
  0xfe   :  { %395 = vst [vmem:[%s659_s4 + $0x18] sm:$0xff] %v379_v46  ;;  %403 = vst [vmem:[%s659_s4 + $0x58] sm:$0xff] %v387_v47  ;;  %v343_v52 = vmul.f32 %v468_v50, %v428_v16  ;;  %v351_v53 = vmul.f32 %v476_v51, %v428_v16  ;;  %v232_v54 = vpop.f32.mrb[5].mxu0  ;;  %v264_v55 = vpop.f32.mrb[5].mxu1 }
  0xff   :  { %393 = vst [vmem:[%s659_s4 + $0x8] sm:$0xff] %v377_v48  ;;  %401 = vst [vmem:[%s659_s4 + $0x48] sm:$0xff] %v385_v49  ;;  %v341_v56 = vmul.f32 %v428_v16, %v232_v54  ;;  %v349_v57 = vmul.f32 %v428_v16, %v264_v55  ;;  %v469_v58 = vpop.f32.mrb[6].mxu0  ;;  %v477_v59 = vpop.f32.mrb[6].mxu1 }
 0x100   :  { %v366_v60 = vadd.f32 %v589_v18, %v343_v52  ;;  %v374_v61 = vadd.f32 %v589_v18, %v351_v53  ;;  %v344_v62 = vmul.f32 %v469_v58, %v428_v16  ;;  %v352_v63 = vmul.f32 %v477_v59, %v428_v16  ;;  %v235_v0 = vpop.f32.mrb[7].mxu0  ;;  %v267_v1 = vpop.f32.mrb[7].mxu1 }
 0x101   :  { %v364_v2 = vadd.f32 %v589_v18, %v341_v56  ;;  %v372_v3 = vadd.f32 %v589_v18, %v349_v57  ;;  %v342_v4 = vmul.f32 %v428_v16, %v235_v0  ;;  %v350_v5 = vmul.f32 %v428_v16, %v267_v1 }
 0x102   :  { %v382_v6 = vmax.f32 %v366_v60, 0.0  ;;  %v390_v7 = vmax.f32 %v374_v61, 0.0  ;;  %v367_v8 = vadd.f32 %v589_v18, %v344_v62  ;;  %v375_v9 = vadd.f32 %v589_v18, %v352_v63 }
 0x103   :  { %v380_v10 = vmax.f32 %v364_v2, 0.0  ;;  %v388_v11 = vmax.f32 %v372_v3, 0.0  ;;  %v365_v12 = vadd.f32 %v589_v18, %v342_v4  ;;  %v373_v13 = vadd.f32 %v589_v18, %v350_v5 }
 0x104   :  { %398 = vst [vmem:[%s659_s4 + $0x30] sm:$0xff] %v382_v6  ;;  %406 = vst [vmem:[%s659_s4 + $0x70] sm:$0xff] %v390_v7  ;;  %v383_v14 = vmax.f32 %v367_v8, 0.0  ;;  %v391_v15 = vmax.f32 %v375_v9, 0.0 }
 0x105   :  { %396 = vst [vmem:[%s659_s4 + $0x20] sm:$0xff] %v380_v10  ;;  %404 = vst [vmem:[%s659_s4 + $0x60] sm:$0xff] %v388_v11  ;;  %v381_v16 = vmax.f32 %v365_v12, 0.0  ;;  %v389_v17 = vmax.f32 %v373_v13, 0.0 }
 0x106   :  { %399 = vst [vmem:[%s659_s4 + $0x38] sm:$0xff] %v383_v14  ;;  %407 = vst [vmem:[%s659_s4 + $0x78] sm:$0xff] %v391_v15 }
 0x107   :  { %397 = vst [vmem:[%s659_s4 + $0x28] sm:$0xff] %v381_v16  ;;  %405 = vst [vmem:[%s659_s4 + $0x68] sm:$0xff] %v389_v17 }

// kernel: _lambda_.30
= control target key start
LH: loop header
LB: loop body
LE: loop exit
PB: predicated region body
PF: predicated region fallthrough
CT: control target
= control target key end

     0   :  { %s621_s1 = inlined_call_operand.vmem [shape: bf16[128,128], index: 1, kind: input, shape index: {}]   ;;  %s622_s0 = inlined_call_operand.vmem [shape: bf16[128,128], index: 0, kind: input, shape index: {}]   ;;  %s623_s2 = inlined_call_operand.vmem [shape: f32[1,128], index: 2, kind: input, shape index: {}]   ;;  %s624_s3 = inlined_call_operand.vmem [shape: f32[1,128], index: 3, kind: input, shape index: {}]   ;;  %s625_s4 = inlined_call_operand.vmem [shape: f32[128,128], index: 4, kind: output, shape index: {}]  }
   0x1   :  { %v478_v0 = vld [vmem:[%s621_s1] sm:$0xff]   ;;  %v479_v1 = vld [vmem:[%s621_s1 + $0x8] sm:$0xff]   ;;  %v480_v2 = vld [vmem:[%s621_s1 + $0x10] sm:$0xff]  }
   0x2   :  { %430 = vmatprep.subr.bf16.mxu0 %v478_v0  ;;  %462 = vmatprep.subr.bf16.mxu1 %v478_v0  ;;  %v481_v3 = vld [vmem:[%s621_s1 + $0x18] sm:$0xff]   ;;  %v486_v4 = vld [vmem:[%s622_s0] sm:$0xff]   ;;  %v483_v7 = vld [vmem:[%s621_s1 + $0x28] sm:$0xff]  }
   0x3   :  { %431 = vmatpush3.bf16.msra.mxu0 %v478_v0  ;;  %470 = vmatpush3.bf16.msra.mxu1 %v478_v0  ;;  %v487_v5 = vld [vmem:[%s622_s0 + $0x20] sm:$0xff]   ;;  %v484_v8 = vld [vmem:[%s621_s1 + $0x30] sm:$0xff]   ;;  %v485_v9 = vld [vmem:[%s621_s1 + $0x38] sm:$0xff]  }
   0x4   :  { %432 = vmatprep.subr.bf16.mxu0 %v479_v1  ;;  %463 = vmatprep.subr.bf16.mxu1 %v479_v1  ;;  %v482_v6 = vld [vmem:[%s621_s1 + $0x20] sm:$0xff]   ;;  %v488_v10 = vld [vmem:[%s622_s0 + $0x8] sm:$0xff]   ;;  %v490_v12 = vld [vmem:[%s622_s0 + $0x10] sm:$0xff]  }
   0x5   :  { %446 = vmatprep.mubr.bf16.mxu0 %v486_v4  ;;  %454 = vmatprep.mubr.bf16.mxu1 %v487_v5  ;;  %v489_v11 = vld [vmem:[%s622_s0 + $0x28] sm:$0xff]   ;;  %v491_v13 = vld [vmem:[%s622_s0 + $0x30] sm:$0xff]   ;;  %v492_v14 = vld [vmem:[%s622_s0 + $0x18] sm:$0xff]  }
   0x6   :  { %v493_v15 = vld [vmem:[%s622_s0 + $0x38] sm:$0xff]   ;;  %v412_v16 = vld [vmem:[%s623_s2] ss:$0 sm:$0xff] }
   0x7   :  { %433 = vmatpush3.bf16.msra.mxu0 %v479_v1  ;;  %471 = vmatpush3.bf16.msra.mxu1 %v479_v1  ;;  %v413_v18 = vld [vmem:[%s624_s3] ss:$0 sm:$0xff] }
   0x8   :  { %434 = vmatprep.subr.bf16.mxu0 %v480_v2  ;;  %464 = vmatprep.subr.bf16.mxu1 %v480_v2 }
   0xb   :  { %435 = vmatpush3.bf16.msra.mxu0 %v480_v2  ;;  %472 = vmatpush3.bf16.msra.mxu1 %v480_v2 }
   0xc   :  { %436 = vmatprep.subr.bf16.mxu0 %v481_v3  ;;  %465 = vmatprep.subr.bf16.mxu1 %v481_v3 }
   0xf   :  { %437 = vmatpush3.bf16.msra.mxu0 %v481_v3  ;;  %473 = vmatpush3.bf16.msra.mxu1 %v481_v3 }
  0x10   :  { %438 = vmatprep.subr.bf16.mxu0 %v482_v6  ;;  %466 = vmatprep.subr.bf16.mxu1 %v482_v6 }
  0x13   :  { %439 = vmatpush3.bf16.msra.mxu0 %v482_v6  ;;  %474 = vmatpush3.bf16.msra.mxu1 %v482_v6 }
  0x14   :  { %440 = vmatprep.subr.bf16.mxu0 %v483_v7  ;;  %467 = vmatprep.subr.bf16.mxu1 %v483_v7 }
  0x17   :  { %441 = vmatpush3.bf16.msra.mxu0 %v483_v7  ;;  %475 = vmatpush3.bf16.msra.mxu1 %v483_v7 }
  0x18   :  { %442 = vmatprep.subr.bf16.mxu0 %v484_v8  ;;  %468 = vmatprep.subr.bf16.mxu1 %v484_v8 }
  0x1b   :  { %443 = vmatpush3.bf16.msra.mxu0 %v484_v8  ;;  %476 = vmatpush3.bf16.msra.mxu1 %v484_v8 }
  0x1c   :  { %444 = vmatprep.subr.bf16.mxu0 %v485_v9  ;;  %469 = vmatprep.subr.bf16.mxu1 %v485_v9 }
  0x1f   :  { %445 = vmatpush3.bf16.msra.mxu0 %v485_v9  ;;  %477 = vmatpush3.bf16.msra.mxu1 %v485_v9 }
  0x22   :  { %447 = vmatmul.mubr.bf16.vlgmr.msra.gmra.mrb[0].mxu0 %v488_v10  ;;  %455 = vmatmul.mubr.bf16.vlgmr.msra.gmra.mrb[0].mxu1 %v489_v11 }
  0x23   :  { %450 = vmatprep.mubr.bf16.mxu0 %v490_v12  ;;  %458 = vmatprep.mubr.bf16.mxu1 %v491_v13 }
  0x2a   :  { %451 = vmatmul.mubr.bf16.gmra.mrb[4].mxu0 %v492_v14  ;;  %459 = vmatmul.mubr.bf16.gmra.mrb[4].mxu1 %v493_v15 }
  0xf5   :  { %v448_v17 = vpop.f32.mrb[0].mxu0  ;;  %v456_v19 = vpop.f32.mrb[0].mxu1 }
  0xf6   :  { %v339_v20 = vmul.f32 %v448_v17, %v412_v16  ;;  %v347_v21 = vmul.f32 %v456_v19, %v412_v16  ;;  %v216_v22 = vpop.f32.mrb[1].mxu0  ;;  %v248_v23 = vpop.f32.mrb[1].mxu1 }
  0xf7   :  { %v337_v24 = vmul.f32 %v412_v16, %v216_v22  ;;  %v345_v25 = vmul.f32 %v412_v16, %v248_v23  ;;  %v449_v26 = vpop.f32.mrb[2].mxu0  ;;  %v457_v27 = vpop.f32.mrb[2].mxu1 }
  0xf8   :  { %v362_v28 = vadd.f32 %v413_v18, %v339_v20  ;;  %v370_v29 = vadd.f32 %v413_v18, %v347_v21  ;;  %v340_v30 = vmul.f32 %v449_v26, %v412_v16  ;;  %v348_v31 = vmul.f32 %v457_v27, %v412_v16  ;;  %v219_v32 = vpop.f32.mrb[3].mxu0  ;;  %v251_v33 = vpop.f32.mrb[3].mxu1 }
  0xf9   :  { %v360_v34 = vadd.f32 %v413_v18, %v337_v24  ;;  %v368_v35 = vadd.f32 %v413_v18, %v345_v25  ;;  %v338_v36 = vmul.f32 %v412_v16, %v219_v32  ;;  %v346_v37 = vmul.f32 %v412_v16, %v251_v33 }
  0xfa   :  { %378 = vst [vmem:[%s625_s4 + $0x10] sm:$0xff] %v362_v28  ;;  %386 = vst [vmem:[%s625_s4 + $0x50] sm:$0xff] %v370_v29  ;;  %v363_v38 = vadd.f32 %v413_v18, %v340_v30  ;;  %v371_v39 = vadd.f32 %v413_v18, %v348_v31 }
  0xfb   :  { %376 = vst [vmem:[%s625_s4] sm:$0xff] %v360_v34  ;;  %384 = vst [vmem:[%s625_s4 + $0x40] sm:$0xff] %v368_v35  ;;  %v361_v40 = vadd.f32 %v413_v18, %v338_v36  ;;  %v369_v41 = vadd.f32 %v413_v18, %v346_v37 }
  0xfc   :  { %379 = vst [vmem:[%s625_s4 + $0x18] sm:$0xff] %v363_v38  ;;  %387 = vst [vmem:[%s625_s4 + $0x58] sm:$0xff] %v371_v39 }
  0xfd   :  { %377 = vst [vmem:[%s625_s4 + $0x8] sm:$0xff] %v361_v40  ;;  %385 = vst [vmem:[%s625_s4 + $0x48] sm:$0xff] %v369_v41  ;;  %v452_v42 = vpop.f32.mrb[4].mxu0  ;;  %v460_v43 = vpop.f32.mrb[4].mxu1 }
  0xfe   :  { %v343_v44 = vmul.f32 %v452_v42, %v412_v16  ;;  %v351_v45 = vmul.f32 %v460_v43, %v412_v16  ;;  %v232_v46 = vpop.f32.mrb[5].mxu0  ;;  %v264_v47 = vpop.f32.mrb[5].mxu1 }
  0xff   :  { %v341_v48 = vmul.f32 %v412_v16, %v232_v46  ;;  %v349_v49 = vmul.f32 %v412_v16, %v264_v47  ;;  %v453_v50 = vpop.f32.mrb[6].mxu0  ;;  %v461_v51 = vpop.f32.mrb[6].mxu1 }
 0x100   :  { %v366_v52 = vadd.f32 %v413_v18, %v343_v44  ;;  %v374_v53 = vadd.f32 %v413_v18, %v351_v45  ;;  %v344_v54 = vmul.f32 %v453_v50, %v412_v16  ;;  %v352_v55 = vmul.f32 %v461_v51, %v412_v16  ;;  %v235_v56 = vpop.f32.mrb[7].mxu0  ;;  %v267_v57 = vpop.f32.mrb[7].mxu1 }
 0x101   :  { %v364_v58 = vadd.f32 %v413_v18, %v341_v48  ;;  %v372_v59 = vadd.f32 %v413_v18, %v349_v49  ;;  %v342_v60 = vmul.f32 %v412_v16, %v235_v56  ;;  %v350_v61 = vmul.f32 %v412_v16, %v267_v57 }
 0x102   :  { %382 = vst [vmem:[%s625_s4 + $0x30] sm:$0xff] %v366_v52  ;;  %390 = vst [vmem:[%s625_s4 + $0x70] sm:$0xff] %v374_v53  ;;  %v367_v62 = vadd.f32 %v413_v18, %v344_v54  ;;  %v375_v63 = vadd.f32 %v413_v18, %v352_v55 }
 0x103   :  { %380 = vst [vmem:[%s625_s4 + $0x20] sm:$0xff] %v364_v58  ;;  %388 = vst [vmem:[%s625_s4 + $0x60] sm:$0xff] %v372_v59  ;;  %v365_v0 = vadd.f32 %v413_v18, %v342_v60  ;;  %v373_v1 = vadd.f32 %v413_v18, %v350_v61 }
 0x104   :  { %383 = vst [vmem:[%s625_s4 + $0x38] sm:$0xff] %v367_v62  ;;  %391 = vst [vmem:[%s625_s4 + $0x78] sm:$0xff] %v375_v63 }
 0x105   :  { %381 = vst [vmem:[%s625_s4 + $0x28] sm:$0xff] %v365_v0  ;;  %389 = vst [vmem:[%s625_s4 + $0x68] sm:$0xff] %v373_v1 }

// kernel: _lambda_.31
= control target key start
LH: loop header
LB: loop body
LE: loop exit
PB: predicated region body
PF: predicated region fallthrough
CT: control target
= control target key end

     0   :  { %s761_s1 = inlined_call_operand.vmem [shape: bf16[128,128], index: 1, kind: input, shape index: {}]   ;;  %s762_s0 = inlined_call_operand.vmem [shape: bf16[128,128], index: 0, kind: input, shape index: {}]   ;;  %s763_s2 = inlined_call_operand.vmem [shape: f32[1,128], index: 2, kind: input, shape index: {}]   ;;  %s764_s3 = inlined_call_operand.vmem [shape: f32[1,128], index: 3, kind: input, shape index: {}]   ;;  %s765_s4 = inlined_call_operand.vmem [shape: f32[128,128], index: 4, kind: input, shape index: {}]   ;;  %s766_s5 = inlined_call_operand.vmem [shape: f32[128,128], index: 5, kind: output, shape index: {}]  }
   0x1   :  { %v529_v0 = vld [vmem:[%s761_s1] sm:$0xff]   ;;  %v530_v1 = vld [vmem:[%s761_s1 + $0x8] sm:$0xff]   ;;  %v531_v2 = vld [vmem:[%s761_s1 + $0x10] sm:$0xff]  }
   0x2   :  { %481 = vmatprep.subr.bf16.mxu0 %v529_v0  ;;  %513 = vmatprep.subr.bf16.mxu1 %v529_v0  ;;  %v532_v3 = vld [vmem:[%s761_s1 + $0x18] sm:$0xff]   ;;  %v537_v4 = vld [vmem:[%s762_s0] sm:$0xff]   ;;  %v534_v7 = vld [vmem:[%s761_s1 + $0x28] sm:$0xff]  }
   0x3   :  { %482 = vmatpush3.bf16.msra.mxu0 %v529_v0  ;;  %521 = vmatpush3.bf16.msra.mxu1 %v529_v0  ;;  %v538_v5 = vld [vmem:[%s762_s0 + $0x20] sm:$0xff]   ;;  %v535_v8 = vld [vmem:[%s761_s1 + $0x30] sm:$0xff]   ;;  %v536_v9 = vld [vmem:[%s761_s1 + $0x38] sm:$0xff]  }
   0x4   :  { %483 = vmatprep.subr.bf16.mxu0 %v530_v1  ;;  %514 = vmatprep.subr.bf16.mxu1 %v530_v1  ;;  %v533_v6 = vld [vmem:[%s761_s1 + $0x20] sm:$0xff]   ;;  %v539_v10 = vld [vmem:[%s762_s0 + $0x8] sm:$0xff]   ;;  %v541_v12 = vld [vmem:[%s762_s0 + $0x10] sm:$0xff]  }
   0x5   :  { %497 = vmatprep.mubr.bf16.mxu0 %v537_v4  ;;  %505 = vmatprep.mubr.bf16.mxu1 %v538_v5  ;;  %v540_v11 = vld [vmem:[%s762_s0 + $0x28] sm:$0xff]   ;;  %v542_v13 = vld [vmem:[%s762_s0 + $0x30] sm:$0xff]   ;;  %v543_v14 = vld [vmem:[%s762_s0 + $0x18] sm:$0xff]  }
   0x6   :  { %v544_v15 = vld [vmem:[%s762_s0 + $0x38] sm:$0xff]   ;;  %v626_v16 = vld [vmem:[%s763_s2] ss:$0 sm:$0xff]  ;;  %v381_v24 = vld [vmem:[%s765_s4 + $0x10] sm:$0xff] }
   0x7   :  { %484 = vmatpush3.bf16.msra.mxu0 %v530_v1  ;;  %522 = vmatpush3.bf16.msra.mxu1 %v530_v1  ;;  %v631_v18 = vld [vmem:[%s764_s3] ss:$0 sm:$0xff]  ;;  %v389_v25 = vld [vmem:[%s765_s4 + $0x50] sm:$0xff]  ;;  %v382_v40 = vld [vmem:[%s765_s4 + $0x18] sm:$0xff] }
   0x8   :  { %485 = vmatprep.subr.bf16.mxu0 %v531_v2  ;;  %515 = vmatprep.subr.bf16.mxu1 %v531_v2  ;;  %v379_v32 = vld [vmem:[%s765_s4] sm:$0xff]  ;;  %v390_v41 = vld [vmem:[%s765_s4 + $0x58] sm:$0xff]  ;;  %v380_v48 = vld [vmem:[%s765_s4 + $0x8] sm:$0xff] }
   0x9   :  { %v387_v33 = vld [vmem:[%s765_s4 + $0x40] sm:$0xff]  ;;  %v388_v49 = vld [vmem:[%s765_s4 + $0x48] sm:$0xff] }
   0xb   :  { %486 = vmatpush3.bf16.msra.mxu0 %v531_v2  ;;  %523 = vmatpush3.bf16.msra.mxu1 %v531_v2 }
   0xc   :  { %487 = vmatprep.subr.bf16.mxu0 %v532_v3  ;;  %516 = vmatprep.subr.bf16.mxu1 %v532_v3 }
   0xf   :  { %488 = vmatpush3.bf16.msra.mxu0 %v532_v3  ;;  %524 = vmatpush3.bf16.msra.mxu1 %v532_v3 }
  0x10   :  { %489 = vmatprep.subr.bf16.mxu0 %v533_v6  ;;  %517 = vmatprep.subr.bf16.mxu1 %v533_v6 }
  0x13   :  { %490 = vmatpush3.bf16.msra.mxu0 %v533_v6  ;;  %525 = vmatpush3.bf16.msra.mxu1 %v533_v6 }
  0x14   :  { %491 = vmatprep.subr.bf16.mxu0 %v534_v7  ;;  %518 = vmatprep.subr.bf16.mxu1 %v534_v7 }
  0x17   :  { %492 = vmatpush3.bf16.msra.mxu0 %v534_v7  ;;  %526 = vmatpush3.bf16.msra.mxu1 %v534_v7 }
  0x18   :  { %493 = vmatprep.subr.bf16.mxu0 %v535_v8  ;;  %519 = vmatprep.subr.bf16.mxu1 %v535_v8 }
  0x1b   :  { %494 = vmatpush3.bf16.msra.mxu0 %v535_v8  ;;  %527 = vmatpush3.bf16.msra.mxu1 %v535_v8  ;;  %v385_v8 = vld [vmem:[%s765_s4 + $0x30] sm:$0xff] }
  0x1c   :  { %495 = vmatprep.subr.bf16.mxu0 %v536_v9  ;;  %520 = vmatprep.subr.bf16.mxu1 %v536_v9 }
  0x1f   :  { %496 = vmatpush3.bf16.msra.mxu0 %v536_v9  ;;  %528 = vmatpush3.bf16.msra.mxu1 %v536_v9  ;;  %v393_v9 = vld [vmem:[%s765_s4 + $0x70] sm:$0xff] }
  0x22   :  { %498 = vmatmul.mubr.bf16.vlgmr.msra.gmra.mrb[0].mxu0 %v539_v10  ;;  %506 = vmatmul.mubr.bf16.vlgmr.msra.gmra.mrb[0].mxu1 %v540_v11 }
  0x23   :  { %501 = vmatprep.mubr.bf16.mxu0 %v541_v12  ;;  %509 = vmatprep.mubr.bf16.mxu1 %v542_v13 }
  0x2a   :  { %502 = vmatmul.mubr.bf16.gmra.mrb[4].mxu0 %v543_v14  ;;  %510 = vmatmul.mubr.bf16.gmra.mrb[4].mxu1 %v544_v15 }
  0xf5   :  { %v499_v17 = vpop.f32.mrb[0].mxu0  ;;  %v507_v19 = vpop.f32.mrb[0].mxu1 }
  0xf6   :  { %v342_v20 = vmul.f32 %v499_v17, %v626_v16  ;;  %v350_v21 = vmul.f32 %v507_v19, %v626_v16  ;;  %v219_v22 = vpop.f32.mrb[1].mxu0  ;;  %v251_v23 = vpop.f32.mrb[1].mxu1  ;;  %v383_v17 = vld [vmem:[%s765_s4 + $0x20] sm:$0xff] }
  0xf7   :  { %v340_v26 = vmul.f32 %v626_v16, %v219_v22  ;;  %v348_v27 = vmul.f32 %v626_v16, %v251_v23  ;;  %v500_v28 = vpop.f32.mrb[2].mxu0  ;;  %v508_v29 = vpop.f32.mrb[2].mxu1  ;;  %v391_v19 = vld [vmem:[%s765_s4 + $0x60] sm:$0xff] }
  0xf8   :  { %v365_v30 = vadd.f32 %v631_v18, %v342_v20  ;;  %v373_v31 = vadd.f32 %v631_v18, %v350_v21  ;;  %v343_v34 = vmul.f32 %v500_v28, %v626_v16  ;;  %v351_v35 = vmul.f32 %v508_v29, %v626_v16  ;;  %v222_v36 = vpop.f32.mrb[3].mxu0  ;;  %v254_v37 = vpop.f32.mrb[3].mxu1 }
  0xf9   :  { %v363_v38 = vadd.f32 %v631_v18, %v340_v26  ;;  %v371_v39 = vadd.f32 %v631_v18, %v348_v27  ;;  %v341_v42 = vmul.f32 %v626_v16, %v222_v36  ;;  %v349_v43 = vmul.f32 %v626_v16, %v254_v37  ;;  %v386_v26 = vld [vmem:[%s765_s4 + $0x38] sm:$0xff] }
  0xfa   :  { %v397_v44 = vadd.f32 %v381_v24, %v365_v30  ;;  %v405_v45 = vadd.f32 %v389_v25, %v373_v31  ;;  %v366_v46 = vadd.f32 %v631_v18, %v343_v34  ;;  %v374_v47 = vadd.f32 %v631_v18, %v351_v35  ;;  %v394_v27 = vld [vmem:[%s765_s4 + $0x78] sm:$0xff]  ;;  %v384_v34 = vld [vmem:[%s765_s4 + $0x28] sm:$0xff] }
  0xfb   :  { %v395_v50 = vadd.f32 %v379_v32, %v363_v38  ;;  %v403_v51 = vadd.f32 %v387_v33, %v371_v39  ;;  %v364_v52 = vadd.f32 %v631_v18, %v341_v42  ;;  %v372_v53 = vadd.f32 %v631_v18, %v349_v43  ;;  %v392_v35 = vld [vmem:[%s765_s4 + $0x68] sm:$0xff] }
  0xfc   :  { %v413_v54 = vmax.f32 %v397_v44, 0.0  ;;  %v421_v55 = vmax.f32 %v405_v45, 0.0  ;;  %v398_v56 = vadd.f32 %v382_v40, %v366_v46  ;;  %v406_v57 = vadd.f32 %v390_v41, %v374_v47 }
  0xfd   :  { %v411_v58 = vmax.f32 %v395_v50, 0.0  ;;  %v419_v59 = vmax.f32 %v403_v51, 0.0  ;;  %v396_v60 = vadd.f32 %v380_v48, %v364_v52  ;;  %v404_v61 = vadd.f32 %v388_v49, %v372_v53  ;;  %v503_v62 = vpop.f32.mrb[4].mxu0  ;;  %v511_v63 = vpop.f32.mrb[4].mxu1 }
  0xfe   :  { %429 = vst [vmem:[%s766_s5 + $0x10] sm:$0xff] %v413_v54  ;;  %437 = vst [vmem:[%s766_s5 + $0x50] sm:$0xff] %v421_v55  ;;  %v414_v0 = vmax.f32 %v398_v56, 0.0  ;;  %v422_v1 = vmax.f32 %v406_v57, 0.0  ;;  %v346_v2 = vmul.f32 %v503_v62, %v626_v16  ;;  %v354_v3 = vmul.f32 %v511_v63, %v626_v16  ;;  %v235_v4 = vpop.f32.mrb[5].mxu0  ;;  %v267_v5 = vpop.f32.mrb[5].mxu1 }
  0xff   :  { %427 = vst [vmem:[%s766_s5] sm:$0xff] %v411_v58  ;;  %435 = vst [vmem:[%s766_s5 + $0x40] sm:$0xff] %v419_v59  ;;  %v412_v6 = vmax.f32 %v396_v60, 0.0  ;;  %v420_v7 = vmax.f32 %v404_v61, 0.0  ;;  %v344_v10 = vmul.f32 %v626_v16, %v235_v4  ;;  %v352_v11 = vmul.f32 %v626_v16, %v267_v5  ;;  %v504_v12 = vpop.f32.mrb[6].mxu0  ;;  %v512_v13 = vpop.f32.mrb[6].mxu1 }
 0x100   :  { %430 = vst [vmem:[%s766_s5 + $0x18] sm:$0xff] %v414_v0  ;;  %438 = vst [vmem:[%s766_s5 + $0x58] sm:$0xff] %v422_v1  ;;  %v369_v14 = vadd.f32 %v631_v18, %v346_v2  ;;  %v377_v15 = vadd.f32 %v631_v18, %v354_v3  ;;  %v347_v20 = vmul.f32 %v504_v12, %v626_v16  ;;  %v238_v22 = vpop.f32.mrb[7].mxu0  ;;  %v270_v23 = vpop.f32.mrb[7].mxu1 }
 0x101   :  { %v355_v21 = vmul.f32 %v512_v13, %v626_v16  ;;  %428 = vst [vmem:[%s766_s5 + $0x8] sm:$0xff] %v412_v6  ;;  %436 = vst [vmem:[%s766_s5 + $0x48] sm:$0xff] %v420_v7  ;;  %v367_v24 = vadd.f32 %v631_v18, %v344_v10  ;;  %v375_v25 = vadd.f32 %v631_v18, %v352_v11 }
 0x102   :  { %v345_v28 = vmul.f32 %v626_v16, %v238_v22  ;;  %v353_v29 = vmul.f32 %v626_v16, %v270_v23  ;;  %v401_v30 = vadd.f32 %v385_v8, %v369_v14  ;;  %v409_v31 = vadd.f32 %v393_v9, %v377_v15 }
 0x103   :  { %v370_v32 = vadd.f32 %v631_v18, %v347_v20  ;;  %v378_v33 = vadd.f32 %v631_v18, %v355_v21  ;;  %v399_v36 = vadd.f32 %v383_v17, %v367_v24  ;;  %v407_v37 = vadd.f32 %v391_v19, %v375_v25 }
 0x104   :  { %v368_v38 = vadd.f32 %v631_v18, %v345_v28  ;;  %v376_v16 = vadd.f32 %v631_v18, %v353_v29  ;;  %v417_v39 = vmax.f32 %v401_v30, 0.0  ;;  %v425_v40 = vmax.f32 %v409_v31, 0.0 }
 0x105   :  { %v402_v41 = vadd.f32 %v386_v26, %v370_v32  ;;  %v410_v42 = vadd.f32 %v394_v27, %v378_v33  ;;  %v415_v43 = vmax.f32 %v399_v36, 0.0  ;;  %v423_v44 = vmax.f32 %v407_v37, 0.0 }
 0x106   :  { %v400_v45 = vadd.f32 %v384_v34, %v368_v38  ;;  %v408_v46 = vadd.f32 %v392_v35, %v376_v16  ;;  %433 = vst [vmem:[%s766_s5 + $0x30] sm:$0xff] %v417_v39  ;;  %441 = vst [vmem:[%s766_s5 + $0x70] sm:$0xff] %v425_v40 }
 0x107   :  { %v418_v47 = vmax.f32 %v402_v41, 0.0  ;;  %v426_v48 = vmax.f32 %v410_v42, 0.0  ;;  %431 = vst [vmem:[%s766_s5 + $0x20] sm:$0xff] %v415_v43  ;;  %439 = vst [vmem:[%s766_s5 + $0x60] sm:$0xff] %v423_v44 }
 0x108   :  { %v416_v18 = vmax.f32 %v400_v45, 0.0  ;;  %v424_v49 = vmax.f32 %v408_v46, 0.0 }
 0x109   :  { %434 = vst [vmem:[%s766_s5 + $0x38] sm:$0xff] %v418_v47  ;;  %442 = vst [vmem:[%s766_s5 + $0x78] sm:$0xff] %v426_v48 }
 0x10a   :  { %432 = vst [vmem:[%s766_s5 + $0x28] sm:$0xff] %v416_v18  ;;  %440 = vst [vmem:[%s766_s5 + $0x68] sm:$0xff] %v424_v49 }

// kernel: _lambda_.33
= control target key start
LH: loop header
LB: loop body
LE: loop exit
PB: predicated region body
PF: predicated region fallthrough
CT: control target
= control target key end

     0   :  { %s873_s1 = inlined_call_operand.vmem [shape: bf16[256,128], index: 1, kind: input, shape index: {}]   ;;  %s874_s0 = inlined_call_operand.vmem [shape: bf16[128,256], index: 0, kind: input, shape index: {}]   ;;  %s875_s2 = inlined_call_operand.vmem [shape: f32[1,128], index: 2, kind: input, shape index: {}]   ;;  %s876_s3 = inlined_call_operand.vmem [shape: f32[1,128], index: 3, kind: input, shape index: {}]   ;;  %s877_s4 = inlined_call_operand.vmem [shape: f32[128,128], index: 4, kind: output, shape index: {}]  }
   0x1   :  { %v622_v0 = vld [vmem:[%s873_s1 + $0x40] sm:$0xff]   ;;  %v624_v2 = vld [vmem:[%s873_s1 + $0x48] sm:$0xff]   ;;  %v626_v4 = vld [vmem:[%s873_s1 + $0x50] sm:$0xff]  }
   0x2   :  { %v623_v1 = vld [vmem:[%s873_s1] sm:$0xff]   ;;  %542 = vmatprep.subr.bf16.mxu0 %v622_v0  ;;  %606 = vmatprep.subr.bf16.mxu1 %v622_v0  ;;  %v625_v3 = vld [vmem:[%s873_s1 + $0x8] sm:$0xff]   ;;  %v627_v5 = vld [vmem:[%s873_s1 + $0x10] sm:$0xff]  }
   0x3   :  { %543 = vmatpush3.bf16.msra.mxu0 %v623_v1  ;;  %614 = vmatpush3.bf16.msra.mxu1 %v623_v1  ;;  %v628_v6 = vld [vmem:[%s873_s1 + $0x58] sm:$0xff]   ;;  %v630_v8 = vld [vmem:[%s873_s1 + $0x60] sm:$0xff]   ;;  %v632_v10 = vld [vmem:[%s873_s1 + $0x68] sm:$0xff]  }
   0x4   :  { %544 = vmatprep.subr.bf16.mxu0 %v624_v2  ;;  %607 = vmatprep.subr.bf16.mxu1 %v624_v2  ;;  %v629_v7 = vld [vmem:[%s873_s1 + $0x18] sm:$0xff]   ;;  %v631_v9 = vld [vmem:[%s873_s1 + $0x20] sm:$0xff]   ;;  %v633_v13 = vld [vmem:[%s873_s1 + $0x28] sm:$0xff]  }
   0x5   :  { %v640_v11 = vld [vmem:[%s874_s0 + $0x4] ss:$8 sps:$4 sm:$0xff]   ;;  %v634_v14 = vld [vmem:[%s873_s1 + $0x70] sm:$0xff]   ;;  %v636_v16 = vld [vmem:[%s873_s1 + $0x78] sm:$0xff]  }
   0x6   :  { %v643_v12 = vld [vmem:[%s874_s0 + $0x44] ss:$8 sps:$4 sm:$0xff]   ;;  %310 = vmatprep.mubr.bf16.mxu0 %v640_v11  ;;  %v635_v15 = vld [vmem:[%s873_s1 + $0x30] sm:$0xff]   ;;  %v637_v17 = vld [vmem:[%s873_s1 + $0x38] sm:$0xff]  }
   0x7   :  { %545 = vmatpush3.bf16.msra.mxu0 %v625_v3  ;;  %615 = vmatpush3.bf16.msra.mxu1 %v625_v3  ;;  %v638_v18 = vld [vmem:[%s874_s0] ss:$8 sps:$4 sm:$0xff]   ;;  %v644_v20 = vld [vmem:[%s874_s0 + $0x14] ss:$8 sps:$4 sm:$0xff]   ;;  %v648_v22 = vld [vmem:[%s874_s0 + $0x10] ss:$8 sps:$4 sm:$0xff]  }
   0x8   :  { %546 = vmatprep.subr.bf16.mxu0 %v626_v4  ;;  %608 = vmatprep.subr.bf16.mxu1 %v626_v4  ;;  %v641_v19 = vld [vmem:[%s874_s0 + $0x40] ss:$8 sps:$4 sm:$0xff]   ;;  %v646_v21 = vld [vmem:[%s874_s0 + $0x54] ss:$8 sps:$4 sm:$0xff]   ;;  %v649_v23 = vld [vmem:[%s874_s0 + $0x50] ss:$8 sps:$4 sm:$0xff]  }
   0x9   :  { %342 = vmatprep.mubr.bf16.mxu1 %v643_v12  ;;  %v650_v24 = vld [vmem:[%s874_s0 + $0x24] ss:$8 sps:$4 sm:$0xff]   ;;  %v654_v26 = vld [vmem:[%s874_s0 + $0x20] ss:$8 sps:$4 sm:$0xff]   ;;  %v656_v28 = vld [vmem:[%s874_s0 + $0x34] ss:$8 sps:$4 sm:$0xff]  }
   0xa   :  { %v652_v25 = vld [vmem:[%s874_s0 + $0x64] ss:$8 sps:$4 sm:$0xff]   ;;  %v655_v27 = vld [vmem:[%s874_s0 + $0x60] ss:$8 sps:$4 sm:$0xff]   ;;  %v658_v29 = vld [vmem:[%s874_s0 + $0x74] ss:$8 sps:$4 sm:$0xff]  }
   0xb   :  { %547 = vmatpush3.bf16.msra.mxu0 %v627_v5  ;;  %616 = vmatpush3.bf16.msra.mxu1 %v627_v5  ;;  %v660_v30 = vld [vmem:[%s874_s0 + $0x30] ss:$8 sps:$4 sm:$0xff]   ;;  %v786_v35 = vld [vmem:[%s875_s2] ss:$0 sm:$0xff] }
   0xc   :  { %548 = vmatprep.subr.bf16.mxu0 %v628_v6  ;;  %609 = vmatprep.subr.bf16.mxu1 %v628_v6  ;;  %v661_v31 = vld [vmem:[%s874_s0 + $0x70] ss:$8 sps:$4 sm:$0xff]   ;;  %v791_v41 = vld [vmem:[%s876_s3] ss:$0 sm:$0xff] }
   0xf   :  { %549 = vmatpush3.bf16.msra.mxu0 %v629_v7  ;;  %617 = vmatpush3.bf16.msra.mxu1 %v629_v7 }
  0x10   :  { %550 = vmatprep.subr.bf16.mxu0 %v630_v8  ;;  %610 = vmatprep.subr.bf16.mxu1 %v630_v8 }
  0x13   :  { %551 = vmatpush3.bf16.msra.mxu0 %v631_v9  ;;  %618 = vmatpush3.bf16.msra.mxu1 %v631_v9 }
  0x14   :  { %552 = vmatprep.subr.bf16.mxu0 %v632_v10  ;;  %611 = vmatprep.subr.bf16.mxu1 %v632_v10 }
  0x17   :  { %553 = vmatpush3.bf16.msra.mxu0 %v633_v13  ;;  %619 = vmatpush3.bf16.msra.mxu1 %v633_v13 }
  0x18   :  { %554 = vmatprep.subr.bf16.mxu0 %v634_v14  ;;  %612 = vmatprep.subr.bf16.mxu1 %v634_v14 }
  0x1b   :  { %555 = vmatpush3.bf16.msra.mxu0 %v635_v15  ;;  %620 = vmatpush3.bf16.msra.mxu1 %v635_v15 }
  0x1c   :  { %556 = vmatprep.subr.bf16.mxu0 %v636_v16  ;;  %613 = vmatprep.subr.bf16.mxu1 %v636_v16 }
  0x1f   :  { %557 = vmatpush3.bf16.msra.mxu0 %v637_v17  ;;  %621 = vmatpush3.bf16.msra.mxu1 %v637_v17 }
  0x22   :  { %311 = vmatmul.mubr.bf16.vlgmr.msra.gmra.mrb[0].mxu0 %v638_v18  ;;  %343 = vmatmul.mubr.bf16.vlgmr.msra.gmra.mrb[0].mxu1 %v641_v19 }
  0x23   :  { %318 = vmatprep.mubr.bf16.mxu0 %v644_v20  ;;  %350 = vmatprep.mubr.bf16.mxu1 %v646_v21 }
  0x2a   :  { %319 = vmatmul.mubr.bf16.gmra.mrb[4].mxu0 %v648_v22  ;;  %351 = vmatmul.mubr.bf16.gmra.mrb[4].mxu1 %v649_v23 }
  0x2b   :  { %326 = vmatprep.mubr.bf16.mxu0 %v650_v24  ;;  %358 = vmatprep.mubr.bf16.mxu1 %v652_v25 }
  0x32   :  { %327 = vmatmul.mubr.bf16.gmra.mrb[8].mxu0 %v654_v26  ;;  %359 = vmatmul.mubr.bf16.gmra.mrb[8].mxu1 %v655_v27 }
  0x33   :  { %334 = vmatprep.mubr.bf16.mxu0 %v656_v28  ;;  %366 = vmatprep.mubr.bf16.mxu1 %v658_v29 }
  0x3a   :  { %335 = vmatmul.mubr.bf16.gmra.mrb[12].mxu0 %v660_v30  ;;  %367 = vmatmul.mubr.bf16.gmra.mrb[12].mxu1 %v661_v31 }
  0xf5   :  { %v558_v32 = vpop.f32.mrb[0].mxu0  ;;  %v582_v33 = vpop.f32.mrb[0].mxu1 }
  0xf6   :  { %v559_v34 = vpop.f32.mrb[1].mxu0  ;;  %v583_v36 = vpop.f32.mrb[1].mxu1 }
  0xf7   :  { %v560_v37 = vadd.f32 %v559_v34, %v558_v32  ;;  %v584_v38 = vadd.f32 %v583_v36, %v582_v33  ;;  %v561_v39 = vpop.f32.mrb[2].mxu0  ;;  %v585_v40 = vpop.f32.mrb[2].mxu1 }
  0xf8   :  { %v562_v42 = vpop.f32.mrb[3].mxu0  ;;  %v586_v43 = vpop.f32.mrb[3].mxu1 }
  0xf9   :  { %v433_v44 = vmul.f32 %v560_v37, %v786_v35  ;;  %v441_v45 = vmul.f32 %v584_v38, %v786_v35  ;;  %v563_v46 = vadd.f32 %v562_v42, %v561_v39  ;;  %v587_v47 = vadd.f32 %v586_v43, %v585_v40 }
  0xfb   :  { %v456_v48 = vadd.f32 %v791_v41, %v433_v44  ;;  %v464_v49 = vadd.f32 %v791_v41, %v441_v45  ;;  %v434_v50 = vmul.f32 %v563_v46, %v786_v35  ;;  %v442_v51 = vmul.f32 %v587_v47, %v786_v35 }
  0xfd   :  { %v472_v52 = vmax.f32 %v456_v48, 0.0  ;;  %v480_v53 = vmax.f32 %v464_v49, 0.0  ;;  %v457_v54 = vadd.f32 %v791_v41, %v434_v50  ;;  %v465_v55 = vadd.f32 %v791_v41, %v442_v51  ;;  %v564_v56 = vpop.f32.mrb[4].mxu0  ;;  %v588_v57 = vpop.f32.mrb[4].mxu1 }
  0xfe   :  { %v565_v58 = vpop.f32.mrb[5].mxu0  ;;  %v589_v59 = vpop.f32.mrb[5].mxu1 }
  0xff   :  { %488 = vst [vmem:[%s877_s4] sm:$0xff] %v472_v52  ;;  %496 = vst [vmem:[%s877_s4 + $0x40] sm:$0xff] %v480_v53  ;;  %v473_v60 = vmax.f32 %v457_v54, 0.0  ;;  %v481_v61 = vmax.f32 %v465_v55, 0.0  ;;  %v566_v62 = vadd.f32 %v565_v58, %v564_v56  ;;  %v590_v63 = vadd.f32 %v589_v59, %v588_v57  ;;  %v567_v0 = vpop.f32.mrb[6].mxu0  ;;  %v591_v1 = vpop.f32.mrb[6].mxu1 }
 0x100   :  { %v568_v2 = vpop.f32.mrb[7].mxu0  ;;  %v592_v3 = vpop.f32.mrb[7].mxu1 }
 0x101   :  { %489 = vst [vmem:[%s877_s4 + $0x8] sm:$0xff] %v473_v60  ;;  %497 = vst [vmem:[%s877_s4 + $0x48] sm:$0xff] %v481_v61  ;;  %v435_v4 = vmul.f32 %v566_v62, %v786_v35  ;;  %v443_v5 = vmul.f32 %v590_v63, %v786_v35  ;;  %v569_v6 = vadd.f32 %v568_v2, %v567_v0 }
 0x102   :  { %v593_v7 = vadd.f32 %v592_v3, %v591_v1 }
 0x103   :  { %v458_v8 = vadd.f32 %v791_v41, %v435_v4  ;;  %v466_v9 = vadd.f32 %v791_v41, %v443_v5  ;;  %v436_v10 = vmul.f32 %v569_v6, %v786_v35 }
 0x104   :  { %v444_v11 = vmul.f32 %v593_v7, %v786_v35 }
 0x105   :  { %v474_v12 = vmax.f32 %v458_v8, 0.0  ;;  %v482_v13 = vmax.f32 %v466_v9, 0.0  ;;  %v459_v14 = vadd.f32 %v791_v41, %v436_v10  ;;  %v570_v16 = vpop.f32.mrb[8].mxu0  ;;  %v594_v17 = vpop.f32.mrb[8].mxu1 }
 0x106   :  { %v467_v15 = vadd.f32 %v791_v41, %v444_v11  ;;  %v571_v18 = vpop.f32.mrb[9].mxu0  ;;  %v595_v19 = vpop.f32.mrb[9].mxu1 }
 0x107   :  { %490 = vst [vmem:[%s877_s4 + $0x10] sm:$0xff] %v474_v12  ;;  %498 = vst [vmem:[%s877_s4 + $0x50] sm:$0xff] %v482_v13  ;;  %v475_v20 = vmax.f32 %v459_v14, 0.0  ;;  %v572_v22 = vadd.f32 %v571_v18, %v570_v16  ;;  %v596_v23 = vadd.f32 %v595_v19, %v594_v17  ;;  %v573_v24 = vpop.f32.mrb[10].mxu0  ;;  %v597_v25 = vpop.f32.mrb[10].mxu1 }
 0x108   :  { %v483_v21 = vmax.f32 %v467_v15, 0.0  ;;  %v574_v26 = vpop.f32.mrb[11].mxu0  ;;  %v598_v27 = vpop.f32.mrb[11].mxu1 }
 0x109   :  { %491 = vst [vmem:[%s877_s4 + $0x18] sm:$0xff] %v475_v20  ;;  %v437_v28 = vmul.f32 %v572_v22, %v786_v35  ;;  %v445_v29 = vmul.f32 %v596_v23, %v786_v35  ;;  %v575_v30 = vadd.f32 %v574_v26, %v573_v24  ;;  %v599_v31 = vadd.f32 %v598_v27, %v597_v25 }
 0x10a   :  { %499 = vst [vmem:[%s877_s4 + $0x58] sm:$0xff] %v483_v21 }
 0x10b   :  { %v460_v32 = vadd.f32 %v791_v41, %v437_v28  ;;  %v468_v33 = vadd.f32 %v791_v41, %v445_v29  ;;  %v438_v34 = vmul.f32 %v575_v30, %v786_v35  ;;  %v446_v36 = vmul.f32 %v599_v31, %v786_v35 }
 0x10d   :  { %v476_v37 = vmax.f32 %v460_v32, 0.0  ;;  %v484_v38 = vmax.f32 %v468_v33, 0.0  ;;  %v461_v39 = vadd.f32 %v791_v41, %v438_v34  ;;  %v469_v40 = vadd.f32 %v791_v41, %v446_v36  ;;  %v576_v42 = vpop.f32.mrb[12].mxu0  ;;  %v600_v43 = vpop.f32.mrb[12].mxu1 }
 0x10e   :  { %v577_v44 = vpop.f32.mrb[13].mxu0  ;;  %v601_v45 = vpop.f32.mrb[13].mxu1 }
 0x10f   :  { %492 = vst [vmem:[%s877_s4 + $0x20] sm:$0xff] %v476_v37  ;;  %500 = vst [vmem:[%s877_s4 + $0x60] sm:$0xff] %v484_v38  ;;  %v477_v46 = vmax.f32 %v461_v39, 0.0  ;;  %v485_v47 = vmax.f32 %v469_v40, 0.0  ;;  %v578_v48 = vadd.f32 %v577_v44, %v576_v42  ;;  %v602_v49 = vadd.f32 %v601_v45, %v600_v43  ;;  %v579_v50 = vpop.f32.mrb[14].mxu0  ;;  %v603_v51 = vpop.f32.mrb[14].mxu1 }
 0x110   :  { %v580_v52 = vpop.f32.mrb[15].mxu0  ;;  %v604_v53 = vpop.f32.mrb[15].mxu1 }
 0x111   :  { %493 = vst [vmem:[%s877_s4 + $0x28] sm:$0xff] %v477_v46  ;;  %501 = vst [vmem:[%s877_s4 + $0x68] sm:$0xff] %v485_v47  ;;  %v439_v54 = vmul.f32 %v578_v48, %v786_v35  ;;  %v447_v55 = vmul.f32 %v602_v49, %v786_v35  ;;  %v581_v56 = vadd.f32 %v580_v52, %v579_v50 }
 0x112   :  { %v605_v57 = vadd.f32 %v604_v53, %v603_v51 }
 0x113   :  { %v462_v58 = vadd.f32 %v791_v41, %v439_v54  ;;  %v470_v59 = vadd.f32 %v791_v41, %v447_v55  ;;  %v440_v60 = vmul.f32 %v581_v56, %v786_v35 }
 0x114   :  { %v448_v61 = vmul.f32 %v605_v57, %v786_v35 }
 0x115   :  { %v478_v62 = vmax.f32 %v462_v58, 0.0  ;;  %v486_v63 = vmax.f32 %v470_v59, 0.0  ;;  %v463_v0 = vadd.f32 %v791_v41, %v440_v60 }
 0x116   :  { %v471_v1 = vadd.f32 %v791_v41, %v448_v61 }
 0x117   :  { %494 = vst [vmem:[%s877_s4 + $0x30] sm:$0xff] %v478_v62  ;;  %502 = vst [vmem:[%s877_s4 + $0x70] sm:$0xff] %v486_v63  ;;  %v479_v2 = vmax.f32 %v463_v0, 0.0 }
 0x118   :  { %v487_v3 = vmax.f32 %v471_v1, 0.0 }
 0x119   :  { %495 = vst [vmem:[%s877_s4 + $0x38] sm:$0xff] %v479_v2 }
 0x11a   :  { %503 = vst [vmem:[%s877_s4 + $0x78] sm:$0xff] %v487_v3 }

// kernel: _lambda_.36
= control target key start
LH: loop header
LB: loop body
LE: loop exit
PB: predicated region body
PF: predicated region fallthrough
CT: control target
= control target key end

     0   :  { %s333_s1 = inlined_call_operand.vmem [shape: bf16[128,128], index: 1, kind: input, shape index: {}]   ;;  %s334_s0 = inlined_call_operand.vmem [shape: bf16[32,128], index: 0, kind: input, shape index: {}]   ;;  %s335_s2 = inlined_call_operand.vmem [shape: f32[1,128], index: 2, kind: input, shape index: {}]   ;;  %s336_s3 = inlined_call_operand.vmem [shape: f32[1,128], index: 3, kind: input, shape index: {}]   ;;  %s337_s4 = inlined_call_operand.vmem [shape: f32[32,128], index: 4, kind: output, shape index: {}]  }
   0x1   :  { %v250_v0 = vld [vmem:[%s333_s1] sm:$0xff]   ;;  %v251_v1 = vld [vmem:[%s333_s1 + $0x8] sm:$0xff]   ;;  %v252_v2 = vld [vmem:[%s333_s1 + $0x10] sm:$0xff]  }
   0x2   :  { %230 = vmatprep.subr.bf16.mxu0 %v250_v0  ;;  %v253_v3 = vld [vmem:[%s333_s1 + $0x18] sm:$0xff]   ;;  %v258_v4 = vld [vmem:[%s334_s0] sm:$0xff]   ;;  %v255_v6 = vld [vmem:[%s333_s1 + $0x28] sm:$0xff]  }
   0x3   :  { %231 = vmatpush3.bf16.msra.mxu0 %v250_v0  ;;  %246 = vmatprep.mubr.bf16.mxu0 %v258_v4  ;;  %v254_v5 = vld [vmem:[%s333_s1 + $0x20] sm:$0xff]   ;;  %v256_v7 = vld [vmem:[%s333_s1 + $0x30] sm:$0xff]   ;;  %v257_v8 = vld [vmem:[%s333_s1 + $0x38] sm:$0xff]  }
   0x4   :  { %232 = vmatprep.subr.bf16.mxu0 %v251_v1  ;;  %v259_v9 = vld [vmem:[%s334_s0 + $0x8] sm:$0xff]   ;;  %v218_v10 = vld [vmem:[%s335_s2] ss:$0 sm:$0xff] }
   0x5   :  { %v219_v12 = vld [vmem:[%s336_s3] ss:$0 sm:$0xff] }
   0x7   :  { %233 = vmatpush3.bf16.msra.mxu0 %v251_v1 }
   0x8   :  { %234 = vmatprep.subr.bf16.mxu0 %v252_v2 }
   0xb   :  { %235 = vmatpush3.bf16.msra.mxu0 %v252_v2 }
   0xc   :  { %236 = vmatprep.subr.bf16.mxu0 %v253_v3 }
   0xf   :  { %237 = vmatpush3.bf16.msra.mxu0 %v253_v3 }
  0x10   :  { %238 = vmatprep.subr.bf16.mxu0 %v254_v5 }
  0x13   :  { %239 = vmatpush3.bf16.msra.mxu0 %v254_v5 }
  0x14   :  { %240 = vmatprep.subr.bf16.mxu0 %v255_v6 }
  0x17   :  { %241 = vmatpush3.bf16.msra.mxu0 %v255_v6 }
  0x18   :  { %242 = vmatprep.subr.bf16.mxu0 %v256_v7 }
  0x1b   :  { %243 = vmatpush3.bf16.msra.mxu0 %v256_v7 }
  0x1c   :  { %244 = vmatprep.subr.bf16.mxu0 %v257_v8 }
  0x1f   :  { %245 = vmatpush3.bf16.msra.mxu0 %v257_v8 }
  0x22   :  { %247 = vmatmul.mubr.bf16.vlgmr.msra.gmra.mrb[0].mxu0 %v259_v9 }
  0xf5   :  { %v248_v11 = vpop.f32.mrb[0].mxu0 }
  0xf6   :  { %v183_v13 = vmul.f32 %v248_v11, %v218_v10  ;;  %v144_v14 = vpop.f32.mrb[1].mxu0 }
  0xf7   :  { %v181_v15 = vmul.f32 %v218_v10, %v144_v14  ;;  %v249_v16 = vpop.f32.mrb[2].mxu0 }
  0xf8   :  { %v194_v17 = vadd.f32 %v219_v12, %v183_v13  ;;  %v184_v18 = vmul.f32 %v249_v16, %v218_v10  ;;  %v147_v19 = vpop.f32.mrb[3].mxu0 }
  0xf9   :  { %v192_v20 = vadd.f32 %v219_v12, %v181_v15  ;;  %v182_v21 = vmul.f32 %v218_v10, %v147_v19 }
  0xfa   :  { %v198_v22 = vmax.f32 %v194_v17, 0.0  ;;  %v195_v23 = vadd.f32 %v219_v12, %v184_v18 }
  0xfb   :  { %v196_v24 = vmax.f32 %v192_v20, 0.0  ;;  %v193_v25 = vadd.f32 %v219_v12, %v182_v21 }
  0xfc   :  { %202 = vst [vmem:[%s337_s4 + $0x10] sm:$0xff] %v198_v22  ;;  %v199_v26 = vmax.f32 %v195_v23, 0.0 }
  0xfd   :  { %200 = vst [vmem:[%s337_s4] sm:$0xff] %v196_v24  ;;  %v197_v27 = vmax.f32 %v193_v25, 0.0 }
  0xfe   :  { %203 = vst [vmem:[%s337_s4 + $0x18] sm:$0xff] %v199_v26 }
  0xff   :  { %201 = vst [vmem:[%s337_s4 + $0x8] sm:$0xff] %v197_v27 }

// kernel: _lambda_.34
= control target key start
LH: loop header
LB: loop body
LE: loop exit
PB: predicated region body
PF: predicated region fallthrough
CT: control target
= control target key end

     0   :  { %s329_s1 = inlined_call_operand.vmem [shape: bf16[128,128], index: 1, kind: input, shape index: {}]   ;;  %s330_s0 = inlined_call_operand.vmem [shape: bf16[32,128], index: 0, kind: input, shape index: {}]   ;;  %s331_s2 = inlined_call_operand.vmem [shape: f32[1,128], index: 2, kind: input, shape index: {}]   ;;  %s332_s3 = inlined_call_operand.vmem [shape: f32[1,128], index: 3, kind: input, shape index: {}]   ;;  %s333_s4 = inlined_call_operand.vmem [shape: f32[32,128], index: 4, kind: output, shape index: {}]  }
   0x1   :  { %v246_v0 = vld [vmem:[%s329_s1] sm:$0xff]   ;;  %v247_v1 = vld [vmem:[%s329_s1 + $0x8] sm:$0xff]   ;;  %v248_v2 = vld [vmem:[%s329_s1 + $0x10] sm:$0xff]  }
   0x2   :  { %226 = vmatprep.subr.bf16.mxu0 %v246_v0  ;;  %v249_v3 = vld [vmem:[%s329_s1 + $0x18] sm:$0xff]   ;;  %v254_v4 = vld [vmem:[%s330_s0] sm:$0xff]   ;;  %v251_v6 = vld [vmem:[%s329_s1 + $0x28] sm:$0xff]  }
   0x3   :  { %227 = vmatpush3.bf16.msra.mxu0 %v246_v0  ;;  %242 = vmatprep.mubr.bf16.mxu0 %v254_v4  ;;  %v250_v5 = vld [vmem:[%s329_s1 + $0x20] sm:$0xff]   ;;  %v252_v7 = vld [vmem:[%s329_s1 + $0x30] sm:$0xff]   ;;  %v253_v8 = vld [vmem:[%s329_s1 + $0x38] sm:$0xff]  }
   0x4   :  { %228 = vmatprep.subr.bf16.mxu0 %v247_v1  ;;  %v255_v9 = vld [vmem:[%s330_s0 + $0x8] sm:$0xff]   ;;  %v214_v10 = vld [vmem:[%s331_s2] ss:$0 sm:$0xff] }
   0x5   :  { %v215_v12 = vld [vmem:[%s332_s3] ss:$0 sm:$0xff] }
   0x7   :  { %229 = vmatpush3.bf16.msra.mxu0 %v247_v1 }
   0x8   :  { %230 = vmatprep.subr.bf16.mxu0 %v248_v2 }
   0xb   :  { %231 = vmatpush3.bf16.msra.mxu0 %v248_v2 }
   0xc   :  { %232 = vmatprep.subr.bf16.mxu0 %v249_v3 }
   0xf   :  { %233 = vmatpush3.bf16.msra.mxu0 %v249_v3 }
  0x10   :  { %234 = vmatprep.subr.bf16.mxu0 %v250_v5 }
  0x13   :  { %235 = vmatpush3.bf16.msra.mxu0 %v250_v5 }
  0x14   :  { %236 = vmatprep.subr.bf16.mxu0 %v251_v6 }
  0x17   :  { %237 = vmatpush3.bf16.msra.mxu0 %v251_v6 }
  0x18   :  { %238 = vmatprep.subr.bf16.mxu0 %v252_v7 }
  0x1b   :  { %239 = vmatpush3.bf16.msra.mxu0 %v252_v7 }
  0x1c   :  { %240 = vmatprep.subr.bf16.mxu0 %v253_v8 }
  0x1f   :  { %241 = vmatpush3.bf16.msra.mxu0 %v253_v8 }
  0x22   :  { %243 = vmatmul.mubr.bf16.vlgmr.msra.gmra.mrb[0].mxu0 %v255_v9 }
  0xf5   :  { %v244_v11 = vpop.f32.mrb[0].mxu0 }
  0xf6   :  { %v183_v13 = vmul.f32 %v244_v11, %v214_v10  ;;  %v144_v14 = vpop.f32.mrb[1].mxu0 }
  0xf7   :  { %v181_v15 = vmul.f32 %v214_v10, %v144_v14  ;;  %v245_v16 = vpop.f32.mrb[2].mxu0 }
  0xf8   :  { %v194_v17 = vadd.f32 %v215_v12, %v183_v13  ;;  %v184_v18 = vmul.f32 %v245_v16, %v214_v10  ;;  %v147_v19 = vpop.f32.mrb[3].mxu0 }
  0xf9   :  { %v192_v20 = vadd.f32 %v215_v12, %v181_v15  ;;  %v182_v21 = vmul.f32 %v214_v10, %v147_v19 }
  0xfa   :  { %198 = vst [vmem:[%s333_s4 + $0x10] sm:$0xff] %v194_v17  ;;  %v195_v22 = vadd.f32 %v215_v12, %v184_v18 }
  0xfb   :  { %196 = vst [vmem:[%s333_s4] sm:$0xff] %v192_v20  ;;  %v193_v23 = vadd.f32 %v215_v12, %v182_v21 }
  0xfc   :  { %199 = vst [vmem:[%s333_s4 + $0x18] sm:$0xff] %v195_v22 }
  0xfd   :  { %197 = vst [vmem:[%s333_s4 + $0x8] sm:$0xff] %v193_v23 }

// kernel: _lambda_.35
= control target key start
LH: loop header
LB: loop body
LE: loop exit
PB: predicated region body
PF: predicated region fallthrough
CT: control target
= control target key end

     0   :  { %s361_s1 = inlined_call_operand.vmem [shape: bf16[128,128], index: 1, kind: input, shape index: {}]   ;;  %s362_s0 = inlined_call_operand.vmem [shape: bf16[32,128], index: 0, kind: input, shape index: {}]   ;;  %s363_s2 = inlined_call_operand.vmem [shape: f32[1,128], index: 2, kind: input, shape index: {}]   ;;  %s364_s3 = inlined_call_operand.vmem [shape: f32[1,128], index: 3, kind: input, shape index: {}]   ;;  %s365_s4 = inlined_call_operand.vmem [shape: f32[32,128], index: 4, kind: input, shape index: {}]   ;;  %s366_s5 = inlined_call_operand.vmem [shape: f32[32,128], index: 5, kind: output, shape index: {}]  }
   0x1   :  { %v261_v0 = vld [vmem:[%s361_s1] sm:$0xff]   ;;  %v262_v1 = vld [vmem:[%s361_s1 + $0x8] sm:$0xff]   ;;  %v263_v2 = vld [vmem:[%s361_s1 + $0x10] sm:$0xff]  }
   0x2   :  { %241 = vmatprep.subr.bf16.mxu0 %v261_v0  ;;  %v264_v3 = vld [vmem:[%s361_s1 + $0x18] sm:$0xff]   ;;  %v269_v4 = vld [vmem:[%s362_s0] sm:$0xff]   ;;  %v266_v6 = vld [vmem:[%s361_s1 + $0x28] sm:$0xff]  }
   0x3   :  { %242 = vmatpush3.bf16.msra.mxu0 %v261_v0  ;;  %257 = vmatprep.mubr.bf16.mxu0 %v269_v4  ;;  %v265_v5 = vld [vmem:[%s361_s1 + $0x20] sm:$0xff]   ;;  %v267_v7 = vld [vmem:[%s361_s1 + $0x30] sm:$0xff]   ;;  %v268_v8 = vld [vmem:[%s361_s1 + $0x38] sm:$0xff]  }
   0x4   :  { %243 = vmatprep.subr.bf16.mxu0 %v262_v1  ;;  %v270_v9 = vld [vmem:[%s362_s0 + $0x8] sm:$0xff]   ;;  %v229_v10 = vld [vmem:[%s363_s2] ss:$0 sm:$0xff]  ;;  %v201_v15 = vld [vmem:[%s365_s4 + $0x10] sm:$0xff] }
   0x5   :  { %v230_v12 = vld [vmem:[%s364_s3] ss:$0 sm:$0xff]  ;;  %v202_v23 = vld [vmem:[%s365_s4 + $0x18] sm:$0xff]  ;;  %v200_v27 = vld [vmem:[%s365_s4 + $0x8] sm:$0xff] }
   0x6   :  { %v199_v19 = vld [vmem:[%s365_s4] sm:$0xff] }
   0x7   :  { %244 = vmatpush3.bf16.msra.mxu0 %v262_v1 }
   0x8   :  { %245 = vmatprep.subr.bf16.mxu0 %v263_v2 }
   0xb   :  { %246 = vmatpush3.bf16.msra.mxu0 %v263_v2 }
   0xc   :  { %247 = vmatprep.subr.bf16.mxu0 %v264_v3 }
   0xf   :  { %248 = vmatpush3.bf16.msra.mxu0 %v264_v3 }
  0x10   :  { %249 = vmatprep.subr.bf16.mxu0 %v265_v5 }
  0x13   :  { %250 = vmatpush3.bf16.msra.mxu0 %v265_v5 }
  0x14   :  { %251 = vmatprep.subr.bf16.mxu0 %v266_v6 }
  0x17   :  { %252 = vmatpush3.bf16.msra.mxu0 %v266_v6 }
  0x18   :  { %253 = vmatprep.subr.bf16.mxu0 %v267_v7 }
  0x1b   :  { %254 = vmatpush3.bf16.msra.mxu0 %v267_v7 }
  0x1c   :  { %255 = vmatprep.subr.bf16.mxu0 %v268_v8 }
  0x1f   :  { %256 = vmatpush3.bf16.msra.mxu0 %v268_v8 }
  0x22   :  { %258 = vmatmul.mubr.bf16.vlgmr.msra.gmra.mrb[0].mxu0 %v270_v9 }
  0xf5   :  { %v259_v11 = vpop.f32.mrb[0].mxu0 }
  0xf6   :  { %v186_v13 = vmul.f32 %v259_v11, %v229_v10  ;;  %v147_v14 = vpop.f32.mrb[1].mxu0 }
  0xf7   :  { %v184_v16 = vmul.f32 %v229_v10, %v147_v14  ;;  %v260_v17 = vpop.f32.mrb[2].mxu0 }
  0xf8   :  { %v197_v18 = vadd.f32 %v230_v12, %v186_v13  ;;  %v187_v20 = vmul.f32 %v260_v17, %v229_v10  ;;  %v150_v21 = vpop.f32.mrb[3].mxu0 }
  0xf9   :  { %v195_v22 = vadd.f32 %v230_v12, %v184_v16  ;;  %v185_v24 = vmul.f32 %v229_v10, %v150_v21 }
  0xfa   :  { %v205_v25 = vadd.f32 %v201_v15, %v197_v18  ;;  %v198_v26 = vadd.f32 %v230_v12, %v187_v20 }
  0xfb   :  { %v203_v28 = vadd.f32 %v199_v19, %v195_v22  ;;  %v196_v29 = vadd.f32 %v230_v12, %v185_v24 }
  0xfc   :  { %v209_v30 = vmax.f32 %v205_v25, 0.0  ;;  %v206_v31 = vadd.f32 %v202_v23, %v198_v26 }
  0xfd   :  { %v207_v32 = vmax.f32 %v203_v28, 0.0  ;;  %v204_v33 = vadd.f32 %v200_v27, %v196_v29 }
  0xfe   :  { %213 = vst [vmem:[%s366_s5 + $0x10] sm:$0xff] %v209_v30  ;;  %v210_v34 = vmax.f32 %v206_v31, 0.0 }
  0xff   :  { %211 = vst [vmem:[%s366_s5] sm:$0xff] %v207_v32  ;;  %v208_v35 = vmax.f32 %v204_v33, 0.0 }
 0x100   :  { %214 = vst [vmem:[%s366_s5 + $0x18] sm:$0xff] %v210_v34 }
 0x101   :  { %212 = vst [vmem:[%s366_s5 + $0x8] sm:$0xff] %v208_v35 }

// kernel: _lambda_.37
= control target key start
LH: loop header
LB: loop body
LE: loop exit
PB: predicated region body
PF: predicated region fallthrough
CT: control target
= control target key end

     0   :  { %s832_s15 = smov 0   ;;  %s834_s16 = smov 0   ;;  %s934_s0 = inlined_call_operand.vmem [shape: bf16[32,384], index: 0, kind: input, shape index: {}]   ;;  %s935_s1 = inlined_call_operand.vmem [shape: bf16[384,128], index: 1, kind: input, shape index: {}]   ;;  %s936_s2 = inlined_call_operand.vmem [shape: f32[1,128], index: 2, kind: input, shape index: {}]   ;;  %s937_s3 = inlined_call_operand.vmem [shape: f32[1,128], index: 3, kind: input, shape index: {}]   ;;  %s938_s4 = inlined_call_operand.vmem [shape: f32[32,128], index: 4, kind: output, shape index: {}]  }
   0x1   :  { %s836_s17 = smov 0   ;;  %s838_s18 = smov 0  }
   0x2   :  { %s840_s19 = smov 0  }
   0x3 LB: > { %s26_s20 = sadd.s32 1, %s800_s18  ;;  %p49_p1 = scmp.ne.s32.totalorder %s792_s16, %s788_s15  ;;  %s804_s19 = sphi %s840_s19, %s14_s19   ;;  %s800_s18 = sphi %s838_s18, %s942_s18   ;;  %s796_s17 = sphi %s836_s17, %s941_s17   ;;  %s792_s16 = sphi %s834_s16, %s940_s16   ;;  %s788_s15 = sphi %s832_s15, %s939_s15  }
   0x4   : > { %p27_p0 = scmp.ge.s32.totalorder %s26_s20, 3  ;;  %p50_p2 = scmp.eq.s32.totalorder %s804_s19, 0 }
   0x5   : > { %s42_s22 = sadd.s32 1, %s792_s16  ;;  %p660_p5 = scmp.ge.s32.totalorder %s804_s19, 3 }
   0x6   : > { %s944_s20 = smov (%p27_p0, %s26_s20), 0  ;;  %p51_p3 = por %p50_p2, %p49_p1 }
   0x7   : > { %s38_s21 = ssub.s32 %s800_s18, %s944_s20  ;;  %195 = sbr.rel (%p660_p5) target bundleno = 21 (0x15), region = 24 }
   0x8   : > { %p40_p4 = scmp.eq.s32.totalorder %s38_s21, 0 }
   0xa   : > { %s867_s23 = scalar_select %p40_p4, %s792_s16, %s42_s22  }
   0xe   : > { %198 = sbr.rel (!%p51_p3) target bundleno = 21 (0x15), region = 28  ;;  %s200_s24 = sand.u32 (%p51_p3), 1, %s792_s16  }
   0xf   : > { %s662_s25 = sshll.u32 (%p51_p3), %s800_s18, 2  ;;  %s661_s26 = sshll.u32 (%p51_p3), %s200_s24, 4 }
  0x10   : > { %s207_s29 = scalar_lea.vmem (%p51_p3), %s934_s0, %s662_s25  ;;  %s202_s30 = scalar_lea.vmem (%p51_p3), [#allocation3], %s661_s26 }
  0x11   : > { %v223_v0 = vld [vmem:[%s207_s29] sm:$0xf] (%p51_p3)  ;;  %v225_v1 = vld [vmem:[%s207_s29 + $0xc] sm:$0xf] (%p51_p3)  ;;  %v227_v2 = vld [vmem:[%s207_s29 + $0x18] sm:$0xf] (%p51_p3) }
  0x12   : > { %224 = vst [vmem:[%s202_s30] sm:$0xf] (%p51_p3), %v223_v0  ;;  %226 = vst [vmem:[%s202_s30 + $0x4] sm:$0xf] (%p51_p3), %v225_v1  ;;  %v229_v3 = vld [vmem:[%s207_s29 + $0x24] sm:$0xf] (%p51_p3) }
  0x13   : > { %228 = vst [vmem:[%s202_s30 + $0x8] sm:$0xf] (%p51_p3), %v227_v2  ;;  %230 = vst [vmem:[%s202_s30 + $0xc] sm:$0xf] (%p51_p3), %v229_v3 }
  0x15 PF: > { %p663_p6 = scmp.ge.s32.totalorder %s804_s19, 1  ;;  %p272_p7 = scmp.lt.s32.totalorder %s804_s19, 4 }
  0x17   : > { %p273_p8 = pnand %p663_p6, %p272_p7 }
  0x18   : > { %s279_s5 = sand.u32 (!%p273_p8), 1, %s788_s15   ;;  %s665_s6 = sshll.u32 (!%p273_p8), %s796_s17, 4 }
  0x19   : > { %276 = sbr.rel (%p273_p8) target bundleno = 304 (0x130), region = 73  ;;  %s879_s7 = sshll.u32 (!%p273_p8), %s279_s5, 4 }
  0x1a   : > { %p323_p9 = scmp.lt.s32.totalorder (!%p273_p8), %s665_s6, 47  ;;  %s281_s12 = scalar_lea.vmem (!%p273_p8), [#allocation3], %s879_s7 }
  0x1b   : > { %p667_p10 = scmp.ne.s32.totalorder (!%p273_p8), %s796_s17, 0 }
  0x20   : > { %s946_s6 = smov (!%p323_p9, %s665_s6), 47  ;;  %350 = sbr.rel (%p667_p10) target bundleno = 39 (0x27), region = 81 }
  0x21   : > { %s666_s8 = sshll.u32 %s946_s6, 2  ;;  %v806_v4 = vmov (!%p667_p10), 0.0  }
  0x22   : > { %s884_s11 = scalar_lea.vmem %s935_s1, %s666_s8  ;;  %351 = vst [vmem:[#allocation2] sm:$0xff] (!%p667_p10), %v806_v4  ;;  %352 = vst [vmem:[#allocation2 + $0x8] sm:$0xff] (!%p667_p10), %v806_v4 }
  0x23   : > { %353 = vst [vmem:[#allocation2 + $0x10] sm:$0xff] (!%p667_p10), %v806_v4  ;;  %354 = vst [vmem:[#allocation2 + $0x18] sm:$0xff] (!%p667_p10), %v806_v4 }
  0x27 PF: > { %v756_v5 = vld [vmem:[%s884_s11] sm:$0xff]   ;;  %v757_v6 = vld [vmem:[%s884_s11 + $0x8] sm:$0xff]   ;;  %v758_v7 = vld [vmem:[%s884_s11 + $0x10] sm:$0xff]   ;;  %p678_p11 = scmp.ne.s32.totalorder %s796_s17, 2 }
  0x28   : > { %695 = vmatprep.subr.bf16.mxu0 %v756_v5  ;;  %v759_v8 = vld [vmem:[%s884_s11 + $0x18] sm:$0xff]   ;;  %v764_v9 = vld [vmem:[%s281_s12] sm:$0xff]   ;;  %v761_v11 = vld [vmem:[%s884_s11 + $0x28] sm:$0xff]  }
  0x29   : > { %696 = vmatpush3.bf16.msra.mxu0 %v756_v5  ;;  %711 = vmatprep.mubr.bf16.mxu0 %v764_v9  ;;  %v760_v10 = vld [vmem:[%s884_s11 + $0x20] sm:$0xff]   ;;  %v762_v12 = vld [vmem:[%s884_s11 + $0x30] sm:$0xff]   ;;  %v763_v13 = vld [vmem:[%s884_s11 + $0x38] sm:$0xff]  }
  0x2a   : > { %697 = vmatprep.subr.bf16.mxu0 %v757_v6  ;;  %v765_v14 = vld [vmem:[%s281_s12 + $0x8] sm:$0xff]   ;;  %v357_v15 = vld [vmem:[#allocation2 + $0x10] sm:$0xff]  ;;  %v355_v16 = vld [vmem:[#allocation2] sm:$0xff] }
  0x2b   : > { %v358_v18 = vld [vmem:[#allocation2 + $0x18] sm:$0xff]  ;;  %v356_v21 = vld [vmem:[#allocation2 + $0x8] sm:$0xff]  ;;  %v679_v28 = vld [vmem:[%s936_s2] ss:$0 sm:$0xff] (!%p678_p11) }
  0x2c   : > { %v680_v29 = vld [vmem:[%s937_s3] ss:$0 sm:$0xff] (!%p678_p11) }
  0x2d   : > { %698 = vmatpush3.bf16.msra.mxu0 %v757_v6 }
  0x2e   : > { %699 = vmatprep.subr.bf16.mxu0 %v758_v7 }
  0x31   : > { %700 = vmatpush3.bf16.msra.mxu0 %v758_v7 }
  0x32   : > { %701 = vmatprep.subr.bf16.mxu0 %v759_v8 }
  0x35   : > { %702 = vmatpush3.bf16.msra.mxu0 %v759_v8 }
  0x36   : > { %703 = vmatprep.subr.bf16.mxu0 %v760_v10 }
  0x39   : > { %704 = vmatpush3.bf16.msra.mxu0 %v760_v10 }
  0x3a   : > { %705 = vmatprep.subr.bf16.mxu0 %v761_v11 }
  0x3d   : > { %706 = vmatpush3.bf16.msra.mxu0 %v761_v11 }
  0x3e   : > { %707 = vmatprep.subr.bf16.mxu0 %v762_v12 }
  0x41   : > { %708 = vmatpush3.bf16.msra.mxu0 %v762_v12 }
  0x42   : > { %709 = vmatprep.subr.bf16.mxu0 %v763_v13 }
  0x45   : > { %710 = vmatpush3.bf16.msra.mxu0 %v763_v13 }
  0x48   : > { %712 = vmatmul.mubr.bf16.vlgmr.msra.gmra.mrb[0].mxu0 %v765_v14 }
 0x11b   : > { %v713_v17 = vpop.f32.mrb[0].mxu0  ;;  %499 = sbr.rel (%p678_p11) target bundleno = 304 (0x130), region = 85 }
 0x11c   : > { %v490_v19 = vadd.f32 %v713_v17, %v357_v15  ;;  %v473_v20 = vpop.f32.mrb[1].mxu0 }
 0x11d   : > { %v488_v22 = vadd.f32 %v473_v20, %v355_v16  ;;  %v714_v23 = vpop.f32.mrb[2].mxu0 }
 0x11e   : > { %494 = vst [vmem:[#allocation2 + $0x10] sm:$0xff] %v490_v19  ;;  %v491_v24 = vadd.f32 %v714_v23, %v358_v18  ;;  %v476_v25 = vpop.f32.mrb[3].mxu0 }
 0x11f   : > { %492 = vst [vmem:[#allocation2] sm:$0xff] %v488_v22  ;;  %v489_v26 = vadd.f32 %v476_v25, %v356_v21 }
 0x120   : > { %495 = vst [vmem:[#allocation2 + $0x18] sm:$0xff] %v491_v24 }
 0x121   : > { %493 = vst [vmem:[#allocation2 + $0x8] sm:$0xff] %v489_v26 }
 0x125   : > { %v502_v32 = vld [vmem:[#allocation2 + $0x10] sm:$0xff] }
 0x126   : > { %v500_v27 = vld [vmem:[#allocation2] sm:$0xff]  ;;  %v513_v35 = vmul.f32 %v679_v28, %v502_v32 }
 0x127   : > { %v511_v30 = vmul.f32 %v679_v28, %v500_v27  ;;  %v503_v33 = vld [vmem:[#allocation2 + $0x18] sm:$0xff] }
 0x128   : > { %v501_v31 = vld [vmem:[#allocation2 + $0x8] sm:$0xff]  ;;  %v514_v36 = vmul.f32 %v679_v28, %v503_v33  ;;  %v524_v39 = vadd.f32 %v680_v29, %v513_v35 }
 0x129   : > { %v512_v34 = vmul.f32 %v679_v28, %v501_v31  ;;  %v522_v37 = vadd.f32 %v680_v29, %v511_v30 }
 0x12a   : > { %v525_v40 = vadd.f32 %v680_v29, %v514_v36  ;;  %v528_v43 = vmax.f32 %v524_v39, 0.0 }
 0x12b   : > { %v523_v38 = vadd.f32 %v680_v29, %v512_v34  ;;  %v526_v41 = vmax.f32 %v522_v37, 0.0 }
 0x12c   : > { %v529_v44 = vmax.f32 %v525_v40, 0.0  ;;  %532 = vst [vmem:[%s938_s4 + $0x10] sm:$0xff] %v528_v43 }
 0x12d   : > { %v527_v42 = vmax.f32 %v523_v38, 0.0  ;;  %530 = vst [vmem:[%s938_s4] sm:$0xff] %v526_v41 }
 0x12e   : > { %533 = vst [vmem:[%s938_s4 + $0x18] sm:$0xff] %v529_v44 }
 0x12f   : > { %531 = vst [vmem:[%s938_s4 + $0x8] sm:$0xff] %v527_v42 }
 0x130 PF: > { %s14_s19 = sadd.s32 1, %s804_s19   ;;  %s939_s15 = smov %s792_s16 }
 0x131   : > { %p11_p12 = scmp.ge.s32.totalorder %s14_s19, 5   ;;  %s940_s16 = smov %s867_s23 }
 0x132   : > { %s941_s17 = smov %s800_s18  ;;  %s942_s18 = smov %s944_s20 }
 0x133   :  { %13 = sbr.rel (!%p11_p12) target bundleno = 3 (0x3), region = 129 }

// kernel: _lambda_.38
= control target key start
LH: loop header
LB: loop body
LE: loop exit
PB: predicated region body
PF: predicated region fallthrough
CT: control target
= control target key end

     0   :  { %v205_v0 = vmov 0.0   ;;  %vm206_vm0 = vmmov 0   ;;  %s268_s1 = inlined_call_operand.vmem [shape: bf16[128,128], index: 1, kind: input, shape index: {}]   ;;  %s269_s0 = inlined_call_operand.vmem [shape: bf16[8,128], index: 0, kind: input, shape index: {}]   ;;  %s270_s2 = inlined_call_operand.vmem [shape: f32[1,128], index: 2, kind: input, shape index: {}]   ;;  %s271_s3 = inlined_call_operand.vmem [shape: f32[1,128], index: 3, kind: input, shape index: {}]   ;;  %s272_s4 = inlined_call_operand.vmem [shape: f32[8,128], index: 4, kind: output, shape index: {}]  }
   0x1   :  { %175 = vmatprep.subr.bf16.mxu0 %v205_v0  ;;  %v197_v1 = vld [vmem:[%s268_s1] sm:$0xff]   ;;  %191 = vmatprep.mubr.msk.bf16.mxu0 %vm206_vm0, %v205_v0  ;;  %v198_v2 = vld [vmem:[%s268_s1 + $0x8] sm:$0xff]   ;;  %v199_v3 = vld [vmem:[%s268_s1 + $0x10] sm:$0xff]  }
   0x2   :  { %176 = vmatpush3.bf16.msra.mxu0 %v197_v1  ;;  %v200_v4 = vld [vmem:[%s268_s1 + $0x18] sm:$0xff]   ;;  %v201_v5 = vld [vmem:[%s268_s1 + $0x20] sm:$0xff]   ;;  %v202_v6 = vld [vmem:[%s268_s1 + $0x28] sm:$0xff]  }
   0x3   :  { %177 = vmatprep.subr.bf16.mxu0 %v205_v0  ;;  %v203_v7 = vld [vmem:[%s268_s1 + $0x30] sm:$0xff]   ;;  %v204_v8 = vld [vmem:[%s268_s1 + $0x38] sm:$0xff]   ;;  %v24_v9 = vld [vmem:[%s269_s0] sm:$0xf] }
   0x4   :  { %v164_v10 = vld [vmem:[%s270_s2] ss:$0 sm:$0xff] }
   0x5   :  { %v165_v12 = vld [vmem:[%s271_s3] ss:$0 sm:$0xff] }
   0x6   :  { %178 = vmatpush3.bf16.msra.mxu0 %v198_v2 }
   0x7   :  { %179 = vmatprep.subr.bf16.mxu0 %v205_v0 }
   0xa   :  { %180 = vmatpush3.bf16.msra.mxu0 %v199_v3 }
   0xb   :  { %181 = vmatprep.subr.bf16.mxu0 %v205_v0 }
   0xe   :  { %182 = vmatpush3.bf16.msra.mxu0 %v200_v4 }
   0xf   :  { %183 = vmatprep.subr.bf16.mxu0 %v205_v0 }
  0x12   :  { %184 = vmatpush3.bf16.msra.mxu0 %v201_v5 }
  0x13   :  { %185 = vmatprep.subr.bf16.mxu0 %v205_v0 }
  0x16   :  { %186 = vmatpush3.bf16.msra.mxu0 %v202_v6 }
  0x17   :  { %187 = vmatprep.subr.bf16.mxu0 %v205_v0 }
  0x1a   :  { %188 = vmatpush3.bf16.msra.mxu0 %v203_v7 }
  0x1b   :  { %189 = vmatprep.subr.bf16.mxu0 %v205_v0 }
  0x1e   :  { %190 = vmatpush3.bf16.msra.mxu0 %v204_v8 }
  0x21   :  { %192 = vmatmul.mubr.bf16.vlgmr.msra.gmra.mrb[0].mxu0 %v24_v9 }
  0xf4   :  { %v123_v11 = vpop.f32.mrb[0].mxu0 }
  0xf5   :  { %v142_v13 = vmul.f32 %v164_v10, %v123_v11  ;;  %v193_v14 = vpop.f32.mrb[1].mxu0 }
  0xf6   :  { %v126_v15 = vpop.f32.mrb[2].mxu0 }
  0xf7   :  { %v150_v16 = vadd.f32 %v165_v12, %v142_v13  ;;  %v194_v17 = vpop.f32.mrb[3].mxu0 }
  0xf9   :  { %151 = vst [vmem:[%s272_s4] sm:$0xff] %v150_v16 }

// kernel: _lambda_.39
= control target key start
LH: loop header
LB: loop body
LE: loop exit
PB: predicated region body
PF: predicated region fallthrough
CT: control target
= control target key end

     0   :  { %v211_v0 = vmov 0.0   ;;  %vm212_vm0 = vmmov 0   ;;  %s282_s1 = inlined_call_operand.vmem [shape: bf16[128,128], index: 1, kind: input, shape index: {}]   ;;  %s283_s0 = inlined_call_operand.vmem [shape: bf16[8,128], index: 0, kind: input, shape index: {}]   ;;  %s284_s2 = inlined_call_operand.vmem [shape: f32[1,128], index: 2, kind: input, shape index: {}]   ;;  %s285_s3 = inlined_call_operand.vmem [shape: f32[1,128], index: 3, kind: input, shape index: {}]   ;;  %s286_s4 = inlined_call_operand.vmem [shape: f32[8,128], index: 4, kind: input, shape index: {}]   ;;  %s287_s5 = inlined_call_operand.vmem [shape: f32[8,128], index: 5, kind: output, shape index: {}]  }
   0x1   :  { %181 = vmatprep.subr.bf16.mxu0 %v211_v0  ;;  %v203_v1 = vld [vmem:[%s282_s1] sm:$0xff]   ;;  %197 = vmatprep.mubr.msk.bf16.mxu0 %vm212_vm0, %v211_v0  ;;  %v204_v2 = vld [vmem:[%s282_s1 + $0x8] sm:$0xff]   ;;  %v205_v3 = vld [vmem:[%s282_s1 + $0x10] sm:$0xff]  }
   0x2   :  { %182 = vmatpush3.bf16.msra.mxu0 %v203_v1  ;;  %v206_v4 = vld [vmem:[%s282_s1 + $0x18] sm:$0xff]   ;;  %v207_v5 = vld [vmem:[%s282_s1 + $0x20] sm:$0xff]   ;;  %v208_v6 = vld [vmem:[%s282_s1 + $0x28] sm:$0xff]  }
   0x3   :  { %183 = vmatprep.subr.bf16.mxu0 %v211_v0  ;;  %v209_v7 = vld [vmem:[%s282_s1 + $0x30] sm:$0xff]   ;;  %v210_v8 = vld [vmem:[%s282_s1 + $0x38] sm:$0xff]   ;;  %v27_v9 = vld [vmem:[%s283_s0] sm:$0xf] }
   0x4   :  { %v170_v10 = vld [vmem:[%s284_s2] ss:$0 sm:$0xff] }
   0x5   :  { %v171_v12 = vld [vmem:[%s285_s3] ss:$0 sm:$0xff] }
   0x6   :  { %184 = vmatpush3.bf16.msra.mxu0 %v204_v2  ;;  %v154_v15 = vld [vmem:[%s286_s4] sm:$0xff] }
   0x7   :  { %185 = vmatprep.subr.bf16.mxu0 %v211_v0 }
   0xa   :  { %186 = vmatpush3.bf16.msra.mxu0 %v205_v3 }
   0xb   :  { %187 = vmatprep.subr.bf16.mxu0 %v211_v0 }
   0xe   :  { %188 = vmatpush3.bf16.msra.mxu0 %v206_v4 }
   0xf   :  { %189 = vmatprep.subr.bf16.mxu0 %v211_v0 }
  0x12   :  { %190 = vmatpush3.bf16.msra.mxu0 %v207_v5 }
  0x13   :  { %191 = vmatprep.subr.bf16.mxu0 %v211_v0 }
  0x16   :  { %192 = vmatpush3.bf16.msra.mxu0 %v208_v6 }
  0x17   :  { %193 = vmatprep.subr.bf16.mxu0 %v211_v0 }
  0x1a   :  { %194 = vmatpush3.bf16.msra.mxu0 %v209_v7 }
  0x1b   :  { %195 = vmatprep.subr.bf16.mxu0 %v211_v0 }
  0x1e   :  { %196 = vmatpush3.bf16.msra.mxu0 %v210_v8 }
  0x21   :  { %198 = vmatmul.mubr.bf16.vlgmr.msra.gmra.mrb[0].mxu0 %v27_v9 }
  0xf4   :  { %v126_v11 = vpop.f32.mrb[0].mxu0 }
  0xf5   :  { %v145_v13 = vmul.f32 %v170_v10, %v126_v11  ;;  %v199_v14 = vpop.f32.mrb[1].mxu0 }
  0xf6   :  { %v129_v16 = vpop.f32.mrb[2].mxu0 }
  0xf7   :  { %v153_v17 = vadd.f32 %v171_v12, %v145_v13  ;;  %v200_v18 = vpop.f32.mrb[3].mxu0 }
  0xf9   :  { %v155_v19 = vadd.f32 %v154_v15, %v153_v17 }
  0xfb   :  { %v156_v20 = vmax.f32 %v155_v19, 0.0 }
  0xfd   :  { %157 = vst [vmem:[%s287_s5] sm:$0xff] %v156_v20 }

// kernel: _lambda_.42
= control target key start
LH: loop header
LB: loop body
LE: loop exit
PB: predicated region body
PF: predicated region fallthrough
CT: control target
= control target key end

     0   :  { %v248_v1 = vmov 0   ;;  %v175_v18 = vlaneseq  ;;  %s337_s1 = inlined_call_operand.vmem [shape: bf16[128,256], index: 1, kind: input, shape index: {}]   ;;  %s338_s0 = inlined_call_operand.vmem [shape: bf16[8,128], index: 0, kind: input, shape index: {}]   ;;  %s339_s2 = inlined_call_operand.vmem [shape: f32[1,256], index: 2, kind: input, shape index: {}]   ;;  %s340_s3 = inlined_call_operand.vmem [shape: f32[1,256], index: 3, kind: input, shape index: {}]   ;;  %s341_s4 = inlined_call_operand.vmem [shape: f32[8,256], index: 4, kind: output, shape index: {}]  }
   0x1   :  { %v224_v0 = vld [vmem:[%s337_s1 + $0x4] ss:$8 sps:$4 sm:$0xff]   ;;  %155 = vmatprep.mubr.bf16.mxu0 %v248_v1  ;;  %v226_v2 = vld [vmem:[%s337_s1] ss:$8 sps:$4 sm:$0xff]   ;;  %v227_v3 = vld [vmem:[%s337_s1 + $0x14] ss:$8 sps:$4 sm:$0xff]  }
   0x2   :  { %123 = vmatprep.subr.bf16.mxu0 %v224_v0  ;;  %v229_v4 = vld [vmem:[%s337_s1 + $0x10] ss:$8 sps:$4 sm:$0xff]   ;;  %v230_v5 = vld [vmem:[%s337_s1 + $0x24] ss:$8 sps:$4 sm:$0xff]   ;;  %v232_v6 = vld [vmem:[%s337_s1 + $0x20] ss:$8 sps:$4 sm:$0xff]  }
   0x3   :  { %124 = vmatpush1.bf16.msra.mxu0 %v226_v2  ;;  %v233_v7 = vld [vmem:[%s337_s1 + $0x34] ss:$8 sps:$4 sm:$0xff]   ;;  %v235_v8 = vld [vmem:[%s337_s1 + $0x30] ss:$8 sps:$4 sm:$0xff]   ;;  %v236_v9 = vld [vmem:[%s337_s1 + $0x44] ss:$8 sps:$4 sm:$0xff]  }
   0x4   :  { %125 = vmatprep.subr.bf16.mxu0 %v227_v3  ;;  %v238_v10 = vld [vmem:[%s337_s1 + $0x40] ss:$8 sps:$4 sm:$0xff]   ;;  %v239_v11 = vld [vmem:[%s337_s1 + $0x54] ss:$8 sps:$4 sm:$0xff]   ;;  %v241_v12 = vld [vmem:[%s337_s1 + $0x50] ss:$8 sps:$4 sm:$0xff]  }
   0x5   :  { %v242_v13 = vld [vmem:[%s337_s1 + $0x64] ss:$8 sps:$4 sm:$0xff]   ;;  %v244_v14 = vld [vmem:[%s337_s1 + $0x60] ss:$8 sps:$4 sm:$0xff]   ;;  %v245_v15 = vld [vmem:[%s337_s1 + $0x74] ss:$8 sps:$4 sm:$0xff]  }
   0x6   :  { %v247_v16 = vld [vmem:[%s337_s1 + $0x70] ss:$8 sps:$4 sm:$0xff]   ;;  %v26_v17 = vld [vmem:[%s338_s0] sm:$0xf]  ;;  %v176_v19 = vshrl.u32 %v175_v18, 7 }
   0x7   :  { %126 = vmatpush1.bf16.msra.mxu0 %v229_v4  ;;  %v173_v21 = vld [vmem:[%s339_s2] sm:$0x3] }
   0x8   :  { %127 = vmatprep.subr.bf16.mxu0 %v230_v5  ;;  %v177_v20 = vsub.s32 0, %v176_v19  ;;  %v181_v22 = vsub.s32 1, %v176_v19  ;;  %v187_v23 = vld [vmem:[%s340_s3] sm:$0x3] }
   0xa   :  { %v178_v24 = vrot.slane %v173_v21, %v177_v20  ;;  %v182_v25 = vrot.slane %v173_v21, %v181_v22  ;;  %v192_v26 = vrot.slane %v187_v23, %v177_v20  ;;  %v196_v28 = vrot.slane %v187_v23, %v181_v22 }
   0xb   :  { %128 = vmatpush1.bf16.msra.mxu0 %v232_v6 }
   0xc   :  { %129 = vmatprep.subr.bf16.mxu0 %v233_v7 }
   0xf   :  { %130 = vmatpush1.bf16.msra.mxu0 %v235_v8 }
  0x10   :  { %131 = vmatprep.subr.bf16.mxu0 %v236_v9 }
  0x13   :  { %132 = vmatpush1.bf16.msra.mxu0 %v238_v10 }
  0x14   :  { %133 = vmatprep.subr.bf16.mxu0 %v239_v11 }
  0x17   :  { %134 = vmatpush1.bf16.msra.mxu0 %v241_v12 }
  0x18   :  { %135 = vmatprep.subr.bf16.mxu0 %v242_v13 }
  0x1b   :  { %136 = vmatpush1.bf16.msra.mxu0 %v244_v14 }
  0x1c   :  { %137 = vmatprep.subr.bf16.mxu0 %v245_v15 }
  0x1f   :  { %138 = vmatpush1.bf16.msra.mxu0 %v247_v16 }
  0x22   :  { %156 = vmatmul.mubr.bf16.vlgmr.msra.gmra.mrb[0].mxu0 %v26_v17 }
  0xf5   :  { %v157_v27 = vpop.f32.mrb[0].mxu0 }
  0xf6   :  { %v185_v29 = vmul.f32 %v178_v24, %v157_v27  ;;  %v159_v30 = vpop.f32.mrb[1].mxu0 }
  0xf7   :  { %v186_v31 = vmul.f32 %v182_v25, %v159_v30  ;;  %v161_v32 = vpop.f32.mrb[2].mxu0 }
  0xf8   :  { %v199_v33 = vadd.f32 %v192_v26, %v185_v29  ;;  %v162_v34 = vpop.f32.mrb[3].mxu0 }
  0xf9   :  { %v200_v35 = vadd.f32 %v196_v28, %v186_v31 }
  0xfa   :  { %201 = vst [vmem:[%s341_s4] sm:$0xff] %v199_v33 }
  0xfb   :  { %202 = vst [vmem:[%s341_s4 + $0x8] sm:$0xff] %v200_v35 }

// kernel: _lambda_.40
= control target key start
LH: loop header
LB: loop body
LE: loop exit
PB: predicated region body
PF: predicated region fallthrough
CT: control target
= control target key end

     0   :  { %v206_v0 = vmov 0.0   ;;  %vm207_vm0 = vmmov 0   ;;  %s269_s1 = inlined_call_operand.vmem [shape: bf16[128,128], index: 1, kind: input, shape index: {}]   ;;  %s270_s0 = inlined_call_operand.vmem [shape: bf16[8,128], index: 0, kind: input, shape index: {}]   ;;  %s271_s2 = inlined_call_operand.vmem [shape: f32[1,128], index: 2, kind: input, shape index: {}]   ;;  %s272_s3 = inlined_call_operand.vmem [shape: f32[1,128], index: 3, kind: input, shape index: {}]   ;;  %s273_s4 = inlined_call_operand.vmem [shape: f32[8,128], index: 4, kind: output, shape index: {}]  }
   0x1   :  { %176 = vmatprep.subr.bf16.mxu0 %v206_v0  ;;  %v198_v1 = vld [vmem:[%s269_s1] sm:$0xff]   ;;  %192 = vmatprep.mubr.msk.bf16.mxu0 %vm207_vm0, %v206_v0  ;;  %v199_v2 = vld [vmem:[%s269_s1 + $0x8] sm:$0xff]   ;;  %v200_v3 = vld [vmem:[%s269_s1 + $0x10] sm:$0xff]  }
   0x2   :  { %177 = vmatpush3.bf16.msra.mxu0 %v198_v1  ;;  %v201_v4 = vld [vmem:[%s269_s1 + $0x18] sm:$0xff]   ;;  %v202_v5 = vld [vmem:[%s269_s1 + $0x20] sm:$0xff]   ;;  %v203_v6 = vld [vmem:[%s269_s1 + $0x28] sm:$0xff]  }
   0x3   :  { %178 = vmatprep.subr.bf16.mxu0 %v206_v0  ;;  %v204_v7 = vld [vmem:[%s269_s1 + $0x30] sm:$0xff]   ;;  %v205_v8 = vld [vmem:[%s269_s1 + $0x38] sm:$0xff]   ;;  %v24_v9 = vld [vmem:[%s270_s0] sm:$0xf] }
   0x4   :  { %v165_v10 = vld [vmem:[%s271_s2] ss:$0 sm:$0xff] }
   0x5   :  { %v166_v12 = vld [vmem:[%s272_s3] ss:$0 sm:$0xff] }
   0x6   :  { %179 = vmatpush3.bf16.msra.mxu0 %v199_v2 }
   0x7   :  { %180 = vmatprep.subr.bf16.mxu0 %v206_v0 }
   0xa   :  { %181 = vmatpush3.bf16.msra.mxu0 %v200_v3 }
   0xb   :  { %182 = vmatprep.subr.bf16.mxu0 %v206_v0 }
   0xe   :  { %183 = vmatpush3.bf16.msra.mxu0 %v201_v4 }
   0xf   :  { %184 = vmatprep.subr.bf16.mxu0 %v206_v0 }
  0x12   :  { %185 = vmatpush3.bf16.msra.mxu0 %v202_v5 }
  0x13   :  { %186 = vmatprep.subr.bf16.mxu0 %v206_v0 }
  0x16   :  { %187 = vmatpush3.bf16.msra.mxu0 %v203_v6 }
  0x17   :  { %188 = vmatprep.subr.bf16.mxu0 %v206_v0 }
  0x1a   :  { %189 = vmatpush3.bf16.msra.mxu0 %v204_v7 }
  0x1b   :  { %190 = vmatprep.subr.bf16.mxu0 %v206_v0 }
  0x1e   :  { %191 = vmatpush3.bf16.msra.mxu0 %v205_v8 }
  0x21   :  { %193 = vmatmul.mubr.bf16.vlgmr.msra.gmra.mrb[0].mxu0 %v24_v9 }
  0xf4   :  { %v123_v11 = vpop.f32.mrb[0].mxu0 }
  0xf5   :  { %v142_v13 = vmul.f32 %v165_v10, %v123_v11  ;;  %v194_v14 = vpop.f32.mrb[1].mxu0 }
  0xf6   :  { %v126_v15 = vpop.f32.mrb[2].mxu0 }
  0xf7   :  { %v150_v16 = vadd.f32 %v166_v12, %v142_v13  ;;  %v195_v17 = vpop.f32.mrb[3].mxu0 }
  0xf9   :  { %v151_v18 = vmax.f32 %v150_v16, 0.0 }
  0xfb   :  { %152 = vst [vmem:[%s273_s4] sm:$0xff] %v151_v18 }

// kernel: _lambda_.41
= control target key start
LH: loop header
LB: loop body
LE: loop exit
PB: predicated region body
PF: predicated region fallthrough
CT: control target
= control target key end

     0   :  { %s689_s15 = smov 0   ;;  %s691_s16 = smov 0   ;;  %s741_s0 = inlined_call_operand.vmem [shape: bf16[8,640], index: 0, kind: input, shape index: {}]   ;;  %s742_s1 = inlined_call_operand.vmem [shape: bf16[640,128], index: 1, kind: input, shape index: {}]   ;;  %s743_s2 = inlined_call_operand.vmem [shape: f32[1,128], index: 2, kind: input, shape index: {}]   ;;  %s744_s3 = inlined_call_operand.vmem [shape: f32[1,128], index: 3, kind: input, shape index: {}]   ;;  %s745_s4 = inlined_call_operand.vmem [shape: f32[8,128], index: 4, kind: output, shape index: {}]  }
   0x1   :  { %s693_s17 = smov 0  }
   0x2 LB: > { %s26_s18 = sadd.s32 1, %s655_s16  ;;  %p554_p0 = scmp.ge.s32.totalorder %s659_s17, 1  ;;  %s659_s17 = sphi %s693_s17, %s14_s17   ;;  %s655_s16 = sphi %s691_s16, %s747_s16   ;;  %s651_s15 = sphi %s689_s15, %s746_s15  }
   0x3   : > { %p27_p1 = scmp.ge.s32.totalorder %s26_s18, 5  ;;  %p220_p2 = scmp.lt.s32.totalorder %s659_s17, 6 }
   0x5   : > { %s749_s18 = smov (%p27_p1, %s26_s18), 0  ;;  %p221_p3 = pnand %p554_p0, %p220_p2 }
   0x6   : > { %p267_p4 = scmp.lt.s32.totalorder (!%p221_p3), %s651_s15, 4  ;;  %s556_s19 = sshll.u32 (!%p221_p3), %s651_s15, 4 }
   0x7   : > { %224 = sbr.rel (%p221_p3) target bundleno = 284 (0x11c), region = 36  ;;  %p274_p5 = scmp.lt.s32.totalorder (!%p221_p3), %s556_s19, 79 }
   0x8   : > { %p558_p6 = scmp.ne.s32.totalorder (!%p221_p3), %s651_s15, 0 }
   0xe   : > { %s268_s20 = scalar_select %p267_p4, %s651_s15, 4 }
   0xf   : > { %s751_s19 = smov (!%p274_p5, %s556_s19), 79  ;;  %299 = sbr.rel (%p558_p6) target bundleno = 22 (0x16), region = 40 }
  0x10   : > { %s555_s21 = sshll.u32 %s268_s20, 2  ;;  %s557_s25 = sshll.u32 %s751_s19, 2  ;;  %v661_v0 = vmov (!%p558_p6), 0.0  }
  0x11   : > { %s715_s24 = scalar_lea.vmem %s741_s0, %s555_s21  ;;  %s280_s28 = scalar_lea.vmem %s742_s1, %s557_s25  ;;  %300 = vst [vmem:[#allocation2] sm:$0xff] (!%p558_p6), %v661_v0 }
  0x16 PF: > { %v629_v1 = vld [vmem:[%s280_s28] sm:$0xff]   ;;  %v662_v2 = vmov 0.0   ;;  %v630_v3 = vld [vmem:[%s280_s28 + $0x8] sm:$0xff]   ;;  %vm663_vm0 = vmmov 0   ;;  %v631_v4 = vld [vmem:[%s280_s28 + $0x10] sm:$0xff]   ;;  %p567_p7 = scmp.ne.s32.totalorder %s651_s15, 4 }
  0x17   : > { %582 = vmatprep.subr.bf16.mxu0 %v662_v2  ;;  %598 = vmatprep.mubr.msk.bf16.mxu0 %vm663_vm0, %v662_v2  ;;  %v632_v5 = vld [vmem:[%s280_s28 + $0x18] sm:$0xff]   ;;  %v633_v6 = vld [vmem:[%s280_s28 + $0x20] sm:$0xff]   ;;  %v634_v7 = vld [vmem:[%s280_s28 + $0x28] sm:$0xff]  }
  0x18   : > { %583 = vmatpush3.bf16.msra.mxu0 %v629_v1  ;;  %v635_v8 = vld [vmem:[%s280_s28 + $0x30] sm:$0xff]   ;;  %v636_v9 = vld [vmem:[%s280_s28 + $0x38] sm:$0xff]   ;;  %v302_v10 = vld [vmem:[%s715_s24] sm:$0xf] }
  0x19   : > { %584 = vmatprep.subr.bf16.mxu0 %v662_v2  ;;  %v301_v11 = vld [vmem:[#allocation2] sm:$0xff] }
  0x1a   : > { %v568_v18 = vld [vmem:[%s743_s2] ss:$0 sm:$0xff] (!%p567_p7) }
  0x1b   : > { %v569_v19 = vld [vmem:[%s744_s3] ss:$0 sm:$0xff] (!%p567_p7) }
  0x1c   : > { %585 = vmatpush3.bf16.msra.mxu0 %v630_v3 }
  0x1d   : > { %586 = vmatprep.subr.bf16.mxu0 %v662_v2 }
  0x20   : > { %587 = vmatpush3.bf16.msra.mxu0 %v631_v4 }
  0x21   : > { %588 = vmatprep.subr.bf16.mxu0 %v662_v2 }
  0x24   : > { %589 = vmatpush3.bf16.msra.mxu0 %v632_v5 }
  0x25   : > { %590 = vmatprep.subr.bf16.mxu0 %v662_v2 }
  0x28   : > { %591 = vmatpush3.bf16.msra.mxu0 %v633_v6 }
  0x29   : > { %592 = vmatprep.subr.bf16.mxu0 %v662_v2 }
  0x2c   : > { %593 = vmatpush3.bf16.msra.mxu0 %v634_v7 }
  0x2d   : > { %594 = vmatprep.subr.bf16.mxu0 %v662_v2 }
  0x30   : > { %595 = vmatpush3.bf16.msra.mxu0 %v635_v8 }
  0x31   : > { %596 = vmatprep.subr.bf16.mxu0 %v662_v2 }
  0x34   : > { %597 = vmatpush3.bf16.msra.mxu0 %v636_v9 }
  0x37   : > { %599 = vmatmul.mubr.bf16.vlgmr.msra.gmra.mrb[0].mxu0 %v302_v10 }
 0x107   : > { %412 = sbr.rel (%p567_p7) target bundleno = 284 (0x11c), region = 44 }
 0x10a   : > { %v401_v12 = vpop.f32.mrb[0].mxu0 }
 0x10b   : > { %v407_v13 = vadd.f32 %v401_v12, %v301_v11  ;;  %v600_v14 = vpop.f32.mrb[1].mxu0 }
 0x10c   : > { %v404_v15 = vpop.f32.mrb[2].mxu0 }
 0x10d   : > { %408 = vst [vmem:[#allocation2] sm:$0xff] %v407_v13  ;;  %v601_v16 = vpop.f32.mrb[3].mxu0 }
 0x114   : > { %v413_v17 = vld [vmem:[#allocation2] sm:$0xff] }
 0x115   : > { %v421_v20 = vmul.f32 %v568_v18, %v413_v17 }
 0x117   : > { %v429_v21 = vadd.f32 %v569_v19, %v421_v20 }
 0x119   : > { %v430_v22 = vmax.f32 %v429_v21, 0.0 }
 0x11b   : > { %431 = vst [vmem:[%s745_s4] sm:$0xff] %v430_v22 }
 0x11c PF: > { %s14_s17 = sadd.s32 1, %s659_s17   ;;  %s746_s15 = smov %s655_s16 }
 0x11d   : > { %p11_p8 = scmp.ge.s32.totalorder %s14_s17, 7   ;;  %s747_s16 = smov %s749_s18 }
 0x11f   :  { %13 = sbr.rel (!%p11_p8) target bundleno = 2 (0x2), region = 83 }

// kernel: _lambda_.43
= control target key start
LH: loop header
LB: loop body
LE: loop exit
PB: predicated region body
PF: predicated region fallthrough
CT: control target
= control target key end

     0   :  { %v257_v1 = vmov 0   ;;  %v178_v18 = vlaneseq  ;;  %s357_s1 = inlined_call_operand.vmem [shape: bf16[128,256], index: 1, kind: input, shape index: {}]   ;;  %s358_s0 = inlined_call_operand.vmem [shape: bf16[8,128], index: 0, kind: input, shape index: {}]   ;;  %s359_s2 = inlined_call_operand.vmem [shape: f32[1,256], index: 2, kind: input, shape index: {}]   ;;  %s360_s3 = inlined_call_operand.vmem [shape: f32[1,256], index: 3, kind: input, shape index: {}]   ;;  %s361_s4 = inlined_call_operand.vmem [shape: f32[8,256], index: 4, kind: input, shape index: {}]   ;;  %s362_s5 = inlined_call_operand.vmem [shape: f32[8,256], index: 5, kind: output, shape index: {}]  }
   0x1   :  { %v233_v0 = vld [vmem:[%s357_s1 + $0x4] ss:$8 sps:$4 sm:$0xff]   ;;  %158 = vmatprep.mubr.bf16.mxu0 %v257_v1  ;;  %v235_v2 = vld [vmem:[%s357_s1] ss:$8 sps:$4 sm:$0xff]   ;;  %v236_v3 = vld [vmem:[%s357_s1 + $0x14] ss:$8 sps:$4 sm:$0xff]  }
   0x2   :  { %126 = vmatprep.subr.bf16.mxu0 %v233_v0  ;;  %v238_v4 = vld [vmem:[%s357_s1 + $0x10] ss:$8 sps:$4 sm:$0xff]   ;;  %v239_v5 = vld [vmem:[%s357_s1 + $0x24] ss:$8 sps:$4 sm:$0xff]   ;;  %v241_v6 = vld [vmem:[%s357_s1 + $0x20] ss:$8 sps:$4 sm:$0xff]  }
   0x3   :  { %127 = vmatpush1.bf16.msra.mxu0 %v235_v2  ;;  %v242_v7 = vld [vmem:[%s357_s1 + $0x34] ss:$8 sps:$4 sm:$0xff]   ;;  %v244_v8 = vld [vmem:[%s357_s1 + $0x30] ss:$8 sps:$4 sm:$0xff]   ;;  %v245_v9 = vld [vmem:[%s357_s1 + $0x44] ss:$8 sps:$4 sm:$0xff]  }
   0x4   :  { %128 = vmatprep.subr.bf16.mxu0 %v236_v3  ;;  %v247_v10 = vld [vmem:[%s357_s1 + $0x40] ss:$8 sps:$4 sm:$0xff]   ;;  %v248_v11 = vld [vmem:[%s357_s1 + $0x54] ss:$8 sps:$4 sm:$0xff]   ;;  %v250_v12 = vld [vmem:[%s357_s1 + $0x50] ss:$8 sps:$4 sm:$0xff]  }
   0x5   :  { %v251_v13 = vld [vmem:[%s357_s1 + $0x64] ss:$8 sps:$4 sm:$0xff]   ;;  %v253_v14 = vld [vmem:[%s357_s1 + $0x60] ss:$8 sps:$4 sm:$0xff]   ;;  %v254_v15 = vld [vmem:[%s357_s1 + $0x74] ss:$8 sps:$4 sm:$0xff]  }
   0x6   :  { %v256_v16 = vld [vmem:[%s357_s1 + $0x70] ss:$8 sps:$4 sm:$0xff]   ;;  %v29_v17 = vld [vmem:[%s358_s0] sm:$0xf]  ;;  %v179_v19 = vshrl.u32 %v178_v18, 7  ;;  %v205_v35 = vld [vmem:[%s361_s4 + $0x8] sm:$0xff] }
   0x7   :  { %129 = vmatpush1.bf16.msra.mxu0 %v238_v4  ;;  %v176_v21 = vld [vmem:[%s359_s2] sm:$0x3] }
   0x8   :  { %130 = vmatprep.subr.bf16.mxu0 %v239_v5  ;;  %v180_v20 = vsub.s32 0, %v179_v19  ;;  %v184_v22 = vsub.s32 1, %v179_v19  ;;  %v190_v23 = vld [vmem:[%s360_s3] sm:$0x3] }
   0x9   :  { %v204_v31 = vld [vmem:[%s361_s4] sm:$0xff] }
   0xa   :  { %v181_v24 = vrot.slane %v176_v21, %v180_v20  ;;  %v185_v25 = vrot.slane %v176_v21, %v184_v22  ;;  %v195_v26 = vrot.slane %v190_v23, %v180_v20  ;;  %v199_v28 = vrot.slane %v190_v23, %v184_v22 }
   0xb   :  { %131 = vmatpush1.bf16.msra.mxu0 %v241_v6 }
   0xc   :  { %132 = vmatprep.subr.bf16.mxu0 %v242_v7 }
   0xf   :  { %133 = vmatpush1.bf16.msra.mxu0 %v244_v8 }
  0x10   :  { %134 = vmatprep.subr.bf16.mxu0 %v245_v9 }
  0x13   :  { %135 = vmatpush1.bf16.msra.mxu0 %v247_v10 }
  0x14   :  { %136 = vmatprep.subr.bf16.mxu0 %v248_v11 }
  0x17   :  { %137 = vmatpush1.bf16.msra.mxu0 %v250_v12 }
  0x18   :  { %138 = vmatprep.subr.bf16.mxu0 %v251_v13 }
  0x1b   :  { %139 = vmatpush1.bf16.msra.mxu0 %v253_v14 }
  0x1c   :  { %140 = vmatprep.subr.bf16.mxu0 %v254_v15 }
  0x1f   :  { %141 = vmatpush1.bf16.msra.mxu0 %v256_v16 }
  0x22   :  { %159 = vmatmul.mubr.bf16.vlgmr.msra.gmra.mrb[0].mxu0 %v29_v17 }
  0xf5   :  { %v160_v27 = vpop.f32.mrb[0].mxu0 }
  0xf6   :  { %v188_v29 = vmul.f32 %v181_v24, %v160_v27  ;;  %v162_v30 = vpop.f32.mrb[1].mxu0 }
  0xf7   :  { %v189_v32 = vmul.f32 %v185_v25, %v162_v30  ;;  %v164_v33 = vpop.f32.mrb[2].mxu0 }
  0xf8   :  { %v202_v34 = vadd.f32 %v195_v26, %v188_v29  ;;  %v165_v36 = vpop.f32.mrb[3].mxu0 }
  0xf9   :  { %v203_v37 = vadd.f32 %v199_v28, %v189_v32 }
  0xfa   :  { %v206_v38 = vadd.f32 %v204_v31, %v202_v34 }
  0xfb   :  { %v207_v39 = vadd.f32 %v205_v35, %v203_v37 }
  0xfc   :  { %v208_v40 = vmax.f32 %v206_v38, 0.0 }
  0xfd   :  { %v209_v41 = vmax.f32 %v207_v39, 0.0 }
  0xfe   :  { %210 = vst [vmem:[%s362_s5] sm:$0xff] %v208_v40 }
  0xff   :  { %211 = vst [vmem:[%s362_s5 + $0x8] sm:$0xff] %v209_v41 }

// kernel: _lambda_.45
= control target key start
LH: loop header
LB: loop body
LE: loop exit
PB: predicated region body
PF: predicated region fallthrough
CT: control target
= control target key end

     0   :  { %v277_v35 = vlaneseq  ;;  %s529_s1 = inlined_call_operand.vmem [shape: bf16[256,256], index: 1, kind: input, shape index: {}]   ;;  %s530_s0 = inlined_call_operand.vmem [shape: bf16[8,256], index: 0, kind: input, shape index: {}]   ;;  %s531_s2 = inlined_call_operand.vmem [shape: f32[1,256], index: 2, kind: input, shape index: {}]   ;;  %s532_s3 = inlined_call_operand.vmem [shape: f32[1,256], index: 3, kind: input, shape index: {}]   ;;  %s533_s4 = inlined_call_operand.vmem [shape: f32[8,256], index: 4, kind: output, shape index: {}]  }
   0x1   :  { %v343_v0 = vld [vmem:[%s529_s1 + $0x4] ss:$8 sps:$4 sm:$0xff]   ;;  %v345_v1 = vld [vmem:[%s529_s1] ss:$8 sps:$4 sm:$0xff]   ;;  %v346_v2 = vld [vmem:[%s529_s1 + $0x14] ss:$8 sps:$4 sm:$0xff]  }
   0x2   :  { %225 = vmatprep.subr.bf16.mxu0 %v343_v0  ;;  %v348_v3 = vld [vmem:[%s529_s1 + $0x10] ss:$8 sps:$4 sm:$0xff]   ;;  %v349_v4 = vld [vmem:[%s529_s1 + $0x24] ss:$8 sps:$4 sm:$0xff]   ;;  %v351_v5 = vld [vmem:[%s529_s1 + $0x20] ss:$8 sps:$4 sm:$0xff]  }
   0x3   :  { %226 = vmatpush1.bf16.msra.mxu0 %v345_v1  ;;  %v352_v6 = vld [vmem:[%s529_s1 + $0x34] ss:$8 sps:$4 sm:$0xff]   ;;  %v354_v7 = vld [vmem:[%s529_s1 + $0x30] ss:$8 sps:$4 sm:$0xff]   ;;  %v355_v8 = vld [vmem:[%s529_s1 + $0x44] ss:$8 sps:$4 sm:$0xff]  }
   0x4   :  { %227 = vmatprep.subr.bf16.mxu0 %v346_v2  ;;  %v357_v9 = vld [vmem:[%s529_s1 + $0x40] ss:$8 sps:$4 sm:$0xff]   ;;  %v358_v10 = vld [vmem:[%s529_s1 + $0x54] ss:$8 sps:$4 sm:$0xff]   ;;  %v360_v11 = vld [vmem:[%s529_s1 + $0x50] ss:$8 sps:$4 sm:$0xff]  }
   0x5   :  { %v361_v12 = vld [vmem:[%s529_s1 + $0x64] ss:$8 sps:$4 sm:$0xff]   ;;  %v363_v15 = vld [vmem:[%s529_s1 + $0x60] ss:$8 sps:$4 sm:$0xff]   ;;  %v364_v16 = vld [vmem:[%s529_s1 + $0x74] ss:$8 sps:$4 sm:$0xff]  }
   0x6   :  { %v25_v13 = vld [vmem:[%s530_s0] sm:$0xff]  ;;  %v366_v17 = vld [vmem:[%s529_s1 + $0x70] ss:$8 sps:$4 sm:$0xff]   ;;  %v370_v20 = vld [vmem:[%s529_s1 + $0x94] ss:$8 sps:$4 sm:$0xff]   ;;  %v278_v36 = vshrl.u32 %v277_v35, 7 }
   0x7   :  { %228 = vmatpush1.bf16.msra.mxu0 %v348_v3  ;;  %v310_v14 = vcombine.high %v25_v13, %v25_v13  ;;  %v367_v18 = vld [vmem:[%s529_s1 + $0x84] ss:$8 sps:$4 sm:$0xff]   ;;  %v369_v19 = vld [vmem:[%s529_s1 + $0x80] ss:$8 sps:$4 sm:$0xff]   ;;  %v372_v21 = vld [vmem:[%s529_s1 + $0x90] ss:$8 sps:$4 sm:$0xff]   ;;  %v309_v34 = vcombine.low %v25_v13, %v25_v13 }
   0x8   :  { %229 = vmatprep.subr.bf16.mxu0 %v349_v4  ;;  %v373_v22 = vld [vmem:[%s529_s1 + $0xa4] ss:$8 sps:$4 sm:$0xff]   ;;  %v375_v23 = vld [vmem:[%s529_s1 + $0xa0] ss:$8 sps:$4 sm:$0xff]   ;;  %v376_v24 = vld [vmem:[%s529_s1 + $0xb4] ss:$8 sps:$4 sm:$0xff]  }
   0x9   :  { %257 = vmatprep.mubr.bf16.mxu0 %v310_v14  ;;  %v378_v25 = vld [vmem:[%s529_s1 + $0xb0] ss:$8 sps:$4 sm:$0xff]   ;;  %v379_v26 = vld [vmem:[%s529_s1 + $0xc4] ss:$8 sps:$4 sm:$0xff]   ;;  %v381_v27 = vld [vmem:[%s529_s1 + $0xc0] ss:$8 sps:$4 sm:$0xff]  }
   0xa   :  { %v382_v28 = vld [vmem:[%s529_s1 + $0xd4] ss:$8 sps:$4 sm:$0xff]   ;;  %v384_v29 = vld [vmem:[%s529_s1 + $0xd0] ss:$8 sps:$4 sm:$0xff]   ;;  %v385_v30 = vld [vmem:[%s529_s1 + $0xe4] ss:$8 sps:$4 sm:$0xff]  }
   0xb   :  { %230 = vmatpush1.bf16.msra.mxu0 %v351_v5  ;;  %v387_v31 = vld [vmem:[%s529_s1 + $0xe0] ss:$8 sps:$4 sm:$0xff]   ;;  %v388_v32 = vld [vmem:[%s529_s1 + $0xf4] ss:$8 sps:$4 sm:$0xff]   ;;  %v390_v33 = vld [vmem:[%s529_s1 + $0xf0] ss:$8 sps:$4 sm:$0xff]  }
   0xc   :  { %231 = vmatprep.subr.bf16.mxu0 %v352_v6  ;;  %v279_v37 = vsub.s32 0, %v278_v36  ;;  %v275_v38 = vld [vmem:[%s531_s2] sm:$0x3]  ;;  %v283_v39 = vsub.s32 1, %v278_v36 }
   0xd   :  { %v289_v40 = vld [vmem:[%s532_s3] sm:$0x3] }
   0xe   :  { %v280_v41 = vrot.slane %v275_v38, %v279_v37  ;;  %v284_v42 = vrot.slane %v275_v38, %v283_v39  ;;  %v294_v43 = vrot.slane %v289_v40, %v279_v37  ;;  %v298_v45 = vrot.slane %v289_v40, %v283_v39 }
   0xf   :  { %232 = vmatpush1.bf16.msra.mxu0 %v354_v7 }
  0x10   :  { %233 = vmatprep.subr.bf16.mxu0 %v355_v8 }
  0x13   :  { %234 = vmatpush1.bf16.msra.mxu0 %v357_v9 }
  0x14   :  { %235 = vmatprep.subr.bf16.mxu0 %v358_v10 }
  0x17   :  { %236 = vmatpush1.bf16.msra.mxu0 %v360_v11 }
  0x18   :  { %237 = vmatprep.subr.bf16.mxu0 %v361_v12 }
  0x1b   :  { %238 = vmatpush1.bf16.msra.mxu0 %v363_v15 }
  0x1c   :  { %239 = vmatprep.subr.bf16.mxu0 %v364_v16 }
  0x1f   :  { %240 = vmatpush1.bf16.msra.mxu0 %v366_v17 }
  0x20   :  { %241 = vmatprep.subr.bf16.mxu0 %v367_v18 }
  0x23   :  { %242 = vmatpush1.bf16.msra.mxu0 %v369_v19 }
  0x24   :  { %243 = vmatprep.subr.bf16.mxu0 %v370_v20 }
  0x27   :  { %244 = vmatpush1.bf16.msra.mxu0 %v372_v21 }
  0x28   :  { %245 = vmatprep.subr.bf16.mxu0 %v373_v22 }
  0x2b   :  { %246 = vmatpush1.bf16.msra.mxu0 %v375_v23 }
  0x2c   :  { %247 = vmatprep.subr.bf16.mxu0 %v376_v24 }
  0x2f   :  { %248 = vmatpush1.bf16.msra.mxu0 %v378_v25 }
  0x30   :  { %249 = vmatprep.subr.bf16.mxu0 %v379_v26 }
  0x33   :  { %250 = vmatpush1.bf16.msra.mxu0 %v381_v27 }
  0x34   :  { %251 = vmatprep.subr.bf16.mxu0 %v382_v28 }
  0x37   :  { %252 = vmatpush1.bf16.msra.mxu0 %v384_v29 }
  0x38   :  { %253 = vmatprep.subr.bf16.mxu0 %v385_v30 }
  0x3b   :  { %254 = vmatpush1.bf16.msra.mxu0 %v387_v31 }
  0x3c   :  { %255 = vmatprep.subr.bf16.mxu0 %v388_v32 }
  0x3f   :  { %256 = vmatpush1.bf16.msra.mxu0 %v390_v33 }
  0x42   :  { %258 = vmatmul.mubr.bf16.vlgmr.msra.gmra.mrb[0].mxu0 %v309_v34 }
 0x115   :  { %v259_v44 = vpop.f32.mrb[0].mxu0 }
 0x116   :  { %v287_v46 = vmul.f32 %v280_v41, %v259_v44  ;;  %v261_v47 = vpop.f32.mrb[1].mxu0 }
 0x117   :  { %v288_v48 = vmul.f32 %v284_v42, %v261_v47  ;;  %v263_v49 = vpop.f32.mrb[2].mxu0 }
 0x118   :  { %v301_v50 = vadd.f32 %v294_v43, %v287_v46  ;;  %v264_v51 = vpop.f32.mrb[3].mxu0 }
 0x119   :  { %v302_v52 = vadd.f32 %v298_v45, %v288_v48 }
 0x11a   :  { %303 = vst [vmem:[%s533_s4] sm:$0xff] %v301_v50 }
 0x11b   :  { %304 = vst [vmem:[%s533_s4 + $0x8] sm:$0xff] %v302_v52 }

// kernel: _lambda_.48
= control target key start
LH: loop header
LB: loop body
LE: loop exit
PB: predicated region body
PF: predicated region fallthrough
CT: control target
= control target key end

     0   :  { %s372_s1 = inlined_call_operand.vmem [shape: bf16[256,128], index: 1, kind: input, shape index: {}]   ;;  %s373_s0 = inlined_call_operand.vmem [shape: bf16[8,256], index: 0, kind: input, shape index: {}]   ;;  %s374_s2 = inlined_call_operand.vmem [shape: f32[1,128], index: 2, kind: input, shape index: {}]   ;;  %s375_s3 = inlined_call_operand.vmem [shape: f32[1,128], index: 3, kind: input, shape index: {}]   ;;  %s376_s4 = inlined_call_operand.vmem [shape: f32[8,128], index: 4, kind: output, shape index: {}]  }
   0x1   :  { %v269_v0 = vld [vmem:[%s372_s1 + $0x40] sm:$0xff]   ;;  %v271_v2 = vld [vmem:[%s372_s1 + $0x48] sm:$0xff]   ;;  %v273_v4 = vld [vmem:[%s372_s1 + $0x50] sm:$0xff]  }
   0x2   :  { %v270_v1 = vld [vmem:[%s372_s1] sm:$0xff]   ;;  %247 = vmatprep.subr.bf16.mxu0 %v269_v0  ;;  %v272_v3 = vld [vmem:[%s372_s1 + $0x8] sm:$0xff]   ;;  %v274_v5 = vld [vmem:[%s372_s1 + $0x10] sm:$0xff]  }
   0x3   :  { %248 = vmatpush3.bf16.msra.mxu0 %v270_v1  ;;  %v275_v6 = vld [vmem:[%s372_s1 + $0x58] sm:$0xff]   ;;  %v277_v8 = vld [vmem:[%s372_s1 + $0x60] sm:$0xff]   ;;  %v279_v10 = vld [vmem:[%s372_s1 + $0x68] sm:$0xff]  }
   0x4   :  { %249 = vmatprep.subr.bf16.mxu0 %v271_v2  ;;  %v276_v7 = vld [vmem:[%s372_s1 + $0x18] sm:$0xff]   ;;  %v278_v9 = vld [vmem:[%s372_s1 + $0x20] sm:$0xff]   ;;  %v280_v13 = vld [vmem:[%s372_s1 + $0x28] sm:$0xff]  }
   0x5   :  { %v24_v11 = vld [vmem:[%s373_s0] sm:$0xff]  ;;  %v281_v14 = vld [vmem:[%s372_s1 + $0x70] sm:$0xff]   ;;  %v283_v16 = vld [vmem:[%s372_s1 + $0x78] sm:$0xff]  }
   0x6   :  { %v228_v12 = vcombine.high %v24_v11, %v24_v11  ;;  %v282_v15 = vld [vmem:[%s372_s1 + $0x30] sm:$0xff]   ;;  %v284_v17 = vld [vmem:[%s372_s1 + $0x38] sm:$0xff]   ;;  %v227_v18 = vcombine.low %v24_v11, %v24_v11  ;;  %v245_v21 = vld [vmem:[%s374_s2] ss:$0 sm:$0xff] }
   0x7   :  { %250 = vmatpush3.bf16.msra.mxu0 %v272_v3  ;;  %v246_v24 = vld [vmem:[%s375_s3] ss:$0 sm:$0xff] }
   0x8   :  { %251 = vmatprep.subr.bf16.mxu0 %v273_v4  ;;  %192 = vmatprep.mubr.bf16.mxu0 %v228_v12 }
   0xb   :  { %252 = vmatpush3.bf16.msra.mxu0 %v274_v5 }
   0xc   :  { %253 = vmatprep.subr.bf16.mxu0 %v275_v6 }
   0xf   :  { %254 = vmatpush3.bf16.msra.mxu0 %v276_v7 }
  0x10   :  { %255 = vmatprep.subr.bf16.mxu0 %v277_v8 }
  0x13   :  { %256 = vmatpush3.bf16.msra.mxu0 %v278_v9 }
  0x14   :  { %257 = vmatprep.subr.bf16.mxu0 %v279_v10 }
  0x17   :  { %258 = vmatpush3.bf16.msra.mxu0 %v280_v13 }
  0x18   :  { %259 = vmatprep.subr.bf16.mxu0 %v281_v14 }
  0x1b   :  { %260 = vmatpush3.bf16.msra.mxu0 %v282_v15 }
  0x1c   :  { %261 = vmatprep.subr.bf16.mxu0 %v283_v16 }
  0x1f   :  { %262 = vmatpush3.bf16.msra.mxu0 %v284_v17 }
  0x22   :  { %193 = vmatmul.mubr.bf16.vlgmr.msra.gmra.mrb[0].mxu0 %v227_v18 }
  0xf5   :  { %v263_v19 = vpop.f32.mrb[0].mxu0 }
  0xf6   :  { %v264_v20 = vpop.f32.mrb[1].mxu0 }
  0xf7   :  { %v265_v22 = vadd.f32 %v264_v20, %v263_v19  ;;  %v266_v23 = vpop.f32.mrb[2].mxu0 }
  0xf8   :  { %v267_v25 = vpop.f32.mrb[3].mxu0 }
  0xf9   :  { %v213_v26 = vmul.f32 %v265_v22, %v245_v21 }
  0xfb   :  { %v221_v27 = vadd.f32 %v246_v24, %v213_v26 }
  0xfd   :  { %222 = vst [vmem:[%s376_s4] sm:$0xff] %v221_v27 }

// kernel: _lambda_.47
= control target key start
LH: loop header
LB: loop body
LE: loop exit
PB: predicated region body
PF: predicated region fallthrough
CT: control target
= control target key end

     0   :  { %v2769_v0 = vmov 0.0|0.0   ;;  %vm2770_vm0 = vmmov 0   ;;  %v2771_v6 = vmov 0.0   ;;  %vm857_vm2 = vcmask 1040384   ;;  %s3859_s1 = inlined_call_operand.vmem [shape: f32[8,128,128], index: 1, kind: input, shape index: {}]   ;;  %s3860_s0 = inlined_call_operand.vmem [shape: f32[8,1,128], index: 0, kind: input, shape index: {}]   ;;  %s3861_s2 = inlined_call_operand.vmem [shape: f32[8,128,128], index: 2, kind: input, shape index: {}]   ;;  %s3862_s3 = inlined_call_operand.vmem [shape: f32[8,1,128], index: 3, kind: output, shape index: {}]  }
   0x1   :  { %2350 = vmatprep.subr.bf16.mxu0 %v2769_v0  ;;  %2374 = vmatprep.subr.bf16.mxu1 %v2769_v0  ;;  %v30_v1 = vld [vmem:[%s3859_s1] sm:$0xff]  ;;  %v31_v2 = vld [vmem:[%s3859_s1 + $0x8] sm:$0xff]  ;;  %v32_v8 = vld [vmem:[%s3859_s1 + $0x10] sm:$0xff] }
   0x2   :  { %v46_v3 = vld [vmem:[%s3859_s1 + $0x80] sm:$0xff]  ;;  %v2351_v4 = vpack.c.bf16 %v31_v2, %v30_v1  ;;  %v47_v5 = vld [vmem:[%s3859_s1 + $0x88] sm:$0xff]  ;;  %1822 = vmatprep.mubr.msk.f32.mxu0 %vm2770_vm0, %v2771_v6  ;;  %1857 = vmatprep.mubr.msk.f32.mxu1 %vm2770_vm0, %v2771_v6  ;;  %v33_v9 = vld [vmem:[%s3859_s1 + $0x18] sm:$0xff] }
   0x3   :  { %v2375_v7 = vpack.c.bf16 %v47_v5, %v46_v3  ;;  %v48_v10 = vld [vmem:[%s3859_s1 + $0x90] sm:$0xff]  ;;  %v49_v11 = vld [vmem:[%s3859_s1 + $0x98] sm:$0xff]  ;;  %v2354_v12 = vpack.c.bf16 %v33_v9, %v32_v8  ;;  %v34_v14 = vld [vmem:[%s3859_s1 + $0x20] sm:$0xff] }
   0x4   :  { %2352 = vmatpush3.bf16.xpose.msra.mxu0 %v2351_v4  ;;  %v2378_v13 = vpack.c.bf16 %v49_v11, %v48_v10  ;;  %v35_v15 = vld [vmem:[%s3859_s1 + $0x28] sm:$0xff]  ;;  %v50_v16 = vld [vmem:[%s3859_s1 + $0xa0] sm:$0xff]  ;;  %v36_v20 = vld [vmem:[%s3859_s1 + $0x30] sm:$0xff] }
   0x5   :  { %2376 = vmatpush3.bf16.xpose.msra.mxu1 %v2375_v7  ;;  %2353 = vmatprep.subr.bf16.mxu0 %v2769_v0  ;;  %v51_v17 = vld [vmem:[%s3859_s1 + $0xa8] sm:$0xff]  ;;  %v2357_v18 = vpack.c.bf16 %v35_v15, %v34_v14  ;;  %v37_v21 = vld [vmem:[%s3859_s1 + $0x38] sm:$0xff]  ;;  %v52_v22 = vld [vmem:[%s3859_s1 + $0xb0] sm:$0xff] }
   0x6   :  { %2377 = vmatprep.subr.bf16.mxu1 %v2769_v0  ;;  %v2381_v19 = vpack.c.bf16 %v51_v17, %v50_v16  ;;  %v53_v23 = vld [vmem:[%s3859_s1 + $0xb8] sm:$0xff]  ;;  %v2360_v24 = vpack.c.bf16 %v37_v21, %v36_v20  ;;  %v38_v26 = vld [vmem:[%s3859_s1 + $0x40] sm:$0xff]  ;;  %v39_v27 = vld [vmem:[%s3859_s1 + $0x48] sm:$0xff] }
   0x7   :  { %v2384_v25 = vpack.c.bf16 %v53_v23, %v52_v22  ;;  %v54_v28 = vld [vmem:[%s3859_s1 + $0xc0] sm:$0xff]  ;;  %v55_v29 = vld [vmem:[%s3859_s1 + $0xc8] sm:$0xff]  ;;  %v2363_v30 = vpack.c.bf16 %v39_v27, %v38_v26  ;;  %v40_v32 = vld [vmem:[%s3859_s1 + $0x50] sm:$0xff] }
   0x8   :  { %v2387_v31 = vpack.c.bf16 %v55_v29, %v54_v28  ;;  %v41_v33 = vld [vmem:[%s3859_s1 + $0x58] sm:$0xff]  ;;  %v56_v34 = vld [vmem:[%s3859_s1 + $0xd0] sm:$0xff]  ;;  %v42_v38 = vld [vmem:[%s3859_s1 + $0x60] sm:$0xff] }
   0x9   :  { %v57_v35 = vld [vmem:[%s3859_s1 + $0xd8] sm:$0xff]  ;;  %v2366_v36 = vpack.c.bf16 %v41_v33, %v40_v32  ;;  %v43_v39 = vld [vmem:[%s3859_s1 + $0x68] sm:$0xff]  ;;  %v58_v40 = vld [vmem:[%s3859_s1 + $0xe0] sm:$0xff] }
   0xa   :  { %v2390_v37 = vpack.c.bf16 %v57_v35, %v56_v34  ;;  %v59_v41 = vld [vmem:[%s3859_s1 + $0xe8] sm:$0xff]  ;;  %v2369_v42 = vpack.c.bf16 %v43_v39, %v42_v38  ;;  %v44_v44 = vld [vmem:[%s3859_s1 + $0x70] sm:$0xff]  ;;  %v45_v45 = vld [vmem:[%s3859_s1 + $0x78] sm:$0xff] }
   0xb   :  { %v2393_v43 = vpack.c.bf16 %v59_v41, %v58_v40  ;;  %v60_v46 = vld [vmem:[%s3859_s1 + $0xf0] sm:$0xff]  ;;  %v61_v47 = vld [vmem:[%s3859_s1 + $0xf8] sm:$0xff]  ;;  %v2372_v48 = vpack.c.bf16 %v45_v45, %v44_v44  ;;  %v14_v50 = vld [vmem:[%s3860_s0] sm:$0x1] }
   0xc   :  { %2355 = vmatpush3.bf16.xpose.msra.mxu0 %v2354_v12  ;;  %v2396_v49 = vpack.c.bf16 %v61_v47, %v60_v46  ;;  %v15_v51 = vld [vmem:[%s3860_s0 + $0x1] sm:$0x1]  ;;  %v63_v53 = vld [vmem:[%s3859_s1 + $0x108] sm:$0xff]  ;;  %v22_v56 = vmul.f32 0.125, %v14_v50  ;;  %v64_v60 = vld [vmem:[%s3859_s1 + $0x110] sm:$0xff] }
   0xd   :  { %2379 = vmatpush3.bf16.xpose.msra.mxu1 %v2378_v13  ;;  %2356 = vmatprep.subr.bf16.mxu0 %v2769_v0  ;;  %v62_v52 = vld [vmem:[%s3859_s1 + $0x100] sm:$0xff]  ;;  %v79_v55 = vld [vmem:[%s3859_s1 + $0x188] sm:$0xff]  ;;  %v23_v57 = vmul.f32 0.125, %v15_v51  ;;  %v65_v61 = vld [vmem:[%s3859_s1 + $0x118] sm:$0xff] }
   0xe   :  { %2380 = vmatprep.subr.bf16.mxu1 %v2769_v0  ;;  %v78_v54 = vld [vmem:[%s3859_s1 + $0x180] sm:$0xff]  ;;  %v2399_v58 = vpack.c.bf16 %v63_v53, %v62_v52  ;;  %v80_v62 = vld [vmem:[%s3859_s1 + $0x190] sm:$0xff]  ;;  %v81_v63 = vld [vmem:[%s3859_s1 + $0x198] sm:$0xff]  ;;  %v2402_v1 = vpack.c.bf16 %v65_v61, %v64_v60 }
   0xf   :  { %v2423_v59 = vpack.c.bf16 %v79_v55, %v78_v54  ;;  %v2426_v2 = vpack.c.bf16 %v81_v63, %v80_v62  ;;  %v66_v3 = vld [vmem:[%s3859_s1 + $0x120] sm:$0xff]  ;;  %v67_v4 = vld [vmem:[%s3859_s1 + $0x128] sm:$0xff]  ;;  %v68_v10 = vld [vmem:[%s3859_s1 + $0x130] sm:$0xff] }
  0x10   :  { %v82_v5 = vld [vmem:[%s3859_s1 + $0x1a0] sm:$0xff]  ;;  %v83_v7 = vld [vmem:[%s3859_s1 + $0x1a8] sm:$0xff]  ;;  %v2405_v8 = vpack.c.bf16 %v67_v4, %v66_v3  ;;  %v69_v11 = vld [vmem:[%s3859_s1 + $0x138] sm:$0xff] }
  0x11   :  { %v2429_v9 = vpack.c.bf16 %v83_v7, %v82_v5  ;;  %v84_v12 = vld [vmem:[%s3859_s1 + $0x1b0] sm:$0xff]  ;;  %v85_v13 = vld [vmem:[%s3859_s1 + $0x1b8] sm:$0xff]  ;;  %v2408_v14 = vpack.c.bf16 %v69_v11, %v68_v10  ;;  %v70_v16 = vld [vmem:[%s3859_s1 + $0x140] sm:$0xff] }
  0x12   :  { %v2432_v15 = vpack.c.bf16 %v85_v13, %v84_v12  ;;  %v71_v17 = vld [vmem:[%s3859_s1 + $0x148] sm:$0xff]  ;;  %v72_v22 = vld [vmem:[%s3859_s1 + $0x150] sm:$0xff]  ;;  %v73_v23 = vld [vmem:[%s3859_s1 + $0x158] sm:$0xff] }
  0x13   :  { %v2411_v20 = vpack.c.bf16 %v71_v17, %v70_v16  ;;  %v2414_v26 = vpack.c.bf16 %v73_v23, %v72_v22  ;;  %v74_v28 = vld [vmem:[%s3859_s1 + $0x160] sm:$0xff]  ;;  %v75_v29 = vld [vmem:[%s3859_s1 + $0x168] sm:$0xff]  ;;  %v76_v34 = vld [vmem:[%s3859_s1 + $0x170] sm:$0xff] }
  0x14   :  { %2358 = vmatpush3.bf16.xpose.msra.mxu0 %v2357_v18  ;;  %v86_v18 = vld [vmem:[%s3859_s1 + $0x1c0] sm:$0xff]  ;;  %v2417_v32 = vpack.c.bf16 %v75_v29, %v74_v28  ;;  %v77_v35 = vld [vmem:[%s3859_s1 + $0x178] sm:$0xff]  ;;  %v111_v45 = vld [vmem:[%s3859_s1 + $0x288] sm:$0xff] }
  0x15   :  { %2382 = vmatpush3.bf16.xpose.msra.mxu1 %v2381_v19  ;;  %2359 = vmatprep.subr.bf16.mxu0 %v2769_v0  ;;  %v87_v19 = vld [vmem:[%s3859_s1 + $0x1c8] sm:$0xff]  ;;  %v2420_v38 = vpack.c.bf16 %v77_v35, %v76_v34  ;;  %v16_v40 = vld [vmem:[%s3860_s0 + $0x2] sm:$0x1]  ;;  %v17_v41 = vld [vmem:[%s3860_s0 + $0x3] sm:$0x1] }
  0x16   :  { %2383 = vmatprep.subr.bf16.mxu1 %v2769_v0  ;;  %v2435_v21 = vpack.c.bf16 %v87_v19, %v86_v18  ;;  %v110_v44 = vld [vmem:[%s3859_s1 + $0x280] sm:$0xff]  ;;  %v24_v46 = vmul.f32 0.125, %v16_v40  ;;  %v25_v47 = vmul.f32 0.125, %v17_v41  ;;  %v96_v50 = vld [vmem:[%s3859_s1 + $0x210] sm:$0xff]  ;;  %v97_v51 = vld [vmem:[%s3859_s1 + $0x218] sm:$0xff] }
  0x17   :  { %v112_v52 = vld [vmem:[%s3859_s1 + $0x290] sm:$0xff]  ;;  %v113_v53 = vld [vmem:[%s3859_s1 + $0x298] sm:$0xff]  ;;  %v2450_v54 = vpack.c.bf16 %v97_v51, %v96_v50  ;;  %v102_v5 = vld [vmem:[%s3859_s1 + $0x240] sm:$0xff] }
  0x18   :  { %v2474_v55 = vpack.c.bf16 %v113_v53, %v112_v52  ;;  %v100_v62 = vld [vmem:[%s3859_s1 + $0x230] sm:$0xff]  ;;  %v101_v63 = vld [vmem:[%s3859_s1 + $0x238] sm:$0xff]  ;;  %v103_v7 = vld [vmem:[%s3859_s1 + $0x248] sm:$0xff] }
  0x19   :  { %v2456_v3 = vpack.c.bf16 %v101_v63, %v100_v62  ;;  %v2459_v10 = vpack.c.bf16 %v103_v7, %v102_v5  ;;  %v104_v12 = vld [vmem:[%s3859_s1 + $0x250] sm:$0xff]  ;;  %v105_v13 = vld [vmem:[%s3859_s1 + $0x258] sm:$0xff]  ;;  %v106_v18 = vld [vmem:[%s3859_s1 + $0x260] sm:$0xff] }
  0x1a   :  { %v2462_v16 = vpack.c.bf16 %v105_v13, %v104_v12  ;;  %v107_v19 = vld [vmem:[%s3859_s1 + $0x268] sm:$0xff]  ;;  %v142_v34 = vld [vmem:[%s3859_s1 + $0x380] sm:$0xff]  ;;  %v128_v40 = vld [vmem:[%s3859_s1 + $0x310] sm:$0xff] }
  0x1b   :  { %v2465_v22 = vpack.c.bf16 %v107_v19, %v106_v18  ;;  %v143_v35 = vld [vmem:[%s3859_s1 + $0x388] sm:$0xff]  ;;  %v129_v41 = vld [vmem:[%s3859_s1 + $0x318] sm:$0xff]  ;;  %v132_v52 = vld [vmem:[%s3859_s1 + $0x330] sm:$0xff] }
  0x1c   :  { %2361 = vmatpush3.bf16.xpose.msra.mxu0 %v2360_v24  ;;  %v88_v24 = vld [vmem:[%s3859_s1 + $0x1d0] sm:$0xff]  ;;  %v133_v53 = vld [vmem:[%s3859_s1 + $0x338] sm:$0xff] }
  0x1d   :  { %2385 = vmatpush3.bf16.xpose.msra.mxu1 %v2384_v25  ;;  %2362 = vmatprep.subr.bf16.mxu0 %v2769_v0  ;;  %v89_v25 = vld [vmem:[%s3859_s1 + $0x1d8] sm:$0xff] }
  0x1e   :  { %2386 = vmatprep.subr.bf16.mxu1 %v2769_v0  ;;  %v2438_v27 = vpack.c.bf16 %v89_v25, %v88_v24  ;;  %v108_v24 = vld [vmem:[%s3859_s1 + $0x270] sm:$0xff]  ;;  %v109_v25 = vld [vmem:[%s3859_s1 + $0x278] sm:$0xff] }
  0x1f   :  { %v2468_v28 = vpack.c.bf16 %v109_v25, %v108_v24  ;;  %v846_v24 = vlaneseq }
  0x21   :  { %v3286_v25 = vand.u32 127, %v846_v24 }
  0x23   :  { %vm848_vm1 = vcmp.lt.s32.totalorder %v3286_v25, 2 }
  0x24   :  { %2364 = vmatpush3.bf16.xpose.msra.mxu0 %v2363_v30  ;;  %v90_v30 = vld [vmem:[%s3859_s1 + $0x1e0] sm:$0xff] }
  0x25   :  { %2388 = vmatpush3.bf16.xpose.msra.mxu1 %v2387_v31  ;;  %2365 = vmatprep.subr.bf16.mxu0 %v2769_v0  ;;  %v91_v31 = vld [vmem:[%s3859_s1 + $0x1e8] sm:$0xff] }
  0x26   :  { %2389 = vmatprep.subr.bf16.mxu1 %v2769_v0  ;;  %v2441_v33 = vpack.c.bf16 %v91_v31, %v90_v30  ;;  %v18_v30 = vld [vmem:[%s3860_s0 + $0x4] sm:$0x1]  ;;  %v19_v31 = vld [vmem:[%s3860_s0 + $0x5] sm:$0x1] }
  0x2c   :  { %2367 = vmatpush3.bf16.xpose.msra.mxu0 %v2366_v36  ;;  %v92_v36 = vld [vmem:[%s3859_s1 + $0x1f0] sm:$0xff] }
  0x2d   :  { %2391 = vmatpush3.bf16.xpose.msra.mxu1 %v2390_v37  ;;  %2368 = vmatprep.subr.bf16.mxu0 %v2769_v0  ;;  %v93_v37 = vld [vmem:[%s3859_s1 + $0x1f8] sm:$0xff] }
  0x2e   :  { %2392 = vmatprep.subr.bf16.mxu1 %v2769_v0  ;;  %v2444_v39 = vpack.c.bf16 %v93_v37, %v92_v36  ;;  %v26_v36 = vmul.f32 0.125, %v18_v30  ;;  %v27_v37 = vmul.f32 0.125, %v19_v31 }
  0x34   :  { %2370 = vmatpush3.bf16.xpose.msra.mxu0 %v2369_v42  ;;  %v94_v42 = vld [vmem:[%s3859_s1 + $0x200] sm:$0xff] }
  0x35   :  { %2394 = vmatpush3.bf16.xpose.msra.mxu1 %v2393_v43  ;;  %2371 = vmatprep.subr.bf16.mxu0 %v2769_v0  ;;  %v95_v43 = vld [vmem:[%s3859_s1 + $0x208] sm:$0xff] }
  0x36   :  { %2395 = vmatprep.subr.bf16.mxu1 %v2769_v0 }
  0x3c   :  { %2373 = vmatpush3.bf16.xpose.msra.mxu0 %v2372_v48  ;;  %v2447_v48 = vpack.c.bf16 %v95_v43, %v94_v42  ;;  %v144_v42 = vld [vmem:[%s3859_s1 + $0x390] sm:$0xff]  ;;  %v145_v43 = vld [vmem:[%s3859_s1 + $0x398] sm:$0xff] }
  0x3d   :  { %2397 = vmatpush3.bf16.xpose.msra.mxu1 %v2396_v49  ;;  %2398 = vmatprep.subr.bf16.mxu0 %v2769_v0  ;;  %v2471_v49 = vpack.c.bf16 %v111_v45, %v110_v44  ;;  %v2498_v44 = vpack.c.bf16 %v129_v41, %v128_v40  ;;  %v2522_v45 = vpack.c.bf16 %v145_v43, %v144_v42 }
  0x3e   :  { %2422 = vmatprep.subr.bf16.mxu1 %v2769_v0 }
  0x43   :  { %1823 = vmatmul.mubr.f32.vlgmr.msra.gmra.mrb[0].mxu0 %v22_v56  ;;  %v98_v56 = vld [vmem:[%s3859_s1 + $0x220] sm:$0xff] }
  0x44   :  { %1858 = vmatmul.mubr.f32.vlgmr.msra.gmra.mrb[0].mxu1 %v23_v57  ;;  %2400 = vmatpush3.bf16.xpose.msra.mxu0 %v2399_v58  ;;  %v99_v57 = vld [vmem:[%s3859_s1 + $0x228] sm:$0xff]  ;;  %v114_v58 = vld [vmem:[%s3859_s1 + $0x2a0] sm:$0xff] }
  0x45   :  { %2424 = vmatpush3.bf16.xpose.msra.mxu1 %v2423_v59  ;;  %2401 = vmatprep.subr.bf16.mxu0 %v2769_v0  ;;  %v115_v59 = vld [vmem:[%s3859_s1 + $0x2a8] sm:$0xff]  ;;  %v2453_v60 = vpack.c.bf16 %v99_v57, %v98_v56  ;;  %v2504_v56 = vpack.c.bf16 %v133_v53, %v132_v52 }
  0x46   :  { %2425 = vmatprep.subr.bf16.mxu1 %v2769_v0  ;;  %1892 = vmatprep.mubr.msk.f32.mxu0 %vm2770_vm0, %v2771_v6  ;;  %v2477_v61 = vpack.c.bf16 %v115_v59, %v114_v58  ;;  %v134_v58 = vld [vmem:[%s3859_s1 + $0x340] sm:$0xff]  ;;  %v135_v59 = vld [vmem:[%s3859_s1 + $0x348] sm:$0xff] }
  0x47   :  { %1927 = vmatprep.mubr.msk.f32.mxu1 %vm2770_vm0, %v2771_v6  ;;  %v2507_v62 = vpack.c.bf16 %v135_v59, %v134_v58  ;;  %v160_v58 = vld [vmem:[%s3861_s2 + $0x10] sm:$0xff] }
  0x4c   :  { %2403 = vmatpush3.bf16.xpose.msra.mxu0 %v2402_v1  ;;  %v116_v1 = vld [vmem:[%s3859_s1 + $0x2b0] sm:$0xff] }
  0x4d   :  { %2427 = vmatpush3.bf16.xpose.msra.mxu1 %v2426_v2  ;;  %2404 = vmatprep.subr.bf16.mxu0 %v2769_v0  ;;  %v117_v2 = vld [vmem:[%s3859_s1 + $0x2b8] sm:$0xff] }
  0x4e   :  { %2428 = vmatprep.subr.bf16.mxu1 %v2769_v0  ;;  %v2480_v4 = vpack.c.bf16 %v117_v2, %v116_v1  ;;  %v136_v1 = vld [vmem:[%s3859_s1 + $0x350] sm:$0xff]  ;;  %v137_v2 = vld [vmem:[%s3859_s1 + $0x358] sm:$0xff] }
  0x4f   :  { %v2510_v5 = vpack.c.bf16 %v137_v2, %v136_v1 }
  0x54   :  { %2406 = vmatpush3.bf16.xpose.msra.mxu0 %v2405_v8  ;;  %v118_v8 = vld [vmem:[%s3859_s1 + $0x2c0] sm:$0xff] }
  0x55   :  { %2430 = vmatpush3.bf16.xpose.msra.mxu1 %v2429_v9  ;;  %2407 = vmatprep.subr.bf16.mxu0 %v2769_v0  ;;  %v119_v9 = vld [vmem:[%s3859_s1 + $0x2c8] sm:$0xff] }
  0x56   :  { %2431 = vmatprep.subr.bf16.mxu1 %v2769_v0  ;;  %v2483_v11 = vpack.c.bf16 %v119_v9, %v118_v8  ;;  %v138_v8 = vld [vmem:[%s3859_s1 + $0x360] sm:$0xff]  ;;  %v139_v9 = vld [vmem:[%s3859_s1 + $0x368] sm:$0xff] }
  0x57   :  { %v2513_v12 = vpack.c.bf16 %v139_v9, %v138_v8 }
  0x5c   :  { %2409 = vmatpush3.bf16.xpose.msra.mxu0 %v2408_v14  ;;  %v120_v14 = vld [vmem:[%s3859_s1 + $0x2d0] sm:$0xff] }
  0x5d   :  { %2433 = vmatpush3.bf16.xpose.msra.mxu1 %v2432_v15  ;;  %2410 = vmatprep.subr.bf16.mxu0 %v2769_v0  ;;  %v121_v15 = vld [vmem:[%s3859_s1 + $0x2d8] sm:$0xff] }
  0x5e   :  { %2434 = vmatprep.subr.bf16.mxu1 %v2769_v0  ;;  %v2486_v17 = vpack.c.bf16 %v121_v15, %v120_v14  ;;  %v140_v14 = vld [vmem:[%s3859_s1 + $0x370] sm:$0xff]  ;;  %v141_v15 = vld [vmem:[%s3859_s1 + $0x378] sm:$0xff] }
  0x5f   :  { %v2516_v18 = vpack.c.bf16 %v141_v15, %v140_v14  ;;  %v178_v15 = vld [vmem:[%s3861_s2 + $0xa0] sm:$0xff] }
  0x64   :  { %2412 = vmatpush3.bf16.xpose.msra.mxu0 %v2411_v20  ;;  %v122_v20 = vld [vmem:[%s3859_s1 + $0x2e0] sm:$0xff] }
  0x65   :  { %2436 = vmatpush3.bf16.xpose.msra.mxu1 %v2435_v21  ;;  %2413 = vmatprep.subr.bf16.mxu0 %v2769_v0  ;;  %v123_v21 = vld [vmem:[%s3859_s1 + $0x2e8] sm:$0xff] }
  0x66   :  { %2437 = vmatprep.subr.bf16.mxu1 %v2769_v0  ;;  %v2489_v23 = vpack.c.bf16 %v123_v21, %v122_v20  ;;  %v20_v20 = vld [vmem:[%s3860_s0 + $0x6] sm:$0x1]  ;;  %v21_v21 = vld [vmem:[%s3860_s0 + $0x7] sm:$0x1] }
  0x6c   :  { %2415 = vmatpush3.bf16.xpose.msra.mxu0 %v2414_v26  ;;  %v124_v26 = vld [vmem:[%s3859_s1 + $0x2f0] sm:$0xff] }
  0x6d   :  { %2439 = vmatpush3.bf16.xpose.msra.mxu1 %v2438_v27  ;;  %2416 = vmatprep.subr.bf16.mxu0 %v2769_v0  ;;  %v125_v27 = vld [vmem:[%s3859_s1 + $0x2f8] sm:$0xff] }
  0x6e   :  { %2440 = vmatprep.subr.bf16.mxu1 %v2769_v0  ;;  %v2492_v29 = vpack.c.bf16 %v125_v27, %v124_v26 }
  0x74   :  { %2418 = vmatpush3.bf16.xpose.msra.mxu0 %v2417_v32  ;;  %v126_v32 = vld [vmem:[%s3859_s1 + $0x300] sm:$0xff] }
  0x75   :  { %2442 = vmatpush3.bf16.xpose.msra.mxu1 %v2441_v33  ;;  %2419 = vmatprep.subr.bf16.mxu0 %v2769_v0  ;;  %v127_v33 = vld [vmem:[%s3859_s1 + $0x308] sm:$0xff] }
  0x76   :  { %2443 = vmatprep.subr.bf16.mxu1 %v2769_v0 }
  0x7c   :  { %2421 = vmatpush3.bf16.xpose.msra.mxu0 %v2420_v38  ;;  %v2495_v38 = vpack.c.bf16 %v127_v33, %v126_v32 }
  0x7d   :  { %2445 = vmatpush3.bf16.xpose.msra.mxu1 %v2444_v39  ;;  %2446 = vmatprep.subr.bf16.mxu0 %v2769_v0  ;;  %v2519_v39 = vpack.c.bf16 %v143_v35, %v142_v34 }
  0x7e   :  { %2470 = vmatprep.subr.bf16.mxu1 %v2769_v0 }
  0x83   :  { %1893 = vmatmul.mubr.f32.vlgmr.msra.gmra.mrb[2].mxu0 %v24_v46  ;;  %v130_v46 = vld [vmem:[%s3859_s1 + $0x320] sm:$0xff] }
  0x84   :  { %1928 = vmatmul.mubr.f32.vlgmr.msra.gmra.mrb[2].mxu1 %v25_v47  ;;  %2448 = vmatpush3.bf16.xpose.msra.mxu0 %v2447_v48  ;;  %v131_v47 = vld [vmem:[%s3859_s1 + $0x328] sm:$0xff]  ;;  %v146_v48 = vld [vmem:[%s3859_s1 + $0x3a0] sm:$0xff] }
  0x85   :  { %2472 = vmatpush3.bf16.xpose.msra.mxu1 %v2471_v49  ;;  %2449 = vmatprep.subr.bf16.mxu0 %v2769_v0  ;;  %v147_v49 = vld [vmem:[%s3859_s1 + $0x3a8] sm:$0xff]  ;;  %v2501_v50 = vpack.c.bf16 %v131_v47, %v130_v46 }
  0x86   :  { %2473 = vmatprep.subr.bf16.mxu1 %v2769_v0  ;;  %1962 = vmatprep.mubr.msk.f32.mxu0 %vm2770_vm0, %v2771_v6  ;;  %v2525_v51 = vpack.c.bf16 %v147_v49, %v146_v48 }
  0x87   :  { %1997 = vmatprep.mubr.msk.f32.mxu1 %vm2770_vm0, %v2771_v6 }
  0x8c   :  { %2451 = vmatpush3.bf16.xpose.msra.mxu0 %v2450_v54  ;;  %v148_v54 = vld [vmem:[%s3859_s1 + $0x3b0] sm:$0xff] }
  0x8d   :  { %2475 = vmatpush3.bf16.xpose.msra.mxu1 %v2474_v55  ;;  %2452 = vmatprep.subr.bf16.mxu0 %v2769_v0  ;;  %v149_v55 = vld [vmem:[%s3859_s1 + $0x3b8] sm:$0xff] }
  0x8e   :  { %2476 = vmatprep.subr.bf16.mxu1 %v2769_v0  ;;  %v2528_v57 = vpack.c.bf16 %v149_v55, %v148_v54 }
  0x94   :  { %2454 = vmatpush3.bf16.xpose.msra.mxu0 %v2453_v60  ;;  %v150_v60 = vld [vmem:[%s3859_s1 + $0x3c0] sm:$0xff] }
  0x95   :  { %2478 = vmatpush3.bf16.xpose.msra.mxu1 %v2477_v61  ;;  %2455 = vmatprep.subr.bf16.mxu0 %v2769_v0  ;;  %v151_v61 = vld [vmem:[%s3859_s1 + $0x3c8] sm:$0xff] }
  0x96   :  { %2479 = vmatprep.subr.bf16.mxu1 %v2769_v0  ;;  %v2531_v63 = vpack.c.bf16 %v151_v61, %v150_v60  ;;  %v161_v60 = vld [vmem:[%s3861_s2 + $0x18] sm:$0xff]  ;;  %v174_v61 = vld [vmem:[%s3861_s2 + $0x80] sm:$0xff] }
  0x97   :  { %v2546_v1 = vpack.c.bf16 %v161_v60, %v160_v58 }
  0x9c   :  { %2457 = vmatpush3.bf16.xpose.msra.mxu0 %v2456_v3  ;;  %v152_v3 = vld [vmem:[%s3859_s1 + $0x3d0] sm:$0xff] }
  0x9d   :  { %2481 = vmatpush3.bf16.xpose.msra.mxu1 %v2480_v4  ;;  %2458 = vmatprep.subr.bf16.mxu0 %v2769_v0  ;;  %v153_v4 = vld [vmem:[%s3859_s1 + $0x3d8] sm:$0xff] }
  0x9e   :  { %2482 = vmatprep.subr.bf16.mxu1 %v2769_v0  ;;  %v2534_v7 = vpack.c.bf16 %v153_v4, %v152_v3  ;;  %v162_v4 = vld [vmem:[%s3861_s2 + $0x20] sm:$0xff] }
  0xa4   :  { %2460 = vmatpush3.bf16.xpose.msra.mxu0 %v2459_v10  ;;  %v154_v10 = vld [vmem:[%s3859_s1 + $0x3e0] sm:$0xff] }
  0xa5   :  { %2484 = vmatpush3.bf16.xpose.msra.mxu1 %v2483_v11  ;;  %2461 = vmatprep.subr.bf16.mxu0 %v2769_v0  ;;  %v155_v11 = vld [vmem:[%s3859_s1 + $0x3e8] sm:$0xff] }
  0xa6   :  { %2485 = vmatprep.subr.bf16.mxu1 %v2769_v0  ;;  %v2537_v13 = vpack.c.bf16 %v155_v11, %v154_v10  ;;  %v177_v10 = vld [vmem:[%s3861_s2 + $0x98] sm:$0xff]  ;;  %v164_v11 = vld [vmem:[%s3861_s2 + $0x30] sm:$0xff] }
  0xac   :  { %2463 = vmatpush3.bf16.xpose.msra.mxu0 %v2462_v16  ;;  %v156_v16 = vld [vmem:[%s3859_s1 + $0x3f0] sm:$0xff] }
  0xad   :  { %2487 = vmatpush3.bf16.xpose.msra.mxu1 %v2486_v17  ;;  %2464 = vmatprep.subr.bf16.mxu0 %v2769_v0  ;;  %v157_v17 = vld [vmem:[%s3859_s1 + $0x3f8] sm:$0xff] }
  0xae   :  { %2488 = vmatprep.subr.bf16.mxu1 %v2769_v0  ;;  %v2540_v19 = vpack.c.bf16 %v157_v17, %v156_v16  ;;  %v179_v16 = vld [vmem:[%s3861_s2 + $0xa8] sm:$0xff] }
  0xb4   :  { %2466 = vmatpush3.bf16.xpose.msra.mxu0 %v2465_v22  ;;  %v28_v22 = vmul.f32 0.125, %v20_v20  ;;  %v167_v20 = vld [vmem:[%s3861_s2 + $0x48] sm:$0xff] }
  0xb5   :  { %2490 = vmatpush3.bf16.xpose.msra.mxu1 %v2489_v23  ;;  %2467 = vmatprep.subr.bf16.mxu0 %v2769_v0  ;;  %v29_v23 = vmul.f32 0.125, %v21_v21  ;;  %v180_v21 = vld [vmem:[%s3861_s2 + $0xb0] sm:$0xff] }
  0xb6   :  { %2491 = vmatprep.subr.bf16.mxu1 %v2769_v0 }
  0xbc   :  { %2469 = vmatpush3.bf16.xpose.msra.mxu0 %v2468_v28 }
  0xbd   :  { %2493 = vmatpush3.bf16.xpose.msra.mxu1 %v2492_v29  ;;  %2494 = vmatprep.subr.bf16.mxu0 %v2769_v0 }
  0xbe   :  { %2518 = vmatprep.subr.bf16.mxu1 %v2769_v0 }
  0xc3   :  { %1963 = vmatmul.mubr.f32.vlgmr.msra.gmra.mrb[4].mxu0 %v26_v36 }
  0xc4   :  { %1998 = vmatmul.mubr.f32.vlgmr.msra.gmra.mrb[4].mxu1 %v27_v37  ;;  %2496 = vmatpush3.bf16.xpose.msra.mxu0 %v2495_v38 }
  0xc5   :  { %2520 = vmatpush3.bf16.xpose.msra.mxu1 %v2519_v39  ;;  %2497 = vmatprep.subr.bf16.mxu0 %v2769_v0 }
  0xc6   :  { %2521 = vmatprep.subr.bf16.mxu1 %v2769_v0  ;;  %2032 = vmatprep.mubr.msk.f32.mxu0 %vm2770_vm0, %v2771_v6 }
  0xc7   :  { %2067 = vmatprep.mubr.msk.f32.mxu1 %vm2770_vm0, %v2771_v6 }
  0xcc   :  { %2499 = vmatpush3.bf16.xpose.msra.mxu0 %v2498_v44 }
  0xcd   :  { %2523 = vmatpush3.bf16.xpose.msra.mxu1 %v2522_v45  ;;  %2500 = vmatprep.subr.bf16.mxu0 %v2769_v0 }
  0xce   :  { %2524 = vmatprep.subr.bf16.mxu1 %v2769_v0 }
  0xd4   :  { %2502 = vmatpush3.bf16.xpose.msra.mxu0 %v2501_v50 }
  0xd5   :  { %2526 = vmatpush3.bf16.xpose.msra.mxu1 %v2525_v51  ;;  %2503 = vmatprep.subr.bf16.mxu0 %v2769_v0 }
  0xd6   :  { %2527 = vmatprep.subr.bf16.mxu1 %v2769_v0 }
  0xdc   :  { %2505 = vmatpush3.bf16.xpose.msra.mxu0 %v2504_v56  ;;  %v158_v56 = vld [vmem:[%s3861_s2] sm:$0xff] }
  0xdd   :  { %2529 = vmatpush3.bf16.xpose.msra.mxu1 %v2528_v57  ;;  %2506 = vmatprep.subr.bf16.mxu0 %v2769_v0  ;;  %v159_v57 = vld [vmem:[%s3861_s2 + $0x8] sm:$0xff] }
  0xde   :  { %2530 = vmatprep.subr.bf16.mxu1 %v2769_v0  ;;  %v2543_v59 = vpack.c.bf16 %v159_v57, %v158_v56 }
  0xe4   :  { %2508 = vmatpush3.bf16.xpose.msra.mxu0 %v2507_v62  ;;  %v175_v62 = vld [vmem:[%s3861_s2 + $0x88] sm:$0xff] }
  0xe5   :  { %2532 = vmatpush3.bf16.xpose.msra.mxu1 %v2531_v63  ;;  %2509 = vmatprep.subr.bf16.mxu0 %v2769_v0  ;;  %v2567_v63 = vpack.c.bf16 %v175_v62, %v174_v61 }
  0xe6   :  { %2533 = vmatprep.subr.bf16.mxu1 %v2769_v0 }
  0xec   :  { %2511 = vmatpush3.bf16.xpose.msra.mxu0 %v2510_v5  ;;  %v163_v5 = vld [vmem:[%s3861_s2 + $0x28] sm:$0xff] }
  0xed   :  { %2535 = vmatpush3.bf16.xpose.msra.mxu1 %v2534_v7  ;;  %2512 = vmatprep.subr.bf16.mxu0 %v2769_v0  ;;  %v176_v7 = vld [vmem:[%s3861_s2 + $0x90] sm:$0xff]  ;;  %v2549_v9 = vpack.c.bf16 %v163_v5, %v162_v4 }
  0xee   :  { %2536 = vmatprep.subr.bf16.mxu1 %v2769_v0  ;;  %v2570_v14 = vpack.c.bf16 %v177_v10, %v176_v7 }
  0xf4   :  { %2514 = vmatpush3.bf16.xpose.msra.mxu0 %v2513_v12  ;;  %v165_v12 = vld [vmem:[%s3861_s2 + $0x38] sm:$0xff] }
  0xf5   :  { %2538 = vmatpush3.bf16.xpose.msra.mxu1 %v2537_v13  ;;  %2515 = vmatprep.subr.bf16.mxu0 %v2769_v0  ;;  %v2552_v17 = vpack.c.bf16 %v165_v12, %v164_v11 }
  0xf6   :  { %2539 = vmatprep.subr.bf16.mxu1 %v2769_v0 }
  0xfc   :  { %2517 = vmatpush3.bf16.xpose.msra.mxu0 %v2516_v18  ;;  %v2573_v18 = vpack.c.bf16 %v179_v16, %v178_v15 }
  0xfd   :  { %2541 = vmatpush3.bf16.xpose.msra.mxu1 %v2540_v19  ;;  %2542 = vmatprep.subr.bf16.mxu0 %v2769_v0  ;;  %v166_v19 = vld [vmem:[%s3861_s2 + $0x40] sm:$0xff] }
  0xfe   :  { %2566 = vmatprep.subr.bf16.mxu1 %v2769_v0 }
 0x103   :  { %2033 = vmatmul.mubr.f32.vlgmr.msra.gmra.mrb[6].mxu0 %v28_v22  ;;  %v181_v22 = vld [vmem:[%s3861_s2 + $0xb8] sm:$0xff] }
 0x104   :  { %2068 = vmatmul.mubr.f32.vlgmr.msra.gmra.mrb[6].mxu1 %v29_v23  ;;  %2102 = vmatprep.mubr.msk.f32.mxu0 %vm2770_vm0, %v2771_v6  ;;  %v2555_v23 = vpack.c.bf16 %v167_v20, %v166_v19  ;;  %v2576_v24 = vpack.c.bf16 %v181_v22, %v180_v21  ;;  %v206_v20 = vld [vmem:[%s3861_s2 + $0x180] sm:$0xff]  ;;  %v207_v22 = vld [vmem:[%s3861_s2 + $0x188] sm:$0xff] }
 0x105   :  { %2137 = vmatprep.mubr.msk.f32.mxu1 %vm2770_vm0, %v2771_v6  ;;  %2544 = vmatpush3.bf16.msra.mxu0 %v2543_v59 }
 0x106   :  { %2545 = vmatprep.subr.bf16.mxu0 %v2769_v0  ;;  %2568 = vmatpush3.bf16.msra.mxu1 %v2567_v63 }
 0x107   :  { %2569 = vmatprep.subr.bf16.mxu1 %v2769_v0 }
 0x109   :  { %2547 = vmatpush3.bf16.msra.mxu0 %v2546_v1 }
 0x10a   :  { %2548 = vmatprep.subr.bf16.mxu0 %v2769_v0  ;;  %2571 = vmatpush3.bf16.msra.mxu1 %v2570_v14 }
 0x10b   :  { %2572 = vmatprep.subr.bf16.mxu1 %v2769_v0 }
 0x10d   :  { %2550 = vmatpush3.bf16.msra.mxu0 %v2549_v9 }
 0x10e   :  { %2551 = vmatprep.subr.bf16.mxu0 %v2769_v0  ;;  %2574 = vmatpush3.bf16.msra.mxu1 %v2573_v18 }
 0x10f   :  { %2575 = vmatprep.subr.bf16.mxu1 %v2769_v0 }
 0x111   :  { %2553 = vmatpush3.bf16.msra.mxu0 %v2552_v17  ;;  %v191_v17 = vld [vmem:[%s3861_s2 + $0x108] sm:$0xff] }
 0x112   :  { %2554 = vmatprep.subr.bf16.mxu0 %v2769_v0  ;;  %2577 = vmatpush3.bf16.msra.mxu1 %v2576_v24  ;;  %v193_v24 = vld [vmem:[%s3861_s2 + $0x118] sm:$0xff] }
 0x113   :  { %2578 = vmatprep.subr.bf16.mxu1 %v2769_v0 }
 0x115   :  { %2556 = vmatpush3.bf16.msra.mxu0 %v2555_v23  ;;  %v192_v23 = vld [vmem:[%s3861_s2 + $0x110] sm:$0xff] }
 0x116   :  { %v352_v26 = vpop.f32.mrb[0].mxu0  ;;  %2557 = vmatprep.subr.bf16.mxu0 %v2769_v0 }
 0x117   :  { %v849_v27 = vsel %vm848_vm1, %v352_v26, -inf  ;;  %v422_v28 = vpop.f32.mrb[0].mxu1  ;;  %v1824_v29 = vpop.f32.mrb[1].mxu0  ;;  %v168_v26 = vld [vmem:[%s3861_s2 + $0x50] sm:$0xff] }
 0x118   :  { %v1859_v30 = vpop.f32.mrb[1].mxu1  ;;  %v858_v31 = vsel %vm857_vm2, %v849_v27, -inf  ;;  %v850_v32 = vsel %vm848_vm1, %v422_v28, -inf  ;;  %v182_v28 = vld [vmem:[%s3861_s2 + $0xc0] sm:$0xff] }
 0x119   :  { %859 = vmax.xlane.f32.xlu0 %v858_v31  ;;  %v861_v33 = vsel %vm857_vm2, %v850_v32, -inf  ;;  %v183_v30 = vld [vmem:[%s3861_s2 + $0xc8] sm:$0xff] }
 0x11a   :  { %v2579_v31 = vpack.c.bf16 %v183_v30, %v182_v28  ;;  %v2594_v28 = vpack.c.bf16 %v193_v24, %v192_v23  ;;  %v195_v30 = vld [vmem:[%s3861_s2 + $0x128] sm:$0xff] }
 0x11b   :  { %v223_v23 = vld [vmem:[%s3861_s2 + $0x208] sm:$0xff] }
 0x11c   :  { %2580 = vmatpush3.bf16.msra.mxu1 %v2579_v31  ;;  %v208_v31 = vld [vmem:[%s3861_s2 + $0x190] sm:$0xff] }
 0x11d   :  { %862 = vmax.xlane.f32.xlu0 %v861_v33  ;;  %v171_v33 = vld [vmem:[%s3861_s2 + $0x68] sm:$0xff]  ;;  %2581 = vmatprep.subr.bf16.mxu1 %v2769_v0 }
 0x156   :  { %v492_v34 = vpop.f32.mrb[2].mxu0 }
 0x157   :  { %v3297_v35 = vsel %vm848_vm1, %v492_v34, -inf  ;;  %v562_v36 = vpop.f32.mrb[2].mxu1  ;;  %v1894_v37 = vpop.f32.mrb[3].mxu0  ;;  %v184_v34 = vld [vmem:[%s3861_s2 + $0xd0] sm:$0xff] }
 0x158   :  { %v1929_v38 = vpop.f32.mrb[3].mxu1  ;;  %v864_v39 = vsel %vm857_vm2, %v3297_v35, -inf  ;;  %v3303_v40 = vsel %vm848_vm1, %v562_v36, -inf  ;;  %v185_v37 = vld [vmem:[%s3861_s2 + $0xd8] sm:$0xff] }
 0x159   :  { %865 = vmax.xlane.f32.xlu1 %v864_v39  ;;  %v867_v41 = vsel %vm857_vm2, %v3303_v40, -inf  ;;  %v172_v38 = vld [vmem:[%s3861_s2 + $0x70] sm:$0xff]  ;;  %v173_v39 = vld [vmem:[%s3861_s2 + $0x78] sm:$0xff] }
 0x15d   :  { %868 = vmax.xlane.f32.xlu1 %v867_v41  ;;  %v2582_v41 = vpack.c.bf16 %v185_v37, %v184_v34  ;;  %v210_v37 = vld [vmem:[%s3861_s2 + $0x1a0] sm:$0xff] }
 0x15f   :  { %2583 = vmatpush3.bf16.msra.mxu1 %v2582_v41 }
 0x160   :  { %2584 = vmatprep.subr.bf16.mxu1 %v2769_v0 }
 0x196   :  { %v632_v42 = vpop.f32.mrb[4].mxu0 }
 0x197   :  { %v3309_v43 = vsel %vm848_vm1, %v632_v42, -inf  ;;  %v702_v44 = vpop.f32.mrb[4].mxu1  ;;  %v1964_v45 = vpop.f32.mrb[5].mxu0  ;;  %v186_v42 = vld [vmem:[%s3861_s2 + $0xe0] sm:$0xff] }
 0x198   :  { %v3313_v46 = vsel %vm848_vm1, %v702_v44, -inf  ;;  %v1999_v47 = vpop.f32.mrb[5].mxu1  ;;  %v870_v48 = vsel %vm857_vm2, %v3309_v43, -inf  ;;  %v187_v44 = vld [vmem:[%s3861_s2 + $0xe8] sm:$0xff]  ;;  %v2564_v45 = vpack.c.bf16 %v173_v39, %v172_v38 }
 0x199   :  { %v873_v49 = vsel %vm857_vm2, %v3313_v46, -inf  ;;  %871 = vmax.xlane.f32.xlu0 %v870_v48  ;;  %v2585_v47 = vpack.c.bf16 %v187_v44, %v186_v42  ;;  %v188_v48 = vld [vmem:[%s3861_s2 + $0xf0] sm:$0xff]  ;;  %v211_v38 = vld [vmem:[%s3861_s2 + $0x1a8] sm:$0xff]  ;;  %v198_v42 = vld [vmem:[%s3861_s2 + $0x140] sm:$0xff] }
 0x19a   :  { %874 = vmax.xlane.f32.xlu1 %v873_v49  ;;  %v189_v49 = vld [vmem:[%s3861_s2 + $0xf8] sm:$0xff]  ;;  %v2621_v41 = vpack.c.bf16 %v211_v38, %v210_v37  ;;  %v199_v44 = vld [vmem:[%s3861_s2 + $0x148] sm:$0xff] }
 0x19b   :  { %2586 = vmatpush3.bf16.msra.mxu1 %v2585_v47  ;;  %v213_v47 = vld [vmem:[%s3861_s2 + $0x1b8] sm:$0xff]  ;;  %v227_v37 = vld [vmem:[%s3861_s2 + $0x228] sm:$0xff] }
 0x19c   :  { %2587 = vmatprep.subr.bf16.mxu1 %v2769_v0 }
 0x1a6   :  { %v860_v50 = vpop.xlane.xlu0 %859 }
 0x1a7   :  { %v882_v51 = vsub.f32 %v849_v27, %v860_v50  ;;  %v169_v27 = vld [vmem:[%s3861_s2 + $0x58] sm:$0xff]  ;;  %v2588_v50 = vpack.c.bf16 %v189_v49, %v188_v48  ;;  %v2603_v48 = vpack.c.bf16 %v199_v44, %v198_v42  ;;  %v228_v42 = vld [vmem:[%s3861_s2 + $0x230] sm:$0xff] }
 0x1a8   :  { %v2558_v29 = vpack.c.bf16 %v169_v27, %v168_v26  ;;  %v2615_v27 = vpack.c.bf16 %v207_v22, %v206_v20  ;;  %v222_v22 = vld [vmem:[%s3861_s2 + $0x200] sm:$0xff]  ;;  %v229_v44 = vld [vmem:[%s3861_s2 + $0x238] sm:$0xff] }
 0x1a9   :  { %v890_v52 = vmul.f32 1.442695, %v882_v51  ;;  %2589 = vmatpush3.bf16.msra.mxu1 %v2588_v50  ;;  %v200_v50 = vld [vmem:[%s3861_s2 + $0x150] sm:$0xff] }
 0x1aa   :  { %v863_v53 = vpop.xlane.xlu0 %862  ;;  %2559 = vmatpush3.bf16.msra.mxu0 %v2558_v29  ;;  %2614 = vmatprep.subr.bf16.mxu1 %v2769_v0 }
 0x1ab   :  { %2737 = vpow2.f32 %v890_v52  ;;  %v883_v54 = vsub.f32 %v850_v32, %v863_v53  ;;  %2560 = vmatprep.subr.bf16.mxu0 %v2769_v0  ;;  %v170_v32 = vld [vmem:[%s3861_s2 + $0x60] sm:$0xff] }
 0x1ac   :  { %v2561_v36 = vpack.c.bf16 %v171_v33, %v170_v32  ;;  %v209_v32 = vld [vmem:[%s3861_s2 + $0x198] sm:$0xff] }
 0x1ad   :  { %v892_v55 = vmul.f32 1.442695, %v883_v54  ;;  %v2618_v34 = vpack.c.bf16 %v209_v32, %v208_v31 }
 0x1ae   :  { %2562 = vmatpush3.bf16.msra.mxu0 %v2561_v36  ;;  %v197_v36 = vld [vmem:[%s3861_s2 + $0x138] sm:$0xff] }
 0x1af   :  { %2739 = vpow2.f32 %v892_v55  ;;  %2563 = vmatprep.subr.bf16.mxu0 %v2769_v0 }
 0x1b2   :  { %2565 = vmatpush3.bf16.msra.mxu0 %v2564_v45  ;;  %v212_v45 = vld [vmem:[%s3861_s2 + $0x1b0] sm:$0xff] }
 0x1b3   :  { %2590 = vmatprep.subr.bf16.mxu0 %v2769_v0  ;;  %v2624_v49 = vpack.c.bf16 %v213_v47, %v212_v45  ;;  %v2648_v47 = vpack.c.bf16 %v229_v44, %v228_v42  ;;  %v262_v42 = vld [vmem:[%s3861_s2 + $0x340] sm:$0xff]  ;;  %v263_v44 = vld [vmem:[%s3861_s2 + $0x348] sm:$0xff] }
 0x1b5   :  { %v3339_v2 = vpop.eup %2737 }
 0x1b6   :  { %v906_v3 = vsel %vm857_vm2, %v3339_v2, 0.0 }
 0x1b7   :  { %907 = vadd.xlane.f32.xlu0 %v906_v3 }
 0x1b9   :  { %v3353_v8 = vpop.eup %2739 }
 0x1ba   :  { %v909_v13 = vsel %vm857_vm2, %v3353_v8, 0.0 }
 0x1bb   :  { %910 = vadd.xlane.f32.xlu1 %v909_v13 }
 0x1d6   :  { %v772_v51 = vpop.f32.mrb[6].mxu0 }
 0x1d7   :  { %v3441_v52 = vsel %vm848_vm1, %v772_v51, -inf  ;;  %v842_v53 = vpop.f32.mrb[6].mxu1  ;;  %v2034_v54 = vpop.f32.mrb[7].mxu0  ;;  %v201_v51 = vld [vmem:[%s3861_s2 + $0x158] sm:$0xff] }
 0x1d8   :  { %v3445_v55 = vsel %vm848_vm1, %v842_v53, -inf  ;;  %v2069_v56 = vpop.f32.mrb[7].mxu1  ;;  %v876_v57 = vsel %vm857_vm2, %v3441_v52, -inf  ;;  %v214_v53 = vld [vmem:[%s3861_s2 + $0x1c0] sm:$0xff]  ;;  %v215_v54 = vld [vmem:[%s3861_s2 + $0x1c8] sm:$0xff] }
 0x1d9   :  { %v879_v58 = vsel %vm857_vm2, %v3445_v55, -inf  ;;  %877 = vmax.xlane.f32.xlu0 %v876_v57  ;;  %v2606_v56 = vpack.c.bf16 %v201_v51, %v200_v50  ;;  %v2627_v57 = vpack.c.bf16 %v215_v54, %v214_v53  ;;  %v230_v50 = vld [vmem:[%s3861_s2 + $0x240] sm:$0xff]  ;;  %v231_v51 = vld [vmem:[%s3861_s2 + $0x248] sm:$0xff] }
 0x1da   :  { %880 = vmax.xlane.f32.xlu1 %v879_v58  ;;  %v202_v58 = vld [vmem:[%s3861_s2 + $0x160] sm:$0xff]  ;;  %v2651_v54 = vpack.c.bf16 %v231_v51, %v230_v50  ;;  %v264_v50 = vld [vmem:[%s3861_s2 + $0x350] sm:$0xff]  ;;  %v265_v51 = vld [vmem:[%s3861_s2 + $0x358] sm:$0xff] }
 0x1e6   :  { %v866_v59 = vpop.xlane.xlu1 %865 }
 0x1e7   :  { %v884_v60 = vsub.f32 %v3297_v35, %v866_v59  ;;  %v203_v59 = vld [vmem:[%s3861_s2 + $0x168] sm:$0xff] }
 0x1e9   :  { %v894_v61 = vmul.f32 1.442695, %v884_v60  ;;  %v216_v60 = vld [vmem:[%s3861_s2 + $0x1d0] sm:$0xff] }
 0x1ea   :  { %v869_v62 = vpop.xlane.xlu1 %868 }
 0x1eb   :  { %2741 = vpow2.f32 %v894_v61  ;;  %v885_v63 = vsub.f32 %v3303_v40, %v869_v62  ;;  %v217_v61 = vld [vmem:[%s3861_s2 + $0x1d8] sm:$0xff] }
 0x1ed   :  { %v896_v25 = vmul.f32 1.442695, %v885_v63 }
 0x1ef   :  { %2743 = vpow2.f32 %v896_v25 }
 0x1f5   :  { %v3453_v1 = vpop.eup %2741 }
 0x1f6   :  { %v912_v3 = vsel %vm857_vm2, %v3453_v1, 0.0 }
 0x1f7   :  { %913 = vadd.xlane.f32.xlu0 %v912_v3  ;;  %v2609_v3 = vpack.c.bf16 %v203_v59, %v202_v58  ;;  %v232_v58 = vld [vmem:[%s3861_s2 + $0x250] sm:$0xff]  ;;  %v233_v59 = vld [vmem:[%s3861_s2 + $0x258] sm:$0xff] }
 0x1f9   :  { %v3457_v4 = vpop.eup %2743 }
 0x1fa   :  { %v915_v5 = vsel %vm857_vm2, %v3457_v4, 0.0 }
 0x1fb   :  { %916 = vadd.xlane.f32.xlu1 %v915_v5  ;;  %v2630_v5 = vpack.c.bf16 %v217_v61, %v216_v60  ;;  %v2654_v61 = vpack.c.bf16 %v233_v59, %v232_v58  ;;  %v266_v58 = vld [vmem:[%s3861_s2 + $0x360] sm:$0xff]  ;;  %v267_v59 = vld [vmem:[%s3861_s2 + $0x368] sm:$0xff] }
 0x226   :  { %v872_v35 = vpop.xlane.xlu0 %871 }
 0x227   :  { %v875_v7 = vpop.xlane.xlu1 %874  ;;  %v886_v9 = vsub.f32 %v3309_v43, %v872_v35  ;;  %v204_v35 = vld [vmem:[%s3861_s2 + $0x170] sm:$0xff] }
 0x228   :  { %v887_v40 = vsub.f32 %v3313_v46, %v875_v7  ;;  %v190_v46 = vld [vmem:[%s3861_s2 + $0x100] sm:$0xff] }
 0x229   :  { %v898_v10 = vmul.f32 1.442695, %v886_v9  ;;  %v2591_v19 = vpack.c.bf16 %v191_v17, %v190_v46  ;;  %v205_v9 = vld [vmem:[%s3861_s2 + $0x178] sm:$0xff] }
 0x22a   :  { %v900_v11 = vmul.f32 1.442695, %v887_v40  ;;  %v219_v40 = vld [vmem:[%s3861_s2 + $0x1e8] sm:$0xff] }
 0x22b   :  { %2745 = vpow2.f32 %v898_v10 }
 0x22c   :  { %2747 = vpow2.f32 %v900_v11 }
 0x235   :  { %v3463_v12 = vpop.eup %2745 }
 0x236   :  { %v3465_v13 = vpop.eup %2747  ;;  %v918_v14 = vsel %vm857_vm2, %v3463_v12, 0.0 }
 0x237   :  { %v921_v15 = vsel %vm857_vm2, %v3465_v13, 0.0  ;;  %919 = vadd.xlane.f32.xlu0 %v918_v14 }
 0x238   :  { %922 = vadd.xlane.f32.xlu1 %v921_v15  ;;  %v220_v15 = vld [vmem:[%s3861_s2 + $0x1f0] sm:$0xff] }
 0x244   :  { %v908_v16 = vpop.xlane.xlu0 %907 }
 0x245   :  { %2749 = vrcp.f32 %v908_v16  ;;  %v221_v16 = vld [vmem:[%s3861_s2 + $0x1f8] sm:$0xff] }
 0x248   :  { %v911_v43 = vpop.xlane.xlu1 %910 }
 0x249   :  { %2751 = vrcp.f32 %v911_v43  ;;  %v2636_v43 = vpack.c.bf16 %v221_v16, %v220_v15 }
 0x24f   :  { %v2750_v18 = vpop.eup %2749 }
 0x250   :  { %v938_v21 = vmul.f32 %v2750_v18, %v3339_v2  ;;  %v194_v2 = vld [vmem:[%s3861_s2 + $0x120] sm:$0xff] }
 0x251   :  { %v2597_v33 = vpack.c.bf16 %v195_v30, %v194_v2  ;;  %v239_v2 = vld [vmem:[%s3861_s2 + $0x288] sm:$0xff]  ;;  %v225_v30 = vld [vmem:[%s3861_s2 + $0x218] sm:$0xff] }
 0x252   :  { %2103 = vmatmul.mubr.f32.vlgmr.msra.gmra.mrb[8].mxu0 %v938_v21 }
 0x253   :  { %v2752_v26 = vpop.eup %2751  ;;  %2592 = vmatpush3.bf16.msra.mxu0 %v2591_v19  ;;  %2172 = vmatprep.mubr.msk.f32.mxu0 %vm2770_vm0, %v2771_v6 }
 0x254   :  { %v939_v29 = vmul.f32 %v2752_v26, %v3353_v8  ;;  %2593 = vmatprep.subr.bf16.mxu0 %v2769_v0  ;;  %v196_v8 = vld [vmem:[%s3861_s2 + $0x130] sm:$0xff]  ;;  %v2639_v26 = vpack.c.bf16 %v223_v23, %v222_v22 }
 0x255   :  { %v2600_v39 = vpack.c.bf16 %v197_v36, %v196_v8  ;;  %v241_v8 = vld [vmem:[%s3861_s2 + $0x298] sm:$0xff]  ;;  %v226_v36 = vld [vmem:[%s3861_s2 + $0x220] sm:$0xff] }
 0x256   :  { %2138 = vmatmul.mubr.f32.vlgmr.msra.gmra.mrb[8].mxu1 %v939_v29  ;;  %v224_v29 = vld [vmem:[%s3861_s2 + $0x210] sm:$0xff] }
 0x257   :  { %2616 = vmatpush3.bf16.msra.mxu1 %v2615_v27  ;;  %2595 = vmatpush3.bf16.msra.mxu0 %v2594_v28  ;;  %v238_v27 = vld [vmem:[%s3861_s2 + $0x280] sm:$0xff] }
 0x258   :  { %2596 = vmatprep.subr.bf16.mxu0 %v2769_v0  ;;  %2617 = vmatprep.subr.bf16.mxu1 %v2769_v0  ;;  %v2663_v32 = vpack.c.bf16 %v239_v2, %v238_v27  ;;  %v257_v2 = vld [vmem:[%s3861_s2 + $0x318] sm:$0xff] }
 0x259   :  { %2207 = vmatprep.mubr.msk.f32.mxu1 %vm2770_vm0, %v2771_v6 }
 0x25b   :  { %2598 = vmatpush3.bf16.msra.mxu0 %v2597_v33  ;;  %2619 = vmatpush3.bf16.msra.mxu1 %v2618_v34  ;;  %v2642_v33 = vpack.c.bf16 %v225_v30, %v224_v29  ;;  %v272_v30 = vld [vmem:[%s3861_s2 + $0x390] sm:$0xff] }
 0x25c   :  { %2599 = vmatprep.subr.bf16.mxu0 %v2769_v0  ;;  %2620 = vmatprep.subr.bf16.mxu1 %v2769_v0 }
 0x25f   :  { %2601 = vmatpush3.bf16.msra.mxu0 %v2600_v39  ;;  %2622 = vmatpush3.bf16.msra.mxu1 %v2621_v41  ;;  %v2645_v39 = vpack.c.bf16 %v227_v37, %v226_v36  ;;  %v243_v41 = vld [vmem:[%s3861_s2 + $0x2a8] sm:$0xff]  ;;  %v260_v37 = vld [vmem:[%s3861_s2 + $0x330] sm:$0xff] }
 0x260   :  { %2602 = vmatprep.subr.bf16.mxu0 %v2769_v0  ;;  %2623 = vmatprep.subr.bf16.mxu1 %v2769_v0 }
 0x263   :  { %2604 = vmatpush3.bf16.msra.mxu0 %v2603_v48  ;;  %2625 = vmatpush3.bf16.msra.mxu1 %v2624_v49  ;;  %v244_v48 = vld [vmem:[%s3861_s2 + $0x2b0] sm:$0xff]  ;;  %v245_v49 = vld [vmem:[%s3861_s2 + $0x2b8] sm:$0xff] }
 0x264   :  { %2605 = vmatprep.subr.bf16.mxu0 %v2769_v0  ;;  %2626 = vmatprep.subr.bf16.mxu1 %v2769_v0  ;;  %v2672_v53 = vpack.c.bf16 %v245_v49, %v244_v48  ;;  %v2699_v48 = vpack.c.bf16 %v263_v44, %v262_v42 }
 0x266   :  { %v878_v62 = vpop.xlane.xlu0 %877 }
 0x267   :  { %v881_v63 = vpop.xlane.xlu1 %880  ;;  %v888_v25 = vsub.f32 %v3441_v52, %v878_v62  ;;  %2607 = vmatpush3.bf16.msra.mxu0 %v2606_v56  ;;  %2628 = vmatpush3.bf16.msra.mxu1 %v2627_v57  ;;  %v218_v52 = vld [vmem:[%s3861_s2 + $0x1e0] sm:$0xff]  ;;  %v247_v57 = vld [vmem:[%s3861_s2 + $0x2c8] sm:$0xff]  ;;  %v248_v62 = vld [vmem:[%s3861_s2 + $0x2d0] sm:$0xff] }
 0x268   :  { %v889_v7 = vsub.f32 %v3445_v55, %v881_v63  ;;  %2608 = vmatprep.subr.bf16.mxu0 %v2769_v0  ;;  %2629 = vmatprep.subr.bf16.mxu1 %v2769_v0  ;;  %v2612_v55 = vpack.c.bf16 %v205_v9, %v204_v35  ;;  %v2633_v14 = vpack.c.bf16 %v219_v40, %v218_v52  ;;  %v246_v56 = vld [vmem:[%s3861_s2 + $0x2c0] sm:$0xff]  ;;  %v249_v63 = vld [vmem:[%s3861_s2 + $0x2d8] sm:$0xff]  ;;  %v251_v9 = vld [vmem:[%s3861_s2 + $0x2e8] sm:$0xff] }
 0x269   :  { %v902_v10 = vmul.f32 1.442695, %v888_v25  ;;  %v2675_v60 = vpack.c.bf16 %v247_v57, %v246_v56  ;;  %v234_v25 = vld [vmem:[%s3861_s2 + $0x260] sm:$0xff]  ;;  %v236_v52 = vld [vmem:[%s3861_s2 + $0x270] sm:$0xff]  ;;  %v237_v40 = vld [vmem:[%s3861_s2 + $0x278] sm:$0xff]  ;;  %v2702_v56 = vpack.c.bf16 %v265_v51, %v264_v50 }
 0x26a   :  { %v904_v11 = vmul.f32 1.442695, %v889_v7  ;;  %v250_v7 = vld [vmem:[%s3861_s2 + $0x2e0] sm:$0xff] }
 0x26b   :  { %2753 = vpow2.f32 %v902_v10  ;;  %2610 = vmatpush3.bf16.msra.mxu0 %v2609_v3  ;;  %2631 = vmatpush3.bf16.msra.mxu1 %v2630_v5  ;;  %v235_v3 = vld [vmem:[%s3861_s2 + $0x268] sm:$0xff]  ;;  %v2678_v5 = vpack.c.bf16 %v249_v63, %v248_v62  ;;  %v2681_v10 = vpack.c.bf16 %v251_v9, %v250_v7  ;;  %v2705_v62 = vpack.c.bf16 %v267_v59, %v266_v58 }
 0x26c   :  { %2755 = vpow2.f32 %v904_v11  ;;  %2611 = vmatprep.subr.bf16.mxu0 %v2769_v0  ;;  %2632 = vmatprep.subr.bf16.mxu1 %v2769_v0  ;;  %v2657_v35 = vpack.c.bf16 %v235_v3, %v234_v25  ;;  %v2660_v11 = vpack.c.bf16 %v237_v40, %v236_v52  ;;  %v268_v25 = vld [vmem:[%s3861_s2 + $0x370] sm:$0xff]  ;;  %v269_v3 = vld [vmem:[%s3861_s2 + $0x378] sm:$0xff] }
 0x26d   :  { %v2708_v7 = vpack.c.bf16 %v269_v3, %v268_v25 }
 0x26f   :  { %2613 = vmatpush3.bf16.msra.mxu0 %v2612_v55  ;;  %2634 = vmatpush3.bf16.msra.mxu1 %v2633_v14  ;;  %v252_v55 = vld [vmem:[%s3861_s2 + $0x2f0] sm:$0xff]  ;;  %v253_v14 = vld [vmem:[%s3861_s2 + $0x2f8] sm:$0xff] }
 0x270   :  { %2635 = vmatprep.subr.bf16.mxu1 %v2769_v0  ;;  %2638 = vmatprep.subr.bf16.mxu0 %v2769_v0  ;;  %v2684_v15 = vpack.c.bf16 %v253_v14, %v252_v55 }
 0x273   :  { %2637 = vmatpush3.bf16.msra.mxu1 %v2636_v43 }
 0x274   :  { %2662 = vmatprep.subr.bf16.mxu1 %v2769_v0 }
 0x275   :  { %v3591_v46 = vpop.eup %2753 }
 0x276   :  { %v3593_v17 = vpop.eup %2755  ;;  %v924_v18 = vsel %vm857_vm2, %v3591_v46, 0.0 }
 0x277   :  { %v927_v19 = vsel %vm857_vm2, %v3593_v17, 0.0  ;;  %925 = vadd.xlane.f32.xlu0 %v924_v18  ;;  %v254_v18 = vld [vmem:[%s3861_s2 + $0x300] sm:$0xff] }
 0x278   :  { %928 = vadd.xlane.f32.xlu1 %v927_v19  ;;  %v255_v19 = vld [vmem:[%s3861_s2 + $0x308] sm:$0xff] }
 0x279   :  { %v2687_v23 = vpack.c.bf16 %v255_v19, %v254_v18 }
 0x284   :  { %v914_v20 = vpop.xlane.xlu0 %913 }
 0x285   :  { %2757 = vrcp.f32 %v914_v20  ;;  %v270_v20 = vld [vmem:[%s3861_s2 + $0x380] sm:$0xff] }
 0x288   :  { %v917_v21 = vpop.xlane.xlu1 %916 }
 0x289   :  { %2759 = vrcp.f32 %v917_v21  ;;  %v271_v21 = vld [vmem:[%s3861_s2 + $0x388] sm:$0xff] }
 0x28a   :  { %v2711_v27 = vpack.c.bf16 %v271_v21, %v270_v20 }
 0x28f   :  { %v2758_v24 = vpop.eup %2757 }
 0x290   :  { %v940_v28 = vmul.f32 %v2758_v24, %v3453_v1  ;;  %v240_v1 = vld [vmem:[%s3861_s2 + $0x290] sm:$0xff] }
 0x291   :  { %v2666_v38 = vpack.c.bf16 %v241_v8, %v240_v1  ;;  %v274_v1 = vld [vmem:[%s3861_s2 + $0x3a0] sm:$0xff] }
 0x292   :  { %2173 = vmatmul.mubr.f32.vlgmr.msra.gmra.mrb[10].mxu0 %v940_v28  ;;  %v256_v28 = vld [vmem:[%s3861_s2 + $0x310] sm:$0xff] }
 0x293   :  { %v2760_v31 = vpop.eup %2759  ;;  %2640 = vmatpush3.bf16.msra.mxu0 %v2639_v26  ;;  %2242 = vmatprep.mubr.msk.f32.mxu0 %vm2770_vm0, %v2771_v6 }
 0x294   :  { %v941_v34 = vmul.f32 %v2760_v31, %v3457_v4  ;;  %2641 = vmatprep.subr.bf16.mxu0 %v2769_v0  ;;  %v242_v4 = vld [vmem:[%s3861_s2 + $0x2a0] sm:$0xff]  ;;  %v273_v31 = vld [vmem:[%s3861_s2 + $0x398] sm:$0xff] }
 0x295   :  { %v2669_v45 = vpack.c.bf16 %v243_v41, %v242_v4 }
 0x296   :  { %2208 = vmatmul.mubr.f32.vlgmr.msra.gmra.mrb[10].mxu1 %v941_v34  ;;  %v275_v34 = vld [vmem:[%s3861_s2 + $0x3a8] sm:$0xff] }
 0x297   :  { %2664 = vmatpush3.bf16.msra.mxu1 %v2663_v32  ;;  %2643 = vmatpush3.bf16.msra.mxu0 %v2642_v33  ;;  %v2714_v32 = vpack.c.bf16 %v273_v31, %v272_v30  ;;  %v259_v33 = vld [vmem:[%s3861_s2 + $0x328] sm:$0xff]  ;;  %v2717_v36 = vpack.c.bf16 %v275_v34, %v274_v1 }
 0x298   :  { %2665 = vmatprep.subr.bf16.mxu1 %v2769_v0  ;;  %2644 = vmatprep.subr.bf16.mxu0 %v2769_v0 }
 0x299   :  { %2277 = vmatprep.mubr.msk.f32.mxu1 %vm2770_vm0, %v2771_v6 }
 0x29b   :  { %2667 = vmatpush3.bf16.msra.mxu1 %v2666_v38  ;;  %2646 = vmatpush3.bf16.msra.mxu0 %v2645_v39  ;;  %v261_v38 = vld [vmem:[%s3861_s2 + $0x338] sm:$0xff] }
 0x29c   :  { %2668 = vmatprep.subr.bf16.mxu1 %v2769_v0  ;;  %2647 = vmatprep.subr.bf16.mxu0 %v2769_v0  ;;  %v277_v39 = vld [vmem:[%s3861_s2 + $0x3b8] sm:$0xff]  ;;  %v2696_v4 = vpack.c.bf16 %v261_v38, %v260_v37 }
 0x29f   :  { %2670 = vmatpush3.bf16.msra.mxu1 %v2669_v45  ;;  %2649 = vmatpush3.bf16.msra.mxu0 %v2648_v47  ;;  %v278_v45 = vld [vmem:[%s3861_s2 + $0x3c0] sm:$0xff]  ;;  %v279_v47 = vld [vmem:[%s3861_s2 + $0x3c8] sm:$0xff] }
 0x2a0   :  { %2671 = vmatprep.subr.bf16.mxu1 %v2769_v0  ;;  %2650 = vmatprep.subr.bf16.mxu0 %v2769_v0  ;;  %v2723_v49 = vpack.c.bf16 %v279_v47, %v278_v45 }
 0x2a3   :  { %2673 = vmatpush3.bf16.msra.mxu1 %v2672_v53  ;;  %2652 = vmatpush3.bf16.msra.mxu0 %v2651_v54  ;;  %v280_v53 = vld [vmem:[%s3861_s2 + $0x3d0] sm:$0xff]  ;;  %v281_v54 = vld [vmem:[%s3861_s2 + $0x3d8] sm:$0xff] }
 0x2a4   :  { %2674 = vmatprep.subr.bf16.mxu1 %v2769_v0  ;;  %2653 = vmatprep.subr.bf16.mxu0 %v2769_v0  ;;  %v2726_v57 = vpack.c.bf16 %v281_v54, %v280_v53 }
 0x2a7   :  { %2676 = vmatpush3.bf16.msra.mxu1 %v2675_v60  ;;  %2655 = vmatpush3.bf16.msra.mxu0 %v2654_v61  ;;  %v282_v60 = vld [vmem:[%s3861_s2 + $0x3e0] sm:$0xff]  ;;  %v283_v61 = vld [vmem:[%s3861_s2 + $0x3e8] sm:$0xff] }
 0x2a8   :  { %2677 = vmatprep.subr.bf16.mxu1 %v2769_v0  ;;  %2656 = vmatprep.subr.bf16.mxu0 %v2769_v0  ;;  %v2729_v63 = vpack.c.bf16 %v283_v61, %v282_v60 }
 0x2ab   :  { %2679 = vmatpush3.bf16.msra.mxu1 %v2678_v5  ;;  %2658 = vmatpush3.bf16.msra.mxu0 %v2657_v35  ;;  %v284_v5 = vld [vmem:[%s3861_s2 + $0x3f0] sm:$0xff]  ;;  %v285_v35 = vld [vmem:[%s3861_s2 + $0x3f8] sm:$0xff] }
 0x2ac   :  { %2680 = vmatprep.subr.bf16.mxu1 %v2769_v0  ;;  %2659 = vmatprep.subr.bf16.mxu0 %v2769_v0  ;;  %v2732_v9 = vpack.c.bf16 %v285_v35, %v284_v5 }
 0x2af   :  { %2682 = vmatpush3.bf16.msra.mxu1 %v2681_v10  ;;  %2661 = vmatpush3.bf16.msra.mxu0 %v2660_v11 }
 0x2b0   :  { %2683 = vmatprep.subr.bf16.mxu1 %v2769_v0  ;;  %2686 = vmatprep.subr.bf16.mxu0 %v2769_v0 }
 0x2b3   :  { %2685 = vmatpush3.bf16.msra.mxu1 %v2684_v15 }
 0x2b4   :  { %2710 = vmatprep.subr.bf16.mxu1 %v2769_v0 }
 0x2c4   :  { %v920_v16 = vpop.xlane.xlu0 %919 }
 0x2c5   :  { %v923_v43 = vpop.xlane.xlu1 %922  ;;  %2761 = vrcp.f32 %v920_v16 }
 0x2c6   :  { %2763 = vrcp.f32 %v923_v43 }
 0x2cf   :  { %v2762_v22 = vpop.eup %2761 }
 0x2d0   :  { %v2764_v24 = vpop.eup %2763  ;;  %v942_v26 = vmul.f32 %v2762_v22, %v3463_v12  ;;  %v2690_v12 = vpack.c.bf16 %v257_v2, %v256_v28 }
 0x2d1   :  { %v943_v29 = vmul.f32 %v2764_v24, %v3465_v13  ;;  %v258_v13 = vld [vmem:[%s3861_s2 + $0x320] sm:$0xff] }
 0x2d2   :  { %2243 = vmatmul.mubr.f32.vlgmr.msra.gmra.mrb[12].mxu0 %v942_v26  ;;  %v2693_v8 = vpack.c.bf16 %v259_v33, %v258_v13 }
 0x2d3   :  { %2278 = vmatmul.mubr.f32.vlgmr.msra.gmra.mrb[12].mxu1 %v943_v29  ;;  %2688 = vmatpush3.bf16.msra.mxu0 %v2687_v23 }
 0x2d4   :  { %2712 = vmatpush3.bf16.msra.mxu1 %v2711_v27  ;;  %2689 = vmatprep.subr.bf16.mxu0 %v2769_v0 }
 0x2d5   :  { %2713 = vmatprep.subr.bf16.mxu1 %v2769_v0  ;;  %2312 = vmatprep.mubr.msk.f32.mxu0 %vm2770_vm0, %v2771_v6 }
 0x2d6   :  { %2347 = vmatprep.mubr.msk.f32.mxu1 %vm2770_vm0, %v2771_v6  ;;  %v276_v6 = vld [vmem:[%s3861_s2 + $0x3b0] sm:$0xff] }
 0x2d7   :  { %2691 = vmatpush3.bf16.msra.mxu0 %v2690_v12  ;;  %v2720_v41 = vpack.c.bf16 %v277_v39, %v276_v6 }
 0x2d8   :  { %2715 = vmatpush3.bf16.msra.mxu1 %v2714_v32  ;;  %2692 = vmatprep.subr.bf16.mxu0 %v2769_v0 }
 0x2d9   :  { %2716 = vmatprep.subr.bf16.mxu1 %v2769_v0 }
 0x2db   :  { %2694 = vmatpush3.bf16.msra.mxu0 %v2693_v8 }
 0x2dc   :  { %2718 = vmatpush3.bf16.msra.mxu1 %v2717_v36  ;;  %2695 = vmatprep.subr.bf16.mxu0 %v2769_v0 }
 0x2dd   :  { %2719 = vmatprep.subr.bf16.mxu1 %v2769_v0 }
 0x2df   :  { %2697 = vmatpush3.bf16.msra.mxu0 %v2696_v4 }
 0x2e0   :  { %2721 = vmatpush3.bf16.msra.mxu1 %v2720_v41  ;;  %2698 = vmatprep.subr.bf16.mxu0 %v2769_v0 }
 0x2e1   :  { %2722 = vmatprep.subr.bf16.mxu1 %v2769_v0 }
 0x2e3   :  { %2700 = vmatpush3.bf16.msra.mxu0 %v2699_v48 }
 0x2e4   :  { %2724 = vmatpush3.bf16.msra.mxu1 %v2723_v49  ;;  %2701 = vmatprep.subr.bf16.mxu0 %v2769_v0 }
 0x2e5   :  { %2725 = vmatprep.subr.bf16.mxu1 %v2769_v0 }
 0x2e7   :  { %2703 = vmatpush3.bf16.msra.mxu0 %v2702_v56 }
 0x2e8   :  { %2727 = vmatpush3.bf16.msra.mxu1 %v2726_v57  ;;  %2704 = vmatprep.subr.bf16.mxu0 %v2769_v0 }
 0x2e9   :  { %2728 = vmatprep.subr.bf16.mxu1 %v2769_v0 }
 0x2eb   :  { %2706 = vmatpush3.bf16.msra.mxu0 %v2705_v62 }
 0x2ec   :  { %2730 = vmatpush3.bf16.msra.mxu1 %v2729_v63  ;;  %2707 = vmatprep.subr.bf16.mxu0 %v2769_v0 }
 0x2ed   :  { %2731 = vmatprep.subr.bf16.mxu1 %v2769_v0 }
 0x2ef   :  { %2709 = vmatpush3.bf16.msra.mxu0 %v2708_v7 }
 0x2f0   :  { %2733 = vmatpush3.bf16.msra.mxu1 %v2732_v9 }
 0x304   :  { %v926_v52 = vpop.xlane.xlu0 %925 }
 0x305   :  { %v929_v40 = vpop.xlane.xlu1 %928  ;;  %2765 = vrcp.f32 %v926_v52 }
 0x306   :  { %2767 = vrcp.f32 %v929_v40 }
 0x30f   :  { %v2766_v10 = vpop.eup %2765 }
 0x310   :  { %v2768_v11 = vpop.eup %2767  ;;  %v944_v55 = vmul.f32 %v2766_v10, %v3591_v46 }
 0x311   :  { %v945_v14 = vmul.f32 %v2768_v11, %v3593_v17 }
 0x312   :  { %2313 = vmatmul.mubr.f32.vlgmr.msra.gmra.mrb[14].mxu0 %v944_v55 }
 0x313   :  { %2348 = vmatmul.mubr.f32.vlgmr.msra.gmra.mrb[14].mxu1 %v945_v14 }
 0x325   :  { %v1012_v15 = vpop.f32.mrb[8].mxu0 }
 0x326   :  { %1506 = vst [vmem:[%s3862_s3] sm:$0x1] %v1012_v15  ;;  %v2104_v0 = vpop.f32.mrb[9].mxu0 }
 0x329   :  { %v1082_v16 = vpop.f32.mrb[8].mxu1 }
 0x32a   :  { %1507 = vst [vmem:[%s3862_s3 + $0x1] sm:$0x1] %v1082_v16  ;;  %v2139_v43 = vpop.f32.mrb[9].mxu1 }
 0x365   :  { %v1152_v18 = vpop.f32.mrb[10].mxu0 }
 0x366   :  { %1508 = vst [vmem:[%s3862_s3 + $0x2] sm:$0x1] %v1152_v18  ;;  %v2174_v46 = vpop.f32.mrb[11].mxu0 }
 0x369   :  { %v1222_v17 = vpop.f32.mrb[10].mxu1 }
 0x36a   :  { %1509 = vst [vmem:[%s3862_s3 + $0x3] sm:$0x1] %v1222_v17  ;;  %v2209_v19 = vpop.f32.mrb[11].mxu1 }
 0x3a5   :  { %v1292_v20 = vpop.f32.mrb[12].mxu0 }
 0x3a6   :  { %1510 = vst [vmem:[%s3862_s3 + $0x4] sm:$0x1] %v1292_v20  ;;  %v1362_v21 = vpop.f32.mrb[12].mxu1  ;;  %v2244_v22 = vpop.f32.mrb[13].mxu0 }
 0x3a7   :  { %1511 = vst [vmem:[%s3862_s3 + $0x5] sm:$0x1] %v1362_v21  ;;  %v2279_v23 = vpop.f32.mrb[13].mxu1 }
 0x3e5   :  { %v1432_v24 = vpop.f32.mrb[14].mxu0 }
 0x3e6   :  { %1512 = vst [vmem:[%s3862_s3 + $0x6] sm:$0x1] %v1432_v24  ;;  %v1502_v26 = vpop.f32.mrb[14].mxu1  ;;  %v2314_v27 = vpop.f32.mrb[15].mxu0 }
 0x3e7   :  { %1513 = vst [vmem:[%s3862_s3 + $0x7] sm:$0x1] %v1502_v26  ;;  %v2349_v28 = vpop.f32.mrb[15].mxu1 }

</bundles_post_ra>
